<compile_context>
chip_gen: v7x
topology: tpu7x:2x2x1
jax: 0.10.0
libtpu: 0.0.40
codegen_flags: <defaults>
</compile_context>

<pallas_src>
import jax
import jax.numpy as jnp
from jax import lax
from jax.experimental import pallas as pl
from jax.experimental.pallas import tpu as pltpu

EMBED_DIM = 256
NUM_HEADS = 8
HEAD_DIM = EMBED_DIM // NUM_HEADS          # 32
FFN_DIM = 512
NUM_OUT_HEADS = 6
LN_EPS = 1e-5


def _round_up(x, m):
    return ((x + m - 1) // m) * m


def _layernorm(y, gamma, beta):
    mu = jnp.mean(y, axis=-1, keepdims=True)
    yc = y - mu
    var = jnp.mean(yc * yc, axis=-1, keepdims=True)
    return yc * lax.rsqrt(var + LN_EPS) * gamma + beta


def amatrix_decoder_kernel(
    xe_ref,                     # (BLK, E)        f32  ego (query) rows
    xa_ref,                     # (BLK*Ak, E)     bf16 agent (key/value) rows, flat
    wq_ref, bq_ref,             # (E, E) bf16 (1/sqrt(Dh) folded in), (1, E) f32
    wkv_ref, bkv_ref,           # (E, 2E) bf16 fused K|V, (1, 2E) f32
    wo_ref, bo_ref,             # (E, E) bf16, (1, E) f32
    w1_ref, b1_ref,             # (E, FFN) bf16, (1, FFN) f32
    w2_ref, b2_ref,             # (FFN, E) bf16, (1, E) f32
    g_ln_ref, b_ln_ref,         # (1, E) f32   CrossTransformer LayerNorm params
    hsum_ref, hsumT_ref,        # (E, H) bf16, (H, E) bf16  head-segment sum / broadcast
    wh_ref, bh_ref,             # (E, 6*S16) bf16, (1, 6*S16) f32  fused output heads
    gh_ref, bh_ln_ref,          # (1, 6*S16) f32 per-head LayerNorm params
    out_ref,                    # (BLK, 6*S16) f32
):
    E = EMBED_DIM
    H = NUM_HEADS
    bf = jnp.bfloat16

    xe = xe_ref[...]                                   # (BLK, E) f32, kept for residual
    xa2 = xa_ref[...]                                  # (BLK*Ak, E) bf16
    blk = xe.shape[0]
    ak = xa2.shape[0] // blk

    # ---- in-projections (bf16 operands, f32 MXU accumulation) -----------------
    q = jnp.dot(xe.astype(bf), wq_ref[...],
                preferred_element_type=jnp.float32) + bq_ref[...]            # (BLK, E), pre-scaled
    kv = jnp.dot(xa2, wkv_ref[...],
                 preferred_element_type=jnp.float32) + bkv_ref[...]          # (BLK*Ak, 2E)
    k2 = kv[:, :E]                                                           # (BLK*Ak, E) f32
    v2 = kv[:, E:]                                                           # (BLK*Ak, E) f32

    # ---- single-query multi-head attention (no per-head lane slicing) ---------
    # S[b, j, h] = sum_{d in head h} q[b, d] * k[b, j, d]
    q_rep = jnp.broadcast_to(q[:, None, :], (blk, ak, E)).reshape(blk * ak, E)   # f32, tile-aligned
    qk = q_rep.astype(bf) * k2.astype(bf)                                    # (BLK*Ak, E) bf16
    s = jnp.dot(qk, hsum_ref[...],
                preferred_element_type=jnp.float32).reshape(blk, ak, H)      # (BLK, Ak, H)
    m = jnp.max(s, axis=1, keepdims=True)                                    # (BLK, 1, H)
    p = jnp.exp(s - m)
    l = jnp.sum(p, axis=1, keepdims=True)
    p = p * pl.reciprocal(l, approx=True)                                    # softmax over keys
    # broadcast per-head probabilities back onto the E lanes, reduce over keys
    pe = jnp.dot(p.reshape(blk * ak, H).astype(bf), hsumT_ref[...],
                 preferred_element_type=jnp.float32)                         # (BLK*Ak, E) f32
    ctx = jnp.sum((pe * v2).reshape(blk, ak, E), axis=1)                     # (BLK, E) f32

    attn = jnp.dot(ctx.astype(bf), wo_ref[...],
                   preferred_element_type=jnp.float32) + bo_ref[...]         # (BLK, E)

    # ---- FFN (dropout = identity, eval mode) ----------------------------------
    h1 = jnp.dot(attn.astype(bf), w1_ref[...],
                 preferred_element_type=jnp.float32) + b1_ref[...]
    h1 = jnp.maximum(h1, 0.0)
    f = jnp.dot(h1.astype(bf), w2_ref[...],
                preferred_element_type=jnp.float32) + b2_ref[...]

    # ---- residual with the ORIGINAL query (f32) + LayerNorm over E -------------
    feat = _layernorm(f + xe, g_ln_ref[...], b_ln_ref[...])                  # (BLK, E)

    # ---- 6 decoding heads: one fused matmul, per-head LayerNorm ----------------
    z = jnp.dot(feat.astype(bf), wh_ref[...],
                preferred_element_type=jnp.float32) + bh_ref[...]            # (BLK, 6*S16)
    s16 = z.shape[-1] // NUM_OUT_HEADS
    for hd in range(NUM_OUT_HEADS):                                          # static, 128-aligned
        sl = slice(hd * s16, (hd + 1) * s16)
        out_ref[:, sl] = _layernorm(z[:, sl], gh_ref[:, sl],
                                    bh_ln_ref[:, sl]).astype(out_ref.dtype)


def init_params(key, steps):
    E, F = EMBED_DIM, FFN_DIM
    S16 = steps * 16
    ks = jax.random.split(key, 14 + 4 * NUM_OUT_HEADS)

    def w(k, shape, scale=0.05):
        return (scale * jax.random.normal(k, shape)).astype(jnp.float32)

    # PyTorch Linear computes x @ W.T; we store the already-transposed weights.
    p = dict(
        wq_t=w(ks[0], (E, E)), wk_t=w(ks[1], (E, E)), wv_t=w(ks[2], (E, E)),
        bq=w(ks[3], (1, E)), bk=w(ks[4], (1, E)), bv=w(ks[5], (1, E)),
        wo_t=w(ks[6], (E, E)), bo=w(ks[7], (1, E)),
        w1_t=w(ks[8], (E, F)), b1=w(ks[9], (1, F)),
        w2_t=w(ks[10], (F, E)), b2=w(ks[11], (1, E)),
        gamma=(1.0 + 0.1 * jax.random.normal(ks[12], (1, E))).astype(jnp.float32),
        beta=(0.1 * jax.random.normal(ks[13], (1, E))).astype(jnp.float32),
    )
    wh, bh, gh, bth = [], [], [], []
    for i in range(NUM_OUT_HEADS):
        k0, k1, k2, k3 = ks[14 + 4 * i: 18 + 4 * i]
        wh.append(w(k0, (E, S16)))
        bh.append(w(k1, (1, S16)))
        gh.append((1.0 + 0.1 * jax.random.normal(k2, (1, S16))).astype(jnp.float32))
        bth.append((0.1 * jax.random.normal(k3, (1, S16))).astype(jnp.float32))
    p.update(wh_t=wh, bh=bh, gh=gh, bth=bth)
    return p


def _prepare_kernel_args(params):
    """bf16 weight casts, 1/sqrt(Dh) folding, fused K|V, fused heads, bf16 head-sum matrices."""
    bf = jnp.bfloat16
    scale = 1.0 / (HEAD_DIM ** 0.5)
    # head-segment sum matrix: 0/1 entries -> exact in bf16
    hsum = jnp.repeat(jnp.eye(NUM_HEADS, dtype=jnp.float32), HEAD_DIM, axis=0)   # (E, H)
    wkv = jnp.concatenate([params['wk_t'], params['wv_t']], axis=1).astype(bf)   # (E, 2E)
    bkv = jnp.concatenate([params['bk'], params['bv']], axis=1)                  # (1, 2E)
    wh_all = jnp.concatenate(params['wh_t'], axis=1).astype(bf)                  # (E, 6*S16)
    bh_all = jnp.concatenate(params['bh'], axis=1)
    gh_all = jnp.concatenate(params['gh'], axis=1)
    bth_all = jnp.concatenate(params['bth'], axis=1)
    return (
        (params['wq_t'] * scale).astype(bf), params['bq'] * scale,
        wkv, bkv,
        params['wo_t'].astype(bf), params['bo'],
        params['w1_t'].astype(bf), params['b1'],
        params['w2_t'].astype(bf), params['b2'],
        params['gamma'], params['beta'],
        hsum.astype(bf), hsum.T.astype(bf),
        wh_all, bh_all, gh_all, bth_all,
    )


def amatrix_decoder(inputs, num, params, steps, block_b=128):
    """inputs: (B, N_agents, 256), num: static python int -> (B, 6, steps, 4, 4).

    block_b: batch rows processed per grid step.  Use >=128 at large B (MXU
    utilization); on v7x keep it small enough that the grid has >=2 steps so
    both TensorCores are used.  It is clamped to the (padded) batch size.
    """
    B, N, E = inputs.shape
    assert E == EMBED_DIM
    S16 = steps * 16
    OUT = NUM_OUT_HEADS * S16
    Ak = N - 1

    # TODO(synk): at very large B the ego/agent split + bf16 cast below could be
    #             folded into the kernel (row-skip BlockSpecs); low priority here.
    ego = inputs[:, num, :].astype(jnp.float32)                               # (B, E)
    agents = jnp.concatenate(
        [inputs[:, :num, :], inputs[:, num + 1:, :]], axis=1
    ).astype(jnp.bfloat16)                                                    # (B, Ak, E)

    # effective block size: never larger than the (8-padded) batch
    blk = max(8, min(_round_up(block_b, 8), _round_up(B, 8)))
    Bp = _round_up(B, blk)
    if Bp != B:
        ego = jnp.pad(ego, ((0, Bp - B), (0, 0)))
        agents = jnp.pad(agents, ((0, Bp - B), (0, 0), (0, 0)))
    agents2 = agents.reshape(Bp * Ak, E)                                      # flat bf16 slab

    weight_args = _prepare_kernel_args(params)

    # Replicated (constant-index) weight blocks are never re-fetched across
    # grid steps; total resident weights are only ~1.7 MiB.
    def replicated(a):
        return pl.BlockSpec(a.shape, lambda i, n=a.ndim: (0,) * n)

    # Default scoped VMEM (16/32 MiB) can be too small once blk >= 128 because
    # the f32 (blk*Ak, 256)/(blk*Ak, 512) intermediates are a few MiB each.
    vmem_limit = 48 * 1024 * 1024 if blk >= 128 else None

    out = pl.pallas_call(
        amatrix_decoder_kernel,
        out_shape=jax.ShapeDtypeStruct((Bp, OUT), jnp.float32),
        grid=(Bp // blk,),
        in_specs=[pl.BlockSpec((blk, E), lambda i: (i, 0)),
                  pl.BlockSpec((blk * Ak, E), lambda i: (i, 0)),
                  *[replicated(a) for a in weight_args]],
        out_specs=pl.BlockSpec((blk, OUT), lambda i: (i, 0)),
        compiler_params=pltpu.CompilerParams(
            dimension_semantics=("parallel",),
            vmem_limit_bytes=vmem_limit),
    )(ego, agents2, *weight_args)

    return out[:B].reshape(B, NUM_OUT_HEADS, steps, 4, 4)


def reference(inputs, num, params, steps):
    """Pure-JAX f32 replica of the PyTorch forward (eval mode)."""
    B, N, E = inputs.shape
    x = inputs.astype(jnp.float32)
    ego = x[:, num, :]                                                        # (B, E)
    agents = jnp.concatenate([x[:, :num, :], x[:, num + 1:, :]], axis=1)      # (B, Ak, E)
    Ak = N - 1
    H, Dh = NUM_HEADS, HEAD_DIM

    q = ego @ params['wq_t'] + params['bq']
    k = agents @ params['wk_t'] + params['bk']
    v = agents @ params['wv_t'] + params['bv']

    qh = q.reshape(B, H, Dh) / (Dh ** 0.5)
    kh = k.reshape(B, Ak, H, Dh)
    vh = v.reshape(B, Ak, H, Dh)
    s = jnp.einsum('bhd,bkhd->bhk', qh, kh)
    p = jax.nn.softmax(s, axis=-1)
    ctx = jnp.einsum('bhk,bkhd->bhd', p, vh).reshape(B, E)
    attn = ctx @ params['wo_t'] + params['bo']

    h1 = jax.nn.relu(attn @ params['w1_t'] + params['b1'])
    f = h1 @ params['w2_t'] + params['b2']
    feat = _layernorm(f + ego, params['gamma'], params['beta'])

    outs = []
    for i in range(NUM_OUT_HEADS):
        z = feat @ params['wh_t'][i] + params['bh'][i]
        zn = _layernorm(z, params['gh'][i], params['bth'][i])
        outs.append(zn.reshape(B, steps, 4, 4))
    return jnp.stack(outs, axis=1)


if __name__ == "__main__":
    B, N_AGENTS, NUM_IDX, STEPS = 16, 9, 3, 8        # agents -> Ak = 8 keys, steps*16 = 128
    key = jax.random.PRNGKey(0)
    kp, kx = jax.random.split(key)

    params = init_params(kp, STEPS)
    inputs = jax.random.normal(kx, (B, N_AGENTS, EMBED_DIM), dtype=jnp.float32)

    # small batch: use block_b=8 so the grid has 2 steps and the multi-block
    # path (index maps, replicated weights, pipelining) is exercised; at large
    # B the default block_b=128 fills the MXU.
    out = jax.block_until_ready(
        amatrix_decoder(inputs, NUM_IDX, params, STEPS, block_b=8))
    assert out.shape == (B, NUM_OUT_HEADS, STEPS, 4, 4)

    with jax.default_matmul_precision("float32"):
        ref = jax.block_until_ready(reference(inputs, NUM_IDX, params, STEPS))

    max_err = float(jnp.max(jnp.abs(out - ref)))
    # kernel runs matmuls with bf16 operands (f32 accumulation); outputs are
    # post-LayerNorm (unit scale), so a 5e-2 absolute tolerance is appropriate.
    assert max_err < 5e-2, f"max abs error vs reference: {max_err}"
    print("KERNEL_OK")
</pallas_src>

<mosaic_0001>
module attributes {stable_mosaic.version = 11 : i64} {
  func.func @amatrix_decoder_kernel(%arg0: i32, %arg1: memref<8x256xf32, #tpu.memory_space<vmem>>, %arg2: memref<64x256xbf16, #tpu.memory_space<vmem>>, %arg3: memref<256x256xbf16, #tpu.memory_space<vmem>>, %arg4: memref<1x256xf32, #tpu.memory_space<vmem>>, %arg5: memref<256x512xbf16, #tpu.memory_space<vmem>>, %arg6: memref<1x512xf32, #tpu.memory_space<vmem>>, %arg7: memref<256x256xbf16, #tpu.memory_space<vmem>>, %arg8: memref<1x256xf32, #tpu.memory_space<vmem>>, %arg9: memref<256x512xbf16, #tpu.memory_space<vmem>>, %arg10: memref<1x512xf32, #tpu.memory_space<vmem>>, %arg11: memref<512x256xbf16, #tpu.memory_space<vmem>>, %arg12: memref<1x256xf32, #tpu.memory_space<vmem>>, %arg13: memref<1x256xf32, #tpu.memory_space<vmem>>, %arg14: memref<1x256xf32, #tpu.memory_space<vmem>>, %arg15: memref<256x8xbf16, #tpu.memory_space<vmem>>, %arg16: memref<8x256xbf16, #tpu.memory_space<vmem>>, %arg17: memref<256x768xbf16, #tpu.memory_space<vmem>>, %arg18: memref<1x768xf32, #tpu.memory_space<vmem>>, %arg19: memref<1x768xf32, #tpu.memory_space<vmem>>, %arg20: memref<1x768xf32, #tpu.memory_space<vmem>>, %arg21: memref<8x768xf32, #tpu.memory_space<vmem>>) attributes {dimension_semantics = [#tpu.dimension_semantics<parallel>], iteration_bounds = array<i64: 2>, scalar_prefetch = 0 : i64, scratch_operands = 0 : i64, tpu.core_type = #tpu.core_type<tc>, window_params = [{transform_indices = @transform_0, window_bounds = array<i64: 8, 256>}, {transform_indices = @transform_1, window_bounds = array<i64: 64, 256>}, {pipeline_mode = #tpu.pipeline_mode<synchronous>, transform_indices = @transform_2, window_bounds = array<i64: 256, 256>}, {pipeline_mode = #tpu.pipeline_mode<synchronous>, transform_indices = @transform_3, window_bounds = array<i64: 1, 256>}, {pipeline_mode = #tpu.pipeline_mode<synchronous>, transform_indices = @transform_4, window_bounds = array<i64: 256, 512>}, {pipeline_mode = #tpu.pipeline_mode<synchronous>, transform_indices = @transform_5, window_bounds = array<i64: 1, 512>}, {pipeline_mode = #tpu.pipeline_mode<synchronous>, transform_indices = @transform_6, window_bounds = array<i64: 256, 256>}, {pipeline_mode = #tpu.pipeline_mode<synchronous>, transform_indices = @transform_7, window_bounds = array<i64: 1, 256>}, {pipeline_mode = #tpu.pipeline_mode<synchronous>, transform_indices = @transform_8, window_bounds = array<i64: 256, 512>}, {pipeline_mode = #tpu.pipeline_mode<synchronous>, transform_indices = @transform_9, window_bounds = array<i64: 1, 512>}, {pipeline_mode = #tpu.pipeline_mode<synchronous>, transform_indices = @transform_10, window_bounds = array<i64: 512, 256>}, {pipeline_mode = #tpu.pipeline_mode<synchronous>, transform_indices = @transform_11, window_bounds = array<i64: 1, 256>}, {pipeline_mode = #tpu.pipeline_mode<synchronous>, transform_indices = @transform_12, window_bounds = array<i64: 1, 256>}, {pipeline_mode = #tpu.pipeline_mode<synchronous>, transform_indices = @transform_13, window_bounds = array<i64: 1, 256>}, {pipeline_mode = #tpu.pipeline_mode<synchronous>, transform_indices = @transform_14, window_bounds = array<i64: 256, 8>}, {pipeline_mode = #tpu.pipeline_mode<synchronous>, transform_indices = @transform_15, window_bounds = array<i64: 8, 256>}, {pipeline_mode = #tpu.pipeline_mode<synchronous>, transform_indices = @transform_16, window_bounds = array<i64: 256, 768>}, {pipeline_mode = #tpu.pipeline_mode<synchronous>, transform_indices = @transform_17, window_bounds = array<i64: 1, 768>}, {pipeline_mode = #tpu.pipeline_mode<synchronous>, transform_indices = @transform_18, window_bounds = array<i64: 1, 768>}, {pipeline_mode = #tpu.pipeline_mode<synchronous>, transform_indices = @transform_19, window_bounds = array<i64: 1, 768>}, {transform_indices = @transform_20, window_bounds = array<i64: 8, 768>}]} {
    %c0 = arith.constant 0 : index
    %c0_0 = arith.constant 0 : index
    %0 = vector.load %arg1[%c0, %c0_0] : memref<8x256xf32, #tpu.memory_space<vmem>>, vector<8x256xf32>
    %c0_1 = arith.constant 0 : index
    %c0_2 = arith.constant 0 : index
    %1 = vector.load %arg2[%c0_1, %c0_2] : memref<64x256xbf16, #tpu.memory_space<vmem>>, vector<64x256xbf16>
    %2 = arith.truncf %0 : vector<8x256xf32> to vector<8x256xbf16>
    %c0_3 = arith.constant 0 : index
    %c0_4 = arith.constant 0 : index
    %3 = vector.load %arg3[%c0_3, %c0_4] : memref<256x256xbf16, #tpu.memory_space<vmem>>, vector<256x256xbf16>
    %cst = arith.constant dense<0.000000e+00> : vector<8x256xf32>
    %4 = tpu.matmul %2, %3, %cst {dimension_numbers = #tpu.dot_dimension_numbers<[1], [0], [0], [1], [0, 0, 1, 1], [], []>} : vector<8x256xbf16>, vector<256x256xbf16>, vector<8x256xf32> -> vector<8x256xf32>
    %c0_5 = arith.constant 0 : index
    %c0_6 = arith.constant 0 : index
    %5 = vector.load %arg4[%c0_5, %c0_6] : memref<1x256xf32, #tpu.memory_space<vmem>>, vector<1x256xf32>
    %6 = vector.broadcast %5 : vector<1x256xf32> to vector<8x256xf32>
    %7 = arith.addf %4, %6 : vector<8x256xf32>
    %c0_7 = arith.constant 0 : index
    %c0_8 = arith.constant 0 : index
    %8 = vector.load %arg5[%c0_7, %c0_8] : memref<256x512xbf16, #tpu.memory_space<vmem>>, vector<256x512xbf16>
    %cst_9 = arith.constant dense<0.000000e+00> : vector<64x512xf32>
    %9 = tpu.matmul %1, %8, %cst_9 {dimension_numbers = #tpu.dot_dimension_numbers<[1], [0], [0], [1], [0, 0, 1, 1], [], []>} : vector<64x256xbf16>, vector<256x512xbf16>, vector<64x512xf32> -> vector<64x512xf32>
    %c0_10 = arith.constant 0 : index
    %c0_11 = arith.constant 0 : index
    %10 = vector.load %arg6[%c0_10, %c0_11] : memref<1x512xf32, #tpu.memory_space<vmem>>, vector<1x512xf32>
    %11 = vector.broadcast %10 : vector<1x512xf32> to vector<64x512xf32>
    %12 = arith.addf %9, %11 : vector<64x512xf32>
    %13 = vector.extract_strided_slice %12 {offsets = [0, 0], sizes = [64, 256], strides = [1, 1]} : vector<64x512xf32> to vector<64x256xf32>
    %14 = vector.extract_strided_slice %12 {offsets = [0, 256], sizes = [64, 256], strides = [1, 1]} : vector<64x512xf32> to vector<64x256xf32>
    %15 = vector.shape_cast %7 : vector<8x256xf32> to vector<8x1x256xf32>
    %16 = vector.shape_cast %15 : vector<8x1x256xf32> to vector<8x1x256xf32>
    %17 = vector.broadcast %16 : vector<8x1x256xf32> to vector<8x8x256xf32>
    %18 = vector.shape_cast %17 : vector<8x8x256xf32> to vector<64x256xf32>
    %19 = arith.truncf %18 : vector<64x256xf32> to vector<64x256xbf16>
    %20 = arith.truncf %13 : vector<64x256xf32> to vector<64x256xbf16>
    %21 = arith.mulf %19, %20 : vector<64x256xbf16>
    %c0_12 = arith.constant 0 : index
    %c0_13 = arith.constant 0 : index
    %22 = vector.load %arg15[%c0_12, %c0_13] : memref<256x8xbf16, #tpu.memory_space<vmem>>, vector<256x8xbf16>
    %cst_14 = arith.constant dense<0.000000e+00> : vector<64x8xf32>
    %23 = tpu.matmul %21, %22, %cst_14 {dimension_numbers = #tpu.dot_dimension_numbers<[1], [0], [0], [1], [0, 0, 1, 1], [], []>} : vector<64x256xbf16>, vector<256x8xbf16>, vector<64x8xf32> -> vector<64x8xf32>
    %24 = vector.shape_cast %23 : vector<64x8xf32> to vector<8x8x8xf32>
    %cst_15 = arith.constant dense<0xFF800000> : vector<8x8xf32>
    %25 = vector.multi_reduction <maximumf>, %24, %cst_15 [1] : vector<8x8x8xf32> to vector<8x8xf32>
    %26 = vector.shape_cast %25 : vector<8x8xf32> to vector<8x1x8xf32>
    %27 = vector.broadcast %26 : vector<8x1x8xf32> to vector<8x8x8xf32>
    %28 = arith.subf %24, %27 : vector<8x8x8xf32>
    %29 = math.exp %28 : vector<8x8x8xf32>
    %cst_16 = arith.constant dense<0.000000e+00> : vector<8x8xf32>
    %30 = vector.multi_reduction <add>, %29, %cst_16 [1] : vector<8x8x8xf32> to vector<8x8xf32>
    %31 = vector.shape_cast %30 : vector<8x8xf32> to vector<8x1x8xf32>
    %32 = tpu.reciprocal %31 {approx = true} : vector<8x1x8xf32> -> vector<8x1x8xf32>
    %33 = vector.broadcast %32 : vector<8x1x8xf32> to vector<8x8x8xf32>
    %34 = arith.mulf %29, %33 : vector<8x8x8xf32>
    %35 = vector.shape_cast %34 : vector<8x8x8xf32> to vector<64x8xf32>
    %36 = arith.truncf %35 : vector<64x8xf32> to vector<64x8xbf16>
    %c0_17 = arith.constant 0 : index
    %c0_18 = arith.constant 0 : index
    %37 = vector.load %arg16[%c0_17, %c0_18] : memref<8x256xbf16, #tpu.memory_space<vmem>>, vector<8x256xbf16>
    %cst_19 = arith.constant dense<0.000000e+00> : vector<64x256xf32>
    %38 = tpu.matmul %36, %37, %cst_19 {dimension_numbers = #tpu.dot_dimension_numbers<[1], [0], [0], [1], [0, 0, 1, 1], [], []>} : vector<64x8xbf16>, vector<8x256xbf16>, vector<64x256xf32> -> vector<64x256xf32>
    %39 = arith.mulf %38, %14 : vector<64x256xf32>
    %40 = vector.shape_cast %39 : vector<64x256xf32> to vector<8x8x256xf32>
    %cst_20 = arith.constant dense<0.000000e+00> : vector<8x256xf32>
    %41 = vector.multi_reduction <add>, %40, %cst_20 [1] : vector<8x8x256xf32> to vector<8x256xf32>
    %42 = arith.truncf %41 : vector<8x256xf32> to vector<8x256xbf16>
    %c0_21 = arith.constant 0 : index
    %c0_22 = arith.constant 0 : index
    %43 = vector.load %arg7[%c0_21, %c0_22] : memref<256x256xbf16, #tpu.memory_space<vmem>>, vector<256x256xbf16>
    %cst_23 = arith.constant dense<0.000000e+00> : vector<8x256xf32>
    %44 = tpu.matmul %42, %43, %cst_23 {dimension_numbers = #tpu.dot_dimension_numbers<[1], [0], [0], [1], [0, 0, 1, 1], [], []>} : vector<8x256xbf16>, vector<256x256xbf16>, vector<8x256xf32> -> vector<8x256xf32>
    %c0_24 = arith.constant 0 : index
    %c0_25 = arith.constant 0 : index
    %45 = vector.load %arg8[%c0_24, %c0_25] : memref<1x256xf32, #tpu.memory_space<vmem>>, vector<1x256xf32>
    %46 = vector.broadcast %45 : vector<1x256xf32> to vector<8x256xf32>
    %47 = arith.addf %44, %46 : vector<8x256xf32>
    %48 = arith.truncf %47 : vector<8x256xf32> to vector<8x256xbf16>
    %c0_26 = arith.constant 0 : index
    %c0_27 = arith.constant 0 : index
    %49 = vector.load %arg9[%c0_26, %c0_27] : memref<256x512xbf16, #tpu.memory_space<vmem>>, vector<256x512xbf16>
    %cst_28 = arith.constant dense<0.000000e+00> : vector<8x512xf32>
    %50 = tpu.matmul %48, %49, %cst_28 {dimension_numbers = #tpu.dot_dimension_numbers<[1], [0], [0], [1], [0, 0, 1, 1], [], []>} : vector<8x256xbf16>, vector<256x512xbf16>, vector<8x512xf32> -> vector<8x512xf32>
    %c0_29 = arith.constant 0 : index
    %c0_30 = arith.constant 0 : index
    %51 = vector.load %arg10[%c0_29, %c0_30] : memref<1x512xf32, #tpu.memory_space<vmem>>, vector<1x512xf32>
    %52 = vector.broadcast %51 : vector<1x512xf32> to vector<8x512xf32>
    %53 = arith.addf %50, %52 : vector<8x512xf32>
    %cst_31 = arith.constant 0.000000e+00 : f32
    %54 = vector.broadcast %cst_31 : f32 to vector<8x512xf32>
    %55 = arith.maximumf %53, %54 : vector<8x512xf32>
    %56 = arith.truncf %55 : vector<8x512xf32> to vector<8x512xbf16>
    %c0_32 = arith.constant 0 : index
    %c0_33 = arith.constant 0 : index
    %57 = vector.load %arg11[%c0_32, %c0_33] : memref<512x256xbf16, #tpu.memory_space<vmem>>, vector<512x256xbf16>
    %cst_34 = arith.constant dense<0.000000e+00> : vector<8x256xf32>
    %58 = tpu.matmul %56, %57, %cst_34 {dimension_numbers = #tpu.dot_dimension_numbers<[1], [0], [0], [1], [0, 0, 1, 1], [], []>} : vector<8x512xbf16>, vector<512x256xbf16>, vector<8x256xf32> -> vector<8x256xf32>
    %c0_35 = arith.constant 0 : index
    %c0_36 = arith.constant 0 : index
    %59 = vector.load %arg12[%c0_35, %c0_36] : memref<1x256xf32, #tpu.memory_space<vmem>>, vector<1x256xf32>
    %60 = vector.broadcast %59 : vector<1x256xf32> to vector<8x256xf32>
    %61 = arith.addf %58, %60 : vector<8x256xf32>
    %62 = arith.addf %61, %0 : vector<8x256xf32>
    %c0_37 = arith.constant 0 : index
    %c0_38 = arith.constant 0 : index
    %63 = vector.load %arg13[%c0_37, %c0_38] : memref<1x256xf32, #tpu.memory_space<vmem>>, vector<1x256xf32>
    %c0_39 = arith.constant 0 : index
    %c0_40 = arith.constant 0 : index
    %64 = vector.load %arg14[%c0_39, %c0_40] : memref<1x256xf32, #tpu.memory_space<vmem>>, vector<1x256xf32>
    %cst_41 = arith.constant dense<0.000000e+00> : vector<8xf32>
    %65 = vector.multi_reduction <add>, %62, %cst_41 [1] : vector<8x256xf32> to vector<8xf32>
    %66 = vector.shape_cast %65 : vector<8xf32> to vector<8x1xf32>
    %cst_42 = arith.constant 2.560000e+02 : f32
    %67 = vector.broadcast %cst_42 : f32 to vector<8x1xf32>
    %68 = arith.divf %66, %67 : vector<8x1xf32>
    %69 = vector.broadcast %68 : vector<8x1xf32> to vector<8x256xf32>
    %70 = arith.subf %62, %69 : vector<8x256xf32>
    %71 = arith.mulf %70, %70 : vector<8x256xf32>
    %cst_43 = arith.constant dense<0.000000e+00> : vector<8xf32>
    %72 = vector.multi_reduction <add>, %71, %cst_43 [1] : vector<8x256xf32> to vector<8xf32>
    %73 = vector.shape_cast %72 : vector<8xf32> to vector<8x1xf32>
    %cst_44 = arith.constant 2.560000e+02 : f32
    %74 = vector.broadcast %cst_44 : f32 to vector<8x1xf32>
    %75 = arith.divf %73, %74 : vector<8x1xf32>
    %cst_45 = arith.constant 9.99999974E-6 : f32
    %76 = vector.broadcast %cst_45 : f32 to vector<8x1xf32>
    %77 = arith.addf %75, %76 : vector<8x1xf32>
    %78 = math.rsqrt %77 : vector<8x1xf32>
    %79 = vector.broadcast %78 : vector<8x1xf32> to vector<8x256xf32>
    %80 = arith.mulf %70, %79 : vector<8x256xf32>
    %81 = vector.broadcast %63 : vector<1x256xf32> to vector<8x256xf32>
    %82 = arith.mulf %80, %81 : vector<8x256xf32>
    %83 = vector.broadcast %64 : vector<1x256xf32> to vector<8x256xf32>
    %84 = arith.addf %82, %83 : vector<8x256xf32>
    %85 = arith.truncf %84 : vector<8x256xf32> to vector<8x256xbf16>
    %c0_46 = arith.constant 0 : index
    %c0_47 = arith.constant 0 : index
    %86 = vector.load %arg17[%c0_46, %c0_47] : memref<256x768xbf16, #tpu.memory_space<vmem>>, vector<256x768xbf16>
    %cst_48 = arith.constant dense<0.000000e+00> : vector<8x768xf32>
    %87 = tpu.matmul %85, %86, %cst_48 {dimension_numbers = #tpu.dot_dimension_numbers<[1], [0], [0], [1], [0, 0, 1, 1], [], []>} : vector<8x256xbf16>, vector<256x768xbf16>, vector<8x768xf32> -> vector<8x768xf32>
    %c0_49 = arith.constant 0 : index
    %c0_50 = arith.constant 0 : index
    %88 = vector.load %arg18[%c0_49, %c0_50] : memref<1x768xf32, #tpu.memory_space<vmem>>, vector<1x768xf32>
    %89 = vector.broadcast %88 : vector<1x768xf32> to vector<8x768xf32>
    %90 = arith.addf %87, %89 : vector<8x768xf32>
    %91 = vector.extract_strided_slice %90 {offsets = [0, 0], sizes = [8, 128], strides = [1, 1]} : vector<8x768xf32> to vector<8x128xf32>
    %c0_51 = arith.constant 0 : index
    %c0_52 = arith.constant 0 : index
    %92 = vector.load %arg19[%c0_51, %c0_52] : memref<1x768xf32, #tpu.memory_space<vmem>>, vector<1x128xf32>
    %c0_53 = arith.constant 0 : index
    %c0_54 = arith.constant 0 : index
    %93 = vector.load %arg20[%c0_53, %c0_54] : memref<1x768xf32, #tpu.memory_space<vmem>>, vector<1x128xf32>
    %cst_55 = arith.constant dense<0.000000e+00> : vector<8xf32>
    %94 = vector.multi_reduction <add>, %91, %cst_55 [1] : vector<8x128xf32> to vector<8xf32>
    %95 = vector.shape_cast %94 : vector<8xf32> to vector<8x1xf32>
    %cst_56 = arith.constant 1.280000e+02 : f32
    %96 = vector.broadcast %cst_56 : f32 to vector<8x1xf32>
    %97 = arith.divf %95, %96 : vector<8x1xf32>
    %98 = vector.broadcast %97 : vector<8x1xf32> to vector<8x128xf32>
    %99 = arith.subf %91, %98 : vector<8x128xf32>
    %100 = arith.mulf %99, %99 : vector<8x128xf32>
    %cst_57 = arith.constant dense<0.000000e+00> : vector<8xf32>
    %101 = vector.multi_reduction <add>, %100, %cst_57 [1] : vector<8x128xf32> to vector<8xf32>
    %102 = vector.shape_cast %101 : vector<8xf32> to vector<8x1xf32>
    %cst_58 = arith.constant 1.280000e+02 : f32
    %103 = vector.broadcast %cst_58 : f32 to vector<8x1xf32>
    %104 = arith.divf %102, %103 : vector<8x1xf32>
    %cst_59 = arith.constant 9.99999974E-6 : f32
    %105 = vector.broadcast %cst_59 : f32 to vector<8x1xf32>
    %106 = arith.addf %104, %105 : vector<8x1xf32>
    %107 = math.rsqrt %106 : vector<8x1xf32>
    %108 = vector.broadcast %107 : vector<8x1xf32> to vector<8x128xf32>
    %109 = arith.mulf %99, %108 : vector<8x128xf32>
    %110 = vector.broadcast %92 : vector<1x128xf32> to vector<8x128xf32>
    %111 = arith.mulf %109, %110 : vector<8x128xf32>
    %112 = vector.broadcast %93 : vector<1x128xf32> to vector<8x128xf32>
    %113 = arith.addf %111, %112 : vector<8x128xf32>
    %c0_60 = arith.constant 0 : index
    %c0_61 = arith.constant 0 : index
    %114 = vector.load %arg21[%c0_60, %c0_61] : memref<8x768xf32, #tpu.memory_space<vmem>>, vector<8x128xf32>
    tpu.vector_store %arg21[%c0_60, %c0_61], %113 {strides = array<i32>} : memref<8x768xf32, #tpu.memory_space<vmem>>, vector<8x128xf32>,
    %115 = vector.extract_strided_slice %90 {offsets = [0, 128], sizes = [8, 128], strides = [1, 1]} : vector<8x768xf32> to vector<8x128xf32>
    %c0_62 = arith.constant 0 : index
    %c128 = arith.constant 128 : index
    %116 = vector.load %arg19[%c0_62, %c128] : memref<1x768xf32, #tpu.memory_space<vmem>>, vector<1x128xf32>
    %c0_63 = arith.constant 0 : index
    %c128_64 = arith.constant 128 : index
    %117 = vector.load %arg20[%c0_63, %c128_64] : memref<1x768xf32, #tpu.memory_space<vmem>>, vector<1x128xf32>
    %cst_65 = arith.constant dense<0.000000e+00> : vector<8xf32>
    %118 = vector.multi_reduction <add>, %115, %cst_65 [1] : vector<8x128xf32> to vector<8xf32>
    %119 = vector.shape_cast %118 : vector<8xf32> to vector<8x1xf32>
    %cst_66 = arith.constant 1.280000e+02 : f32
    %120 = vector.broadcast %cst_66 : f32 to vector<8x1xf32>
    %121 = arith.divf %119, %120 : vector<8x1xf32>
    %122 = vector.broadcast %121 : vector<8x1xf32> to vector<8x128xf32>
    %123 = arith.subf %115, %122 : vector<8x128xf32>
    %124 = arith.mulf %123, %123 : vector<8x128xf32>
    %cst_67 = arith.constant dense<0.000000e+00> : vector<8xf32>
    %125 = vector.multi_reduction <add>, %124, %cst_67 [1] : vector<8x128xf32> to vector<8xf32>
    %126 = vector.shape_cast %125 : vector<8xf32> to vector<8x1xf32>
    %cst_68 = arith.constant 1.280000e+02 : f32
    %127 = vector.broadcast %cst_68 : f32 to vector<8x1xf32>
    %128 = arith.divf %126, %127 : vector<8x1xf32>
    %cst_69 = arith.constant 9.99999974E-6 : f32
    %129 = vector.broadcast %cst_69 : f32 to vector<8x1xf32>
    %130 = arith.addf %128, %129 : vector<8x1xf32>
    %131 = math.rsqrt %130 : vector<8x1xf32>
    %132 = vector.broadcast %131 : vector<8x1xf32> to vector<8x128xf32>
    %133 = arith.mulf %123, %132 : vector<8x128xf32>
    %134 = vector.broadcast %116 : vector<1x128xf32> to vector<8x128xf32>
    %135 = arith.mulf %133, %134 : vector<8x128xf32>
    %136 = vector.broadcast %117 : vector<1x128xf32> to vector<8x128xf32>
    %137 = arith.addf %135, %136 : vector<8x128xf32>
    %c0_70 = arith.constant 0 : index
    %c128_71 = arith.constant 128 : index
    %138 = vector.load %arg21[%c0_70, %c128_71] : memref<8x768xf32, #tpu.memory_space<vmem>>, vector<8x128xf32>
    tpu.vector_store %arg21[%c0_70, %c128_71], %137 {strides = array<i32>} : memref<8x768xf32, #tpu.memory_space<vmem>>, vector<8x128xf32>,
    %139 = vector.extract_strided_slice %90 {offsets = [0, 256], sizes = [8, 128], strides = [1, 1]} : vector<8x768xf32> to vector<8x128xf32>
    %c0_72 = arith.constant 0 : index
    %c256 = arith.constant 256 : index
    %140 = vector.load %arg19[%c0_72, %c256] : memref<1x768xf32, #tpu.memory_space<vmem>>, vector<1x128xf32>
    %c0_73 = arith.constant 0 : index
    %c256_74 = arith.constant 256 : index
    %141 = vector.load %arg20[%c0_73, %c256_74] : memref<1x768xf32, #tpu.memory_space<vmem>>, vector<1x128xf32>
    %cst_75 = arith.constant dense<0.000000e+00> : vector<8xf32>
    %142 = vector.multi_reduction <add>, %139, %cst_75 [1] : vector<8x128xf32> to vector<8xf32>
    %143 = vector.shape_cast %142 : vector<8xf32> to vector<8x1xf32>
    %cst_76 = arith.constant 1.280000e+02 : f32
    %144 = vector.broadcast %cst_76 : f32 to vector<8x1xf32>
    %145 = arith.divf %143, %144 : vector<8x1xf32>
    %146 = vector.broadcast %145 : vector<8x1xf32> to vector<8x128xf32>
    %147 = arith.subf %139, %146 : vector<8x128xf32>
    %148 = arith.mulf %147, %147 : vector<8x128xf32>
    %cst_77 = arith.constant dense<0.000000e+00> : vector<8xf32>
    %149 = vector.multi_reduction <add>, %148, %cst_77 [1] : vector<8x128xf32> to vector<8xf32>
    %150 = vector.shape_cast %149 : vector<8xf32> to vector<8x1xf32>
    %cst_78 = arith.constant 1.280000e+02 : f32
    %151 = vector.broadcast %cst_78 : f32 to vector<8x1xf32>
    %152 = arith.divf %150, %151 : vector<8x1xf32>
    %cst_79 = arith.constant 9.99999974E-6 : f32
    %153 = vector.broadcast %cst_79 : f32 to vector<8x1xf32>
    %154 = arith.addf %152, %153 : vector<8x1xf32>
    %155 = math.rsqrt %154 : vector<8x1xf32>
    %156 = vector.broadcast %155 : vector<8x1xf32> to vector<8x128xf32>
    %157 = arith.mulf %147, %156 : vector<8x128xf32>
    %158 = vector.broadcast %140 : vector<1x128xf32> to vector<8x128xf32>
    %159 = arith.mulf %157, %158 : vector<8x128xf32>
    %160 = vector.broadcast %141 : vector<1x128xf32> to vector<8x128xf32>
    %161 = arith.addf %159, %160 : vector<8x128xf32>
    %c0_80 = arith.constant 0 : index
    %c256_81 = arith.constant 256 : index
    %162 = vector.load %arg21[%c0_80, %c256_81] : memref<8x768xf32, #tpu.memory_space<vmem>>, vector<8x128xf32>
    tpu.vector_store %arg21[%c0_80, %c256_81], %161 {strides = array<i32>} : memref<8x768xf32, #tpu.memory_space<vmem>>, vector<8x128xf32>,
    %163 = vector.extract_strided_slice %90 {offsets = [0, 384], sizes = [8, 128], strides = [1, 1]} : vector<8x768xf32> to vector<8x128xf32>
    %c0_82 = arith.constant 0 : index
    %c384 = arith.constant 384 : index
    %164 = vector.load %arg19[%c0_82, %c384] : memref<1x768xf32, #tpu.memory_space<vmem>>, vector<1x128xf32>
    %c0_83 = arith.constant 0 : index
    %c384_84 = arith.constant 384 : index
    %165 = vector.load %arg20[%c0_83, %c384_84] : memref<1x768xf32, #tpu.memory_space<vmem>>, vector<1x128xf32>
    %cst_85 = arith.constant dense<0.000000e+00> : vector<8xf32>
    %166 = vector.multi_reduction <add>, %163, %cst_85 [1] : vector<8x128xf32> to vector<8xf32>
    %167 = vector.shape_cast %166 : vector<8xf32> to vector<8x1xf32>
    %cst_86 = arith.constant 1.280000e+02 : f32
    %168 = vector.broadcast %cst_86 : f32 to vector<8x1xf32>
    %169 = arith.divf %167, %168 : vector<8x1xf32>
    %170 = vector.broadcast %169 : vector<8x1xf32> to vector<8x128xf32>
    %171 = arith.subf %163, %170 : vector<8x128xf32>
    %172 = arith.mulf %171, %171 : vector<8x128xf32>
    %cst_87 = arith.constant dense<0.000000e+00> : vector<8xf32>
    %173 = vector.multi_reduction <add>, %172, %cst_87 [1] : vector<8x128xf32> to vector<8xf32>
    %174 = vector.shape_cast %173 : vector<8xf32> to vector<8x1xf32>
    %cst_88 = arith.constant 1.280000e+02 : f32
    %175 = vector.broadcast %cst_88 : f32 to vector<8x1xf32>
    %176 = arith.divf %174, %175 : vector<8x1xf32>
    %cst_89 = arith.constant 9.99999974E-6 : f32
    %177 = vector.broadcast %cst_89 : f32 to vector<8x1xf32>
    %178 = arith.addf %176, %177 : vector<8x1xf32>
    %179 = math.rsqrt %178 : vector<8x1xf32>
    %180 = vector.broadcast %179 : vector<8x1xf32> to vector<8x128xf32>
    %181 = arith.mulf %171, %180 : vector<8x128xf32>
    %182 = vector.broadcast %164 : vector<1x128xf32> to vector<8x128xf32>
    %183 = arith.mulf %181, %182 : vector<8x128xf32>
    %184 = vector.broadcast %165 : vector<1x128xf32> to vector<8x128xf32>
    %185 = arith.addf %183, %184 : vector<8x128xf32>
    %c0_90 = arith.constant 0 : index
    %c384_91 = arith.constant 384 : index
    %186 = vector.load %arg21[%c0_90, %c384_91] : memref<8x768xf32, #tpu.memory_space<vmem>>, vector<8x128xf32>
    tpu.vector_store %arg21[%c0_90, %c384_91], %185 {strides = array<i32>} : memref<8x768xf32, #tpu.memory_space<vmem>>, vector<8x128xf32>,
    %187 = vector.extract_strided_slice %90 {offsets = [0, 512], sizes = [8, 128], strides = [1, 1]} : vector<8x768xf32> to vector<8x128xf32>
    %c0_92 = arith.constant 0 : index
    %c512 = arith.constant 512 : index
    %188 = vector.load %arg19[%c0_92, %c512] : memref<1x768xf32, #tpu.memory_space<vmem>>, vector<1x128xf32>
    %c0_93 = arith.constant 0 : index
    %c512_94 = arith.constant 512 : index
    %189 = vector.load %arg20[%c0_93, %c512_94] : memref<1x768xf32, #tpu.memory_space<vmem>>, vector<1x128xf32>
    %cst_95 = arith.constant dense<0.000000e+00> : vector<8xf32>
    %190 = vector.multi_reduction <add>, %187, %cst_95 [1] : vector<8x128xf32> to vector<8xf32>
    %191 = vector.shape_cast %190 : vector<8xf32> to vector<8x1xf32>
    %cst_96 = arith.constant 1.280000e+02 : f32
    %192 = vector.broadcast %cst_96 : f32 to vector<8x1xf32>
    %193 = arith.divf %191, %192 : vector<8x1xf32>
    %194 = vector.broadcast %193 : vector<8x1xf32> to vector<8x128xf32>
    %195 = arith.subf %187, %194 : vector<8x128xf32>
    %196 = arith.mulf %195, %195 : vector<8x128xf32>
    %cst_97 = arith.constant dense<0.000000e+00> : vector<8xf32>
    %197 = vector.multi_reduction <add>, %196, %cst_97 [1] : vector<8x128xf32> to vector<8xf32>
    %198 = vector.shape_cast %197 : vector<8xf32> to vector<8x1xf32>
    %cst_98 = arith.constant 1.280000e+02 : f32
    %199 = vector.broadcast %cst_98 : f32 to vector<8x1xf32>
    %200 = arith.divf %198, %199 : vector<8x1xf32>
    %cst_99 = arith.constant 9.99999974E-6 : f32
    %201 = vector.broadcast %cst_99 : f32 to vector<8x1xf32>
    %202 = arith.addf %200, %201 : vector<8x1xf32>
    %203 = math.rsqrt %202 : vector<8x1xf32>
    %204 = vector.broadcast %203 : vector<8x1xf32> to vector<8x128xf32>
    %205 = arith.mulf %195, %204 : vector<8x128xf32>
    %206 = vector.broadcast %188 : vector<1x128xf32> to vector<8x128xf32>
    %207 = arith.mulf %205, %206 : vector<8x128xf32>
    %208 = vector.broadcast %189 : vector<1x128xf32> to vector<8x128xf32>
    %209 = arith.addf %207, %208 : vector<8x128xf32>
    %c0_100 = arith.constant 0 : index
    %c512_101 = arith.constant 512 : index
    %210 = vector.load %arg21[%c0_100, %c512_101] : memref<8x768xf32, #tpu.memory_space<vmem>>, vector<8x128xf32>
    tpu.vector_store %arg21[%c0_100, %c512_101], %209 {strides = array<i32>} : memref<8x768xf32, #tpu.memory_space<vmem>>, vector<8x128xf32>,
    %211 = vector.extract_strided_slice %90 {offsets = [0, 640], sizes = [8, 128], strides = [1, 1]} : vector<8x768xf32> to vector<8x128xf32>
    %c0_102 = arith.constant 0 : index
    %c640 = arith.constant 640 : index
    %212 = vector.load %arg19[%c0_102, %c640] : memref<1x768xf32, #tpu.memory_space<vmem>>, vector<1x128xf32>
    %c0_103 = arith.constant 0 : index
    %c640_104 = arith.constant 640 : index
    %213 = vector.load %arg20[%c0_103, %c640_104] : memref<1x768xf32, #tpu.memory_space<vmem>>, vector<1x128xf32>
    %cst_105 = arith.constant dense<0.000000e+00> : vector<8xf32>
    %214 = vector.multi_reduction <add>, %211, %cst_105 [1] : vector<8x128xf32> to vector<8xf32>
    %215 = vector.shape_cast %214 : vector<8xf32> to vector<8x1xf32>
    %cst_106 = arith.constant 1.280000e+02 : f32
    %216 = vector.broadcast %cst_106 : f32 to vector<8x1xf32>
    %217 = arith.divf %215, %216 : vector<8x1xf32>
    %218 = vector.broadcast %217 : vector<8x1xf32> to vector<8x128xf32>
    %219 = arith.subf %211, %218 : vector<8x128xf32>
    %220 = arith.mulf %219, %219 : vector<8x128xf32>
    %cst_107 = arith.constant dense<0.000000e+00> : vector<8xf32>
    %221 = vector.multi_reduction <add>, %220, %cst_107 [1] : vector<8x128xf32> to vector<8xf32>
    %222 = vector.shape_cast %221 : vector<8xf32> to vector<8x1xf32>
    %cst_108 = arith.constant 1.280000e+02 : f32
    %223 = vector.broadcast %cst_108 : f32 to vector<8x1xf32>
    %224 = arith.divf %222, %223 : vector<8x1xf32>
    %cst_109 = arith.constant 9.99999974E-6 : f32
    %225 = vector.broadcast %cst_109 : f32 to vector<8x1xf32>
    %226 = arith.addf %224, %225 : vector<8x1xf32>
    %227 = math.rsqrt %226 : vector<8x1xf32>
    %228 = vector.broadcast %227 : vector<8x1xf32> to vector<8x128xf32>
    %229 = arith.mulf %219, %228 : vector<8x128xf32>
    %230 = vector.broadcast %212 : vector<1x128xf32> to vector<8x128xf32>
    %231 = arith.mulf %229, %230 : vector<8x128xf32>
    %232 = vector.broadcast %213 : vector<1x128xf32> to vector<8x128xf32>
    %233 = arith.addf %231, %232 : vector<8x128xf32>
    %c0_110 = arith.constant 0 : index
    %c640_111 = arith.constant 640 : index
    %234 = vector.load %arg21[%c0_110, %c640_111] : memref<8x768xf32, #tpu.memory_space<vmem>>, vector<8x128xf32>
    tpu.vector_store %arg21[%c0_110, %c640_111], %233 {strides = array<i32>} : memref<8x768xf32, #tpu.memory_space<vmem>>, vector<8x128xf32>,
    return
  }
  func.func @transform_0(%arg0: i32) -> (i32, i32) {
    %c0_i32 = arith.constant 0 : i32
    %c0_i32_0 = arith.constant 0 : i32
    return %arg0, %c0_i32 : i32, i32
  }
  func.func @transform_1(%arg0: i32) -> (i32, i32) {
    %c0_i32 = arith.constant 0 : i32
    %c0_i32_0 = arith.constant 0 : i32
    return %arg0, %c0_i32 : i32, i32
  }
  func.func @transform_2(%arg0: i32) -> (i32, i32) {
    %c0_i32 = arith.constant 0 : i32
    %c0_i32_0 = arith.constant 0 : i32
    %c0_i32_1 = arith.constant 0 : i32
    return %c0_i32, %c0_i32_0 : i32, i32
  }
  func.func @transform_3(%arg0: i32) -> (i32, i32) {
    %c0_i32 = arith.constant 0 : i32
    %c0_i32_0 = arith.constant 0 : i32
    %c0_i32_1 = arith.constant 0 : i32
    return %c0_i32, %c0_i32_0 : i32, i32
  }
  func.func @transform_4(%arg0: i32) -> (i32, i32) {
    %c0_i32 = arith.constant 0 : i32
    %c0_i32_0 = arith.constant 0 : i32
    %c0_i32_1 = arith.constant 0 : i32
    return %c0_i32, %c0_i32_0 : i32, i32
  }
  func.func @transform_5(%arg0: i32) -> (i32, i32) {
    %c0_i32 = arith.constant 0 : i32
    %c0_i32_0 = arith.constant 0 : i32
    %c0_i32_1 = arith.constant 0 : i32
    return %c0_i32, %c0_i32_0 : i32, i32
  }
  func.func @transform_6(%arg0: i32) -> (i32, i32) {
    %c0_i32 = arith.constant 0 : i32
    %c0_i32_0 = arith.constant 0 : i32
    %c0_i32_1 = arith.constant 0 : i32
    return %c0_i32, %c0_i32_0 : i32, i32
  }
  func.func @transform_7(%arg0: i32) -> (i32, i32) {
    %c0_i32 = arith.constant 0 : i32
    %c0_i32_0 = arith.constant 0 : i32
    %c0_i32_1 = arith.constant 0 : i32
    return %c0_i32, %c0_i32_0 : i32, i32
  }
  func.func @transform_8(%arg0: i32) -> (i32, i32) {
    %c0_i32 = arith.constant 0 : i32
    %c0_i32_0 = arith.constant 0 : i32
    %c0_i32_1 = arith.constant 0 : i32
    return %c0_i32, %c0_i32_0 : i32, i32
  }
  func.func @transform_9(%arg0: i32) -> (i32, i32) {
    %c0_i32 = arith.constant 0 : i32
    %c0_i32_0 = arith.constant 0 : i32
    %c0_i32_1 = arith.constant 0 : i32
    return %c0_i32, %c0_i32_0 : i32, i32
  }
  func.func @transform_10(%arg0: i32) -> (i32, i32) {
    %c0_i32 = arith.constant 0 : i32
    %c0_i32_0 = arith.constant 0 : i32
    %c0_i32_1 = arith.constant 0 : i32
    return %c0_i32, %c0_i32_0 : i32, i32
  }
  func.func @transform_11(%arg0: i32) -> (i32, i32) {
    %c0_i32 = arith.constant 0 : i32
    %c0_i32_0 = arith.constant 0 : i32
    %c0_i32_1 = arith.constant 0 : i32
    return %c0_i32, %c0_i32_0 : i32, i32
  }
  func.func @transform_12(%arg0: i32) -> (i32, i32) {
    %c0_i32 = arith.constant 0 : i32
    %c0_i32_0 = arith.constant 0 : i32
    %c0_i32_1 = arith.constant 0 : i32
    return %c0_i32, %c0_i32_0 : i32, i32
  }
  func.func @transform_13(%arg0: i32) -> (i32, i32) {
    %c0_i32 = arith.constant 0 : i32
    %c0_i32_0 = arith.constant 0 : i32
    %c0_i32_1 = arith.constant 0 : i32
    return %c0_i32, %c0_i32_0 : i32, i32
  }
  func.func @transform_14(%arg0: i32) -> (i32, i32) {
    %c0_i32 = arith.constant 0 : i32
    %c0_i32_0 = arith.constant 0 : i32
    %c0_i32_1 = arith.constant 0 : i32
    return %c0_i32, %c0_i32_0 : i32, i32
  }
  func.func @transform_15(%arg0: i32) -> (i32, i32) {
    %c0_i32 = arith.constant 0 : i32
    %c0_i32_0 = arith.constant 0 : i32
    %c0_i32_1 = arith.constant 0 : i32
    return %c0_i32, %c0_i32_0 : i32, i32
  }
  func.func @transform_16(%arg0: i32) -> (i32, i32) {
    %c0_i32 = arith.constant 0 : i32
    %c0_i32_0 = arith.constant 0 : i32
    %c0_i32_1 = arith.constant 0 : i32
    return %c0_i32, %c0_i32_0 : i32, i32
  }
  func.func @transform_17(%arg0: i32) -> (i32, i32) {
    %c0_i32 = arith.constant 0 : i32
    %c0_i32_0 = arith.constant 0 : i32
    %c0_i32_1 = arith.constant 0 : i32
    return %c0_i32, %c0_i32_0 : i32, i32
  }
  func.func @transform_18(%arg0: i32) -> (i32, i32) {
    %c0_i32 = arith.constant 0 : i32
    %c0_i32_0 = arith.constant 0 : i32
    %c0_i32_1 = arith.constant 0 : i32
    return %c0_i32, %c0_i32_0 : i32, i32
  }
  func.func @transform_19(%arg0: i32) -> (i32, i32) {
    %c0_i32 = arith.constant 0 : i32
    %c0_i32_0 = arith.constant 0 : i32
    %c0_i32_1 = arith.constant 0 : i32
    return %c0_i32, %c0_i32_0 : i32, i32
  }
  func.func @transform_20(%arg0: i32) -> (i32, i32) {
    %c0_i32 = arith.constant 0 : i32
    %c0_i32_0 = arith.constant 0 : i32
    return %arg0, %c0_i32 : i32, i32
  }
}

</mosaic_0001>

<bundles_post_ra>
// kernel: tpu_custom_call.1
= control target key start
LH: loop header
LB: loop body
LE: loop exit
PB: predicated region body
PF: predicated region fallthrough
CT: control target
= control target key end

     0   :  { %s7277_s0 = inlined_call_operand.hbm [shape: f32[16,256], index: 0, kind: input, shape index: {}]   ;;  %s7278_s1 = inlined_call_operand.vmem [shape: bf16[128,256], index: 1, kind: input, shape index: {}]   ;;  %s7279_s2 = inlined_call_operand.hbm [shape: bf16[256,256], index: 2, kind: input, shape index: {}]   ;;  %s7280_s3 = inlined_call_operand.hbm [shape: f32[1,256], index: 3, kind: input, shape index: {}]   ;;  %s7281_s4 = inlined_call_operand.hbm [shape: bf16[256,512], index: 4, kind: input, shape index: {}]   ;;  %s7282_s5 = inlined_call_operand.hbm [shape: f32[1,512], index: 5, kind: input, shape index: {}]   ;;  %s7283_s6 = inlined_call_operand.hbm [shape: bf16[256,256], index: 6, kind: input, shape index: {}]   ;;  %s7284_s7 = inlined_call_operand.hbm [shape: f32[1,256], index: 7, kind: input, shape index: {}]   ;;  %s7285_s8 = inlined_call_operand.hbm [shape: bf16[256,512], index: 8, kind: input, shape index: {}]   ;;  %s7286_s9 = inlined_call_operand.vmem [shape: f32[1,512], index: 9, kind: input, shape index: {}]   ;;  %s7287_s10 = inlined_call_operand.hbm [shape: bf16[512,256], index: 10, kind: input, shape index: {}]   ;;  %s7288_s11 = inlined_call_operand.vmem [shape: f32[1,256], index: 11, kind: input, shape index: {}]   ;;  %s7289_s12 = inlined_call_operand.vmem [shape: f32[1,256], index: 12, kind: input, shape index: {}]   ;;  %s7290_s13 = inlined_call_operand.vmem [shape: f32[1,256], index: 13, kind: input, shape index: {}]   ;;  %s7291_s14 = inlined_call_operand.vmem [shape: bf16[256,8], index: 14, kind: input, shape index: {}]   ;;  %s7292_s15 = inlined_call_operand.vmem [shape: bf16[8,256], index: 15, kind: input, shape index: {}]   ;;  %s7293_s16 = inlined_call_operand.hbm [shape: bf16[256,768], index: 16, kind: input, shape index: {}]   ;;  %s7294_s17 = inlined_call_operand.vmem [shape: f32[1,768], index: 17, kind: input, shape index: {}]   ;;  %s7295_s18 = inlined_call_operand.vmem [shape: f32[1,768], index: 18, kind: input, shape index: {}]   ;;  %s7296_s19 = inlined_call_operand.vmem [shape: f32[1,768], index: 19, kind: input, shape index: {}]   ;;  %s7297_s20 = inlined_call_operand.hbm [shape: f32[16,768], index: 20, kind: output, shape index: {}]  }
   0x1   :  { %7314 = sst [smem:[#allocation27_spill]] %s7277_s0 }
   0x2   :  { %7315 = sst [smem:[#allocation28_spill]] %s7278_s1 }
   0x3   :  { %7316 = sst [smem:[#allocation29_spill]] %s7279_s2 }
   0x4   :  { %7317 = sst [smem:[#allocation30_spill]] %s7280_s3 }
   0x5   :  { %7318 = sst [smem:[#allocation31_spill]] %s7281_s4 }
   0x6   :  { %7319 = sst [smem:[#allocation32_spill]] %s7282_s5 }
   0x7   :  { %7320 = sst [smem:[#allocation33_spill]] %s7283_s6 }
   0x8   :  { %7321 = sst [smem:[#allocation34_spill]] %s7286_s9 }
   0x9   :  { %7322 = sst [smem:[#allocation35_spill]] %s7288_s11 }
   0xa   :  { %7323 = sst [smem:[#allocation36_spill]] %s7289_s12 }
   0xb   :  { %7324 = sst [smem:[#allocation37_spill]] %s7290_s13 }
   0xc   :  { %7325 = sst [smem:[#allocation38_spill]] %s7292_s15 }
   0xd   :  { %7326 = sst [smem:[#allocation39_spill]] %s7294_s17 }
   0xe   :  { %7327 = sst [smem:[#allocation40_spill]] %s7295_s18 }
   0xf   :  { %7328 = sst [smem:[#allocation41_spill]] %s7296_s19 }
  0x10   :  { %7329 = sst [smem:[#allocation42_spill]] %s7297_s20 }
  0x11   :  { %25 = vsyncpa [#allocation3], 0 }
  0x12   :  { %27 = vsyncpa [#allocation3 + $0x1], 0 }
  0x13   :  { %28 = vsyncpa [#allocation6], 0 }
  0x14   :  { %29 = vsyncpa [#allocation9], 0 }
  0x15   :  { %30 = vsyncpa [#allocation12], 0 }
  0x16   :  { %31 = vsyncpa [#allocation15], 0 }
  0x17   :  { %32 = vsyncpa [#allocation18], 0 }
  0x18   :  { %33 = vsyncpa [#allocation4], 0 }
  0x19   :  { %35 = vsyncpa [#allocation4 + $0x1], 0  ;;  %s6507_s1 = smov 0   ;;  %s6509_s22 = smov 0  }
  0x1a   :  { %s6511_s23 = smov 0   ;;  %s6513_s24 = smov 0  }
  0x1b LB: > { %s6383_s2 = smov [#allocation5]   ;;  %s6528_s3 = sadd.s32 4294967295, %s6381_s24   ;;  %s6381_s24 = sphi %s6513_s24, %s7375_s24   ;;  %s6377_s23 = sphi %s6511_s23, %s7374_s23   ;;  %s6373_s22 = sphi %s6509_s22, %s7373_s22   ;;  %s6369_s1 = sphi %s6507_s1, %s7372_s1  }
  0x1c   : > { %s514_s25 = sshll.u32 %s6383_s2, 4  ;;  %p4789_p0 = scmp.ge.s32.totalorder %s6381_s24, 1  ;;  %s6533_s25 = int_to_ptr.vmem [resolvable:$true] %s514_s25 }
  0x1d   : > { %p7307_p1 = scmp.eq.s32.totalorder %s6528_s3, 0  ;;  %p502_p2 = scmp.lt.s32.totalorder %s6381_s24, 3 }
  0x1e   : > { %s6384_s27 = smov [#allocation8]   ;;  %s6385_s29 = smov [#allocation11]  }
  0x1f   : > { %p6535_p3 = pnand %p4789_p0, %p502_p2  ;;  %s538_s28 = sshll.u32 %s6384_s27, 4  ;;  %s6548_s28 = int_to_ptr.vmem [resolvable:$true] %s538_s28 }
  0x20   : > { %s6550_s30 = sshll.u32 %s6385_s29, 4  ;;  %s7332_s2 = sld [smem:[#allocation29_spill]]  ;;  %s563_s30 = int_to_ptr.vmem [resolvable:$true] %s6550_s30 }
  0x21   : > { %s7330_s26 = scalar_select %p6535_p3, 1, 0 }
  0x22   : > { %p5299_p5 = pneg %p6535_p3 }
  0x24   : > { %p6544_p6 = pnand %p5299_p5, %p7307_p1 }
  0x26   : > { %s6013_s20 = scalar_lea.hbm %s7332_s2, 4096  ;;  %p6560_p8 = pneg %p6544_p6 }
  0x27   : > { %p6014_p7 = scmp.ne.s32.totalorder %s7332_s2, %s6013_s20  ;;  %p6020_p11 = scmp.lt.u32.totalorder %s6013_s20, %s7332_s2 }
  0x29   : > { %p6016_p9 = pnand %p6560_p8, %p6014_p7 }
  0x2b   : > { %p6017_p10 = pneg %p6016_p9 }
  0x2d   : > { %p6022_p12 = pnand %p6020_p11, %p6017_p10 }
  0x2f   : > { %6025 = shalt.err (!%p6022_p12)
}
  0x30   : > { %s6026_s18 = scalar_lea.vmem %s6533_s25, 4096  ;;  %p6034_p5 = scmp.lt.s32.totalorder %s6533_s25, %s6533_s25 }
  0x31   : > { %p6027_p13 = scmp.ne.s32.totalorder %s6533_s25, %s6026_s18  ;;  %p6035_p4 = scmp.lt.s32.totalorder %s6026_s18, %s6026_s18 }
  0x33   : > { %p6029_p0 = pnand %p6027_p13, %p6560_p8  ;;  %p6036_p7 = por %p6035_p4, %p6034_p5 }
  0x35   : > { %p6030_p2 = pneg %p6029_p0 }
  0x37   : > { %p6037_p9 = pnand %p6036_p7, %p6030_p2 }
  0x39   : > { %6040 = shalt.err (!%p6037_p9)
}
  0x3a   : > { %s7305_s19 = smov 128   ;;  %s7312_s17 = smov 8  }
  0x3b   : > { %5302 = dma.hbm_to_vmem [thread:$0]  (!%p6544_p6), %s7332_s2, 4096, %s6533_s25, [#allocation6], %s7305_s19, %s7305_s19, %s7312_s17  }
  0x3c   : > { %s7334_s13 = sld [smem:[#allocation31_spill]] }
  0x42   : > { %s6041_s18 = scalar_lea.hbm %s7334_s13, 8192 }
  0x43   : > { %p6042_p4 = scmp.ne.s32.totalorder %s7334_s13, %s6041_s18  ;;  %p6048_p12 = scmp.lt.u32.totalorder %s6041_s18, %s7334_s13 }
  0x45   : > { %p6044_p10 = pnand %p6042_p4, %p6560_p8 }
  0x47   : > { %p6045_p11 = pneg %p6044_p10 }
  0x49   : > { %p6050_p13 = pnand %p6048_p12, %p6045_p11 }
  0x4b   : > { %6053 = shalt.err (!%p6050_p13)
}
  0x4c   : > { %s6054_s25 = scalar_lea.vmem %s6548_s28, 8192  ;;  %p6062_p7 = scmp.lt.s32.totalorder %s6548_s28, %s6548_s28 }
  0x4d   : > { %p6055_p0 = scmp.ne.s32.totalorder %s6548_s28, %s6054_s25  ;;  %p6063_p9 = scmp.lt.s32.totalorder %s6054_s25, %s6054_s25 }
  0x4f   : > { %p6057_p2 = pnand %p6055_p0, %p6560_p8  ;;  %p6064_p4 = por %p6063_p9, %p6062_p7 }
  0x51   : > { %p6058_p5 = pneg %p6057_p2 }
  0x53   : > { %p6065_p10 = pnand %p6064_p4, %p6058_p5 }
  0x55   : > { %6068 = shalt.err (!%p6065_p10)
}
  0x56   : > { %s7309_s11 = smov 256   ;;  %s7310_s9 = smov 16  }
  0x57   : > { %5308 = dma.hbm_to_vmem [thread:$0]  (!%p6544_p6), %s7334_s13, 8192, %s6548_s28, [#allocation9], %s7309_s11, %s7309_s11, %s7310_s9  }
  0x58   : > { %s7335_s6 = sld [smem:[#allocation33_spill]] }
  0x5e   : > { %s6069_s21 = scalar_lea.hbm %s7335_s6, 4096 }
  0x5f   : > { %p6070_p11 = scmp.ne.s32.totalorder %s7335_s6, %s6069_s21  ;;  %p6076_p0 = scmp.lt.u32.totalorder %s6069_s21, %s7335_s6 }
  0x61   : > { %p6072_p12 = pnand %p6070_p11, %p6560_p8 }
  0x63   : > { %p6073_p13 = pneg %p6072_p12 }
  0x65   : > { %p6078_p2 = pnand %p6076_p0, %p6073_p13 }
  0x67   : > { %6081 = shalt.err (!%p6078_p2)
}
  0x68   : > { %s6082_s12 = scalar_lea.vmem %s563_s30, 4096  ;;  %p6090_p4 = scmp.lt.s32.totalorder %s563_s30, %s563_s30 }
  0x69   : > { %p6083_p5 = scmp.ne.s32.totalorder %s563_s30, %s6082_s12  ;;  %p6091_p10 = scmp.lt.s32.totalorder %s6082_s12, %s6082_s12 }
  0x6b   : > { %p6085_p7 = pnand %p6083_p5, %p6560_p8  ;;  %p6092_p1 = por %p6091_p10, %p6090_p4 }
  0x6d   : > { %p6086_p9 = pneg %p6085_p7 }
  0x6f   : > { %p6093_p3 = pnand %p6092_p1, %p6086_p9 }
  0x71   : > { %6096 = shalt.err (!%p6093_p3)
}
  0x72   : > { %s7336_s28 = smov 128   ;;  %s6390_s20 = smov [#allocation14]  }
  0x73   : > { %5314 = dma.hbm_to_vmem [thread:$0]  (!%p6544_p6), %s7335_s6, 4096, %s563_s30, [#allocation12], %s7336_s28, %s7336_s28, %s7312_s17  }
  0x74   : > { %s586_s0 = sshll.u32 %s6390_s20, 4  ;;  %s6391_s21 = smov [#allocation7]   ;;  %s587_s0 = int_to_ptr.vmem [resolvable:$true] %s586_s0 }
  0x75   : > { %s528_s29 = sshll.u32 %s6391_s21, 4  ;;  %s6097_s12 = scalar_lea.hbm %s7285_s8, 8192  ;;  %s529_s29 = int_to_ptr.vmem [resolvable:$true] %s528_s29 }
  0x76   : > { %p6098_p1 = scmp.ne.s32.totalorder %s7285_s8, %s6097_s12  ;;  %p6104_p12 = scmp.lt.u32.totalorder %s6097_s12, %s7285_s8 }
  0x78   : > { %p6100_p3 = pnand %p6098_p1, %p6560_p8 }
  0x7a   : > { %p6101_p11 = pneg %p6100_p3 }
  0x7c   : > { %p6106_p13 = pnand %p6104_p12, %p6101_p11 }
  0x7e   : > { %6109 = shalt.err (!%p6106_p13)
}
  0x7f   : > { %s6110_s30 = scalar_lea.vmem %s587_s0, 8192  ;;  %p6118_p7 = scmp.lt.s32.totalorder %s587_s0, %s587_s0 }
  0x80   : > { %p6111_p0 = scmp.ne.s32.totalorder %s587_s0, %s6110_s30  ;;  %p6119_p9 = scmp.lt.s32.totalorder %s6110_s30, %s6110_s30 }
  0x82   : > { %p6113_p2 = pnand %p6111_p0, %p6560_p8  ;;  %p6120_p4 = por %p6119_p9, %p6118_p7 }
  0x84   : > { %p6114_p5 = pneg %p6113_p2 }
  0x86   : > { %p6121_p10 = pnand %p6120_p4, %p6114_p5 }
  0x88   : > { %6124 = shalt.err (!%p6121_p10)
}
  0x89   : > { %s7337_s11 = smov 16   ;;  %s7338_s9 = smov 256  }
  0x8a   : > { %5320 = dma.hbm_to_vmem [thread:$0]  (!%p6544_p6), %s7285_s8, 8192, %s587_s0, [#allocation15], %s7338_s9, %s7338_s9, %s7337_s11  }
  0x8b   : > { %s7339_s18 = sld [smem:[#allocation30_spill]] }
  0x91   : > { %s6125_s25 = scalar_lea.hbm %s7339_s18, 32 }
  0x92   : > { %p6126_p1 = scmp.ne.s32.totalorder %s7339_s18, %s6125_s25  ;;  %p6132_p12 = scmp.lt.u32.totalorder %s6125_s25, %s7339_s18 }
  0x94   : > { %p6128_p3 = pnand %p6126_p1, %p6560_p8 }
  0x96   : > { %p6129_p11 = pneg %p6128_p3 }
  0x98   : > { %p6134_p13 = pnand %p6132_p12, %p6129_p11 }
  0x9a   : > { %6137 = shalt.err (!%p6134_p13)
}
  0x9b   : > { %s6138_s2 = scalar_lea.vmem %s529_s29, 32  ;;  %p6146_p7 = scmp.lt.s32.totalorder %s529_s29, %s529_s29 }
  0x9c   : > { %p6139_p0 = scmp.ne.s32.totalorder %s529_s29, %s6138_s2  ;;  %p6147_p9 = scmp.lt.s32.totalorder %s6138_s2, %s6138_s2 }
  0x9e   : > { %p6141_p2 = pnand %p6139_p0, %p6560_p8  ;;  %p6148_p4 = por %p6147_p9, %p6146_p7 }
  0xa0   : > { %p6142_p5 = pneg %p6141_p2 }
  0xa2   : > { %p6149_p10 = pnand %p6148_p4, %p6142_p5 }
  0xa4   : > { %6152 = shalt.err (!%p6149_p10)
}
  0xa5   : > { %5305 = dma.hbm_to_vmem [thread:$0]  (!%p6544_p6), %s7339_s18, 32, %s529_s29, [#allocation6]  }
  0xa6   : > { %s6392_s17 = smov [#allocation10]   ;;  %s6393_s15 = smov [#allocation13]  }
  0xa7   : > { %s552_s9 = sshll.u32 %s6392_s17, 4  ;;  %s576_s20 = sshll.u32 %s6393_s15, 4  ;;  %s553_s9 = int_to_ptr.vmem [resolvable:$true] %s552_s9  ;;  %s577_s20 = int_to_ptr.vmem [resolvable:$true] %s576_s20 }
  0xa8   : > { %s7340_s5 = sld [smem:[#allocation32_spill]] }
  0xae   : > { %s6153_s12 = scalar_lea.hbm %s7340_s5, 64 }
  0xaf   : > { %p6154_p1 = scmp.ne.s32.totalorder %s7340_s5, %s6153_s12  ;;  %p6160_p12 = scmp.lt.u32.totalorder %s6153_s12, %s7340_s5 }
  0xb1   : > { %p6156_p3 = pnand %p6154_p1, %p6560_p8 }
  0xb3   : > { %p6157_p11 = pneg %p6156_p3 }
  0xb5   : > { %p6162_p13 = pnand %p6160_p12, %p6157_p11 }
  0xb7   : > { %6165 = shalt.err (!%p6162_p13)
}
  0xb8   : > { %s6166_s29 = scalar_lea.vmem %s553_s9, 64  ;;  %p6174_p7 = scmp.lt.s32.totalorder %s553_s9, %s553_s9 }
  0xb9   : > { %p6167_p0 = scmp.ne.s32.totalorder %s553_s9, %s6166_s29  ;;  %p6175_p9 = scmp.lt.s32.totalorder %s6166_s29, %s6166_s29 }
  0xbb   : > { %p6169_p2 = pnand %p6167_p0, %p6560_p8  ;;  %p6176_p4 = por %p6175_p9, %p6174_p7 }
  0xbd   : > { %p6170_p5 = pneg %p6169_p2 }
  0xbf   : > { %p6177_p10 = pnand %p6176_p4, %p6170_p5 }
  0xc1   : > { %6180 = shalt.err (!%p6177_p10)
}
  0xc2   : > { %5311 = dma.hbm_to_vmem [thread:$0]  (!%p6544_p6), %s7340_s5, 64, %s553_s9, [#allocation9]  }
  0xc3   : > { %s6181_s25 = scalar_lea.hbm %s7284_s7, 32 }
  0xc4   : > { %p6182_p1 = scmp.ne.s32.totalorder %s7284_s7, %s6181_s25  ;;  %p6188_p12 = scmp.lt.u32.totalorder %s6181_s25, %s7284_s7 }
  0xc6   : > { %p6184_p3 = pnand %p6182_p1, %p6560_p8 }
  0xc8   : > { %p6185_p11 = pneg %p6184_p3 }
  0xca   : > { %p6190_p13 = pnand %p6188_p12, %p6185_p11 }
  0xcc   : > { %6193 = shalt.err (!%p6190_p13)
}
  0xcd   : > { %s6194_s0 = scalar_lea.vmem %s577_s20, 32  ;;  %p6202_p7 = scmp.lt.s32.totalorder %s577_s20, %s577_s20 }
  0xce   : > { %p6195_p0 = scmp.ne.s32.totalorder %s577_s20, %s6194_s0  ;;  %p6203_p9 = scmp.lt.s32.totalorder %s6194_s0, %s6194_s0 }
  0xd0   : > { %p6197_p2 = pnand %p6195_p0, %p6560_p8  ;;  %p6204_p4 = por %p6203_p9, %p6202_p7 }
  0xd2   : > { %p6198_p5 = pneg %p6197_p2 }
  0xd4   : > { %p6205_p10 = pnand %p6204_p4, %p6198_p5 }
  0xd6   : > { %6208 = shalt.err (!%p6205_p10)
}
  0xd7   : > { %5317 = dma.hbm_to_vmem [thread:$0]  (!%p6544_p6), %s7284_s7, 32, %s577_s20, [#allocation12]  }
  0xd8   : > { %s6394_s11 = smov [#allocation16]   ;;  %s6395_s15 = smov [#allocation17]  }
  0xd9   : > { %s602_s17 = sshll.u32 %s6394_s11, 4  ;;  %s630_s21 = sshll.u32 %s6395_s15, 4  ;;  %s603_s17 = int_to_ptr.vmem [resolvable:$true] %s602_s17  ;;  %s631_s21 = int_to_ptr.vmem [resolvable:$true] %s630_s21 }
  0xda   : > { %s6209_s19 = scalar_lea.hbm %s7287_s10, 8192 }
  0xdb   : > { %p6210_p1 = scmp.ne.s32.totalorder %s7287_s10, %s6209_s19  ;;  %p6216_p12 = scmp.lt.u32.totalorder %s6209_s19, %s7287_s10 }
  0xdd   : > { %p6212_p3 = pnand %p6210_p1, %p6560_p8 }
  0xdf   : > { %p6213_p11 = pneg %p6212_p3 }
  0xe1   : > { %p6218_p13 = pnand %p6216_p12, %p6213_p11 }
  0xe3   : > { %6221 = shalt.err (!%p6218_p13)
}
  0xe4   : > { %s6222_s20 = scalar_lea.vmem %s603_s17, 8192  ;;  %p6230_p7 = scmp.lt.s32.totalorder %s603_s17, %s603_s17 }
  0xe5   : > { %p6223_p0 = scmp.ne.s32.totalorder %s603_s17, %s6222_s20  ;;  %p6231_p9 = scmp.lt.s32.totalorder %s6222_s20, %s6222_s20 }
  0xe7   : > { %p6225_p2 = pnand %p6223_p0, %p6560_p8  ;;  %p6232_p4 = por %p6231_p9, %p6230_p7 }
  0xe9   : > { %p6226_p5 = pneg %p6225_p2 }
  0xeb   : > { %p6233_p10 = pnand %p6232_p4, %p6226_p5 }
  0xed   : > { %6236 = shalt.err (!%p6233_p10)
}
  0xee   : > { %s7341_s29 = smov 8   ;;  %s6237_s19 = scalar_lea.hbm %s7293_s16, 12288 }
  0xef   : > { %5323 = dma.hbm_to_vmem [thread:$0]  (!%p6544_p6), %s7287_s10, 8192, %s603_s17, [#allocation15], %s7336_s28, %s7336_s28, %s7341_s29  }
  0xf0   : > { %p6238_p1 = scmp.ne.s32.totalorder %s7293_s16, %s6237_s19  ;;  %p6244_p12 = scmp.lt.u32.totalorder %s6237_s19, %s7293_s16 }
  0xf2   : > { %p6240_p3 = pnand %p6238_p1, %p6560_p8 }
  0xf4   : > { %p6241_p11 = pneg %p6240_p3 }
  0xf6   : > { %p6246_p13 = pnand %p6244_p12, %p6241_p11 }
  0xf8   : > { %6249 = shalt.err (!%p6246_p13)
}
  0xf9   : > { %s6250_s20 = scalar_lea.vmem %s631_s21, 12288  ;;  %p6258_p7 = scmp.lt.s32.totalorder %s631_s21, %s631_s21 }
  0xfa   : > { %p6251_p0 = scmp.ne.s32.totalorder %s631_s21, %s6250_s20  ;;  %p6259_p9 = scmp.lt.s32.totalorder %s6250_s20, %s6250_s20 }
  0xfc   : > { %p6253_p2 = pnand %p6251_p0, %p6560_p8  ;;  %p6260_p4 = por %p6259_p9, %p6258_p7 }
  0xfe   : > { %p6254_p5 = pneg %p6253_p2 }
 0x100   : > { %p6261_p10 = pnand %p6260_p4, %p6254_p5 }
 0x102   : > { %6264 = shalt.err (!%p6261_p10)
}
 0x103   : > { %s6396_s28 = smov 384   ;;  %s6397_s27 = smov 24  }
 0x104   : > { %5326 = dma.hbm_to_vmem [thread:$0]  (!%p6544_p6), %s7293_s16, 12288, %s631_s21, [#allocation18], %s6396_s28, %s6396_s28, %s6397_s27  }
 0x105   : > { %s4788_s11 = sadd.s32 4294967294, %s6381_s24   ;;  %s6748_s15 = sadd.s32 1, %s6381_s24  }
 0x106   : > { %s48_s25 = sadd.s32 1, %s6377_s23  ;;  %s45_s12 = ssub.s32 %s6381_s24, %s6748_s15 }
 0x107   : > { %p55_p8 = scmp.ne.s32.totalorder %s6377_s23, %s6373_s22  ;;  %p46_p1 = scmp.eq.s32.totalorder %s45_s12, 0 }
 0x108   : > { %p56_p3 = scmp.eq.s32.totalorder %s6381_s24, 0  ;;  %p61_p11 = scmp.ne.s32.totalorder %s6373_s22, %s6369_s1 }
 0x109   : > { %p489_p12 = scmp.eq.s32.totalorder %s6528_s3, 1  ;;  %p7342_p0 = scmp.eq.s32.totalorder %s6528_s3, 0 }
 0x10a   : > { %s6760_s19 = scalar_select %p46_p1, %s6377_s23, %s48_s25  }
 0x10b   : > { %p57_p13 = por %p56_p3, %p55_p8  ;;  %p6764_p2 = por %p7342_p0, %p61_p11 }
 0x10c   : > { %p6768_p6 = por %p489_p12, %p55_p8  ;;  %p495_p5 = scmp.eq.s32.totalorder %s4788_s11, 1 }
 0x10d   : > { %p5344_p7 = scmp.lt.s32.totalorder %s6381_s24, 2  ;;  %s653_s30 = sand.u32 1, %s6377_s23  }
 0x10e   : > { %s7344_s21 = scalar_select %p6768_p6, 1, 0 }
 0x10f   : > { %p6774_p9 = por %p495_p5, %p61_p11  ;;  %s4800_s0 = sshll.u32 %s653_s30, 4 }
 0x110   : > { %s5215_s9 = sshll.u32 %s6381_s24, 8  ;;  %s7346_s27 = sld [smem:[#allocation27_spill]] }
 0x111   : > { %s7345_s2 = scalar_select %p6774_p9, 1, 0 }
 0x112   : > { %s657_s29 = scalar_lea.vmem [#allocation2], %s4800_s0  ;;  %p6784_p4 = pnand %p5344_p7, %p57_p13 }
 0x113   : > { %s665_s25 = sshll.u32 %s657_s29, 4  ;;  %s654_s12 = scalar_lea.sflag [#allocation3], %s653_s30  ;;  %s6788_s25 = int_to_ptr.vmem [resolvable:$true] %s665_s25 }
 0x114   : > { %p6267_p8 = pneg %p6784_p4 }
 0x116   : > { %s6782_s17 = scalar_lea.hbm %s7346_s27, %s5215_s9  ;;  %s6270_s20 = scalar_lea.hbm %s7346_s27, 512 }
 0x117   : > { %s6265_s5 = scalar_lea.hbm %s6782_s17, 256  ;;  %p6271_p11 = scmp.lt.u32.totalorder %s6782_s17, %s7346_s27 }
 0x118   : > { %p6266_p10 = scmp.ne.s32.totalorder %s6782_s17, %s6265_s5  ;;  %p6272_p12 = scmp.lt.u32.totalorder %s6270_s20, %s6265_s5 }
 0x119   : > { %p6274_p0 = scmp.lt.u32.totalorder %s6265_s5, %s6782_s17 }
 0x11a   : > { %p6268_p1 = pnand %p6267_p8, %p6266_p10  ;;  %p6273_p13 = por %p6272_p12, %p6271_p11 }
 0x11c   : > { %p6269_p3 = pneg %p6268_p1  ;;  %p6275_p5 = por %p6274_p0, %p6273_p13 }
 0x11e   : > { %p6276_p7 = pnand %p6275_p5, %p6269_p3 }
 0x120   : > { %6279 = shalt.err (!%p6276_p7)
}
 0x121   : > { %s6280_s30 = scalar_lea.vmem %s6788_s25, 256  ;;  %s6398_s9 = smov [#allocation2]  }
 0x122   : > { %p6281_p10 = scmp.ne.s32.totalorder %s6788_s25, %s6280_s30  ;;  %s6285_s0 = sshll.u32 %s6398_s9, 4  ;;  %s6286_s0 = int_to_ptr.vmem [resolvable:$false] %s6285_s0 }
 0x123   : > { %s6287_s28 = scalar_lea.vmem %s6286_s0, 512  ;;  %p6288_p6 = scmp.lt.s32.totalorder %s6788_s25, %s6286_s0 }
 0x124   : > { %p6283_p1 = pnand %p6281_p10, %p6267_p8  ;;  %p6289_p11 = scmp.lt.s32.totalorder %s6287_s28, %s6280_s30 }
 0x126   : > { %p6284_p9 = pneg %p6283_p1  ;;  %p6290_p12 = por %p6289_p11, %p6288_p6 }
 0x128   : > { %p6291_p13 = pnand %p6290_p12, %p6284_p9 }
 0x12a   : > { %6294 = shalt.err (!%p6291_p13)
}
 0x12b   : > { %5330 = dma.hbm_to_vmem [thread:$0]  (!%p6784_p4), %s6782_s17, 256, %s6788_s25, %s654_s12  }
 0x12c   : > { %p7348_p3 = scmp.ne.s32.totalorder %s7330_s26, 0 }
 0x12d   : > { %s6818_s5 = sand.u32 (!%p7348_p3), 1, %s6373_s22  }
 0x12e   : > { %684 = sbr.rel (%p7348_p3) target bundleno = 2737 (0xab1), region = 100  ;;  %s4804_s20 = sshll.u32 (!%p7348_p3), %s6818_s5, 4 }
 0x12f   : > { %s687_s29 = scalar_lea.sflag (!%p7348_p3), [#allocation3], %s6818_s5  ;;  %s6822_s30 = scalar_lea.vmem (!%p7348_p3), [#allocation2], %s4804_s20 }
 0x135   : > { %6340 = dma.done.wait (%p6764_p2), %s687_s29, 256  }
 0x136   : > { %6342 = vsyncadd (%p6764_p2), %s687_s29, 4294967040  ;;  %p7349_p6 = scmp.eq.s32.totalorder %s6528_s3, 0 }
 0x138   : > { %6344 = dma.done.wait (%p7349_p6), [#allocation6], 4128   ;;  %p7350_p9 = pmov %p7349_p6 }
 0x139   : > { %p7351_p4 = pmov %p7349_p6 }
 0x13a   : > { %6346 = vsyncadd (%p7350_p9), [#allocation6], 4294963168 }
 0x13b   : > { %6348 = dma.done.wait (%p7351_p4), [#allocation9], 8256   ;;  %p7352_p8 = pmov %p7351_p4 }
 0x13c   : > { %p7353_p0 = pmov %p7351_p4 }
 0x13d   : > { %6350 = vsyncadd (%p7352_p8), [#allocation9], 4294959040 }
 0x13e   : > { %6352 = dma.done.wait (%p7353_p0), [#allocation12], 4128   ;;  %p7354_p5 = pmov %p7353_p0 }
 0x13f   : > { %p7355_p2 = pmov %p7353_p0 }
 0x140   : > { %6354 = vsyncadd (%p7354_p5), [#allocation12], 4294963168 }
 0x141   : > { %6356 = dma.done.wait (%p7355_p2), [#allocation15], 16384   ;;  %p7356_p7 = pmov %p7353_p0 }
 0x142   : > { %p7357_p10 = pmov %p7353_p0 }
 0x143   : > { %6358 = vsyncadd (%p7356_p7), [#allocation15], 4294950912 }
 0x144   : > { %6360 = dma.done.wait (%p7357_p10), [#allocation18], 12288   ;;  %p7358_p1 = pmov %p7353_p0 }
 0x145   : > { %v5404_v0 = vld [vmem:[#allocation5 + $0x4] ss:$8 sps:$4 sm:$0xff]   ;;  %v5408_v2 = vld [vmem:[#allocation5] ss:$8 sps:$4 sm:$0xff]   ;;  %v5410_v4 = vld [vmem:[#allocation5 + $0x14] ss:$8 sps:$4 sm:$0xff]  }
 0x146   : > { %6362 = vsyncadd (%p7358_p1), [#allocation18], 4294955008  ;;  %v5406_v1 = vld [vmem:[#allocation8 + $0x4] ss:$16 sps:$4 sm:$0xff]   ;;  %1013 = vmatprep.subr.bf16.mxu0 %v5404_v0  ;;  %v5409_v3 = vld [vmem:[#allocation8] ss:$16 sps:$4 sm:$0xff]  }
 0x147   : > { %1500 = vmatprep.subr.bf16.mxu1 %v5406_v1  ;;  %1014 = vmatpush1.bf16.msra.mxu0 %v5408_v2  ;;  %v5412_v5 = vld [vmem:[#allocation8 + $0x24] ss:$16 sps:$4 sm:$0xff]   ;;  %v5415_v7 = vld [vmem:[#allocation8 + $0x20] ss:$16 sps:$4 sm:$0xff]   ;;  %s4814_s26 = sshll.u32 %s6528_s3, 3  ;;  %s7359_s11 = sld [smem:[#allocation28_spill]] }
 0x148   : > { %1501 = vmatpush1.bf16.msra.mxu1 %v5409_v3  ;;  %v5414_v6 = vld [vmem:[#allocation5 + $0x10] ss:$8 sps:$4 sm:$0xff]   ;;  %1015 = vmatprep.subr.bf16.mxu0 %v5410_v4  ;;  %v5416_v8 = vld [vmem:[#allocation5 + $0x24] ss:$8 sps:$4 sm:$0xff]   ;;  %v5420_v10 = vld [vmem:[#allocation5 + $0x20] ss:$8 sps:$4 sm:$0xff]  }
 0x149   : > { %1502 = vmatprep.subr.bf16.mxu1 %v5412_v5  ;;  %v5418_v9 = vld [vmem:[#allocation8 + $0x44] ss:$16 sps:$4 sm:$0xff]   ;;  %v5421_v11 = vld [vmem:[#allocation8 + $0x40] ss:$16 sps:$4 sm:$0xff]   ;;  %p790_p11 = scmp.lt.s32.totalorder %s4814_s26, 15  ;;  %s7360_s29 = sld [smem:[#allocation38_spill]] }
 0x14a   : > { %v5422_v12 = vld [vmem:[#allocation5 + $0x34] ss:$8 sps:$4 sm:$0xff]   ;;  %v5426_v14 = vld [vmem:[#allocation5 + $0x30] ss:$8 sps:$4 sm:$0xff]   ;;  %v5428_v16 = vld [vmem:[#allocation5 + $0x44] ss:$8 sps:$4 sm:$0xff]  }
 0x14b   : > { %1016 = vmatpush1.bf16.msra.mxu0 %v5414_v6  ;;  %v5424_v13 = vld [vmem:[#allocation8 + $0x64] ss:$16 sps:$4 sm:$0xff]   ;;  %v5427_v15 = vld [vmem:[#allocation8 + $0x60] ss:$16 sps:$4 sm:$0xff]   ;;  %s7377_s26 = smov (!%p790_p11, %s4814_s26), 15  ;;  %vm2170_vm0 = vcmask 1043456  }
 0x14c   : > { %1503 = vmatpush1.bf16.msra.mxu1 %v5415_v7  ;;  %1017 = vmatprep.subr.bf16.mxu0 %v5416_v8  ;;  %v5430_v17 = vld [vmem:[#allocation8 + $0x84] ss:$16 sps:$4 sm:$0xff]   ;;  %v5433_v19 = vld [vmem:[#allocation8 + $0x80] ss:$16 sps:$4 sm:$0xff]   ;;  %s5216_s4 = sshll.u32 %s7377_s26, 3  ;;  %vm1995_vm1 = vcmask 64512  }
 0x14d   : > { %1504 = vmatprep.subr.bf16.mxu1 %v5418_v9  ;;  %v5432_v18 = vld [vmem:[#allocation5 + $0x40] ss:$8 sps:$4 sm:$0xff]   ;;  %v5434_v20 = vld [vmem:[#allocation5 + $0x54] ss:$8 sps:$4 sm:$0xff]   ;;  %v5438_v22 = vld [vmem:[#allocation5 + $0x50] ss:$8 sps:$4 sm:$0xff]   ;;  %s6852_s12 = scalar_lea.vmem %s7359_s11, %s5216_s4 }
 0x14e   : > { %v5436_v21 = vld [vmem:[#allocation8 + $0xa4] ss:$16 sps:$4 sm:$0xff]   ;;  %v5439_v23 = vld [vmem:[#allocation8 + $0xa0] ss:$16 sps:$4 sm:$0xff]   ;;  %vm2454_vm2 = vcmask 1041409   ;;  %vm2456_vm3 = vcmask 1042434  }
 0x14f   : > { %1018 = vmatpush1.bf16.msra.mxu0 %v5420_v10  ;;  %v5440_v24 = vld [vmem:[#allocation5 + $0x64] ss:$8 sps:$4 sm:$0xff]   ;;  %v5444_v26 = vld [vmem:[#allocation5 + $0x60] ss:$8 sps:$4 sm:$0xff]   ;;  %v5446_v28 = vld [vmem:[#allocation5 + $0x74] ss:$8 sps:$4 sm:$0xff]  }
 0x150   : > { %1505 = vmatpush1.bf16.msra.mxu1 %v5421_v11  ;;  %1019 = vmatprep.subr.bf16.mxu0 %v5422_v12  ;;  %v5442_v25 = vld [vmem:[#allocation8 + $0xc4] ss:$16 sps:$4 sm:$0xff]   ;;  %v5445_v27 = vld [vmem:[#allocation8 + $0xc0] ss:$16 sps:$4 sm:$0xff]   ;;  %vm2458_vm4 = vcmask 1043459   ;;  %vm2460_vm5 = vcmask 1044484  }
 0x151   : > { %1506 = vmatprep.subr.bf16.mxu1 %v5424_v13  ;;  %v5448_v29 = vld [vmem:[#allocation8 + $0xe4] ss:$16 sps:$4 sm:$0xff]   ;;  %v5451_v31 = vld [vmem:[#allocation8 + $0xe0] ss:$16 sps:$4 sm:$0xff]   ;;  %vm2462_vm6 = vcmask 1045509   ;;  %vm2464_vm7 = vcmask 1046534  }
 0x152   : > { %v5450_v30 = vld [vmem:[#allocation5 + $0x70] ss:$8 sps:$4 sm:$0xff]   ;;  %v5452_v32 = vld [vmem:[#allocation5 + $0x84] ss:$8 sps:$4 sm:$0xff]   ;;  %v5456_v34 = vld [vmem:[#allocation5 + $0x80] ss:$8 sps:$4 sm:$0xff]  }
 0x153   : > { %1020 = vmatpush1.bf16.msra.mxu0 %v5426_v14  ;;  %v5454_v33 = vld [vmem:[#allocation8 + $0x104] ss:$16 sps:$4 sm:$0xff]   ;;  %v5457_v35 = vld [vmem:[#allocation8 + $0x100] ss:$16 sps:$4 sm:$0xff]   ;;  %vm2466_vm8 = vcmask 1047559   ;;  %s7361_s4 = sld [smem:[#allocation34_spill]] }
 0x154   : > { %1507 = vmatpush1.bf16.msra.mxu1 %v5427_v15  ;;  %1021 = vmatprep.subr.bf16.mxu0 %v5428_v16  ;;  %v5458_v36 = vld [vmem:[#allocation5 + $0x94] ss:$8 sps:$4 sm:$0xff]   ;;  %v5462_v38 = vld [vmem:[#allocation5 + $0x90] ss:$8 sps:$4 sm:$0xff]   ;;  %v5464_v40 = vld [vmem:[#allocation5 + $0xa4] ss:$8 sps:$4 sm:$0xff]  }
 0x155   : > { %1508 = vmatprep.subr.bf16.mxu1 %v5430_v17  ;;  %v5460_v37 = vld [vmem:[#allocation8 + $0x124] ss:$16 sps:$4 sm:$0xff]   ;;  %v5463_v39 = vld [vmem:[#allocation8 + $0x120] ss:$16 sps:$4 sm:$0xff]   ;;  %s7362_s11 = sld [smem:[#allocation35_spill]]  ;;  %s7363_s0 = sld [smem:[#allocation36_spill]] }
 0x156   : > { %v5466_v41 = vld [vmem:[#allocation8 + $0x144] ss:$16 sps:$4 sm:$0xff]   ;;  %v5469_v43 = vld [vmem:[#allocation8 + $0x140] ss:$16 sps:$4 sm:$0xff]   ;;  %s5257_s17 = smul.u32 48, %s6818_s5  ;;  %s7367_s28 = sld [smem:[#allocation41_spill]] }
 0x157   : > { %1022 = vmatpush1.bf16.msra.mxu0 %v5432_v18  ;;  %v5468_v42 = vld [vmem:[#allocation5 + $0xa0] ss:$8 sps:$4 sm:$0xff]   ;;  %v5470_v44 = vld [vmem:[#allocation5 + $0xb4] ss:$8 sps:$4 sm:$0xff]   ;;  %v5474_v47 = vld [vmem:[#allocation5 + $0xb0] ss:$8 sps:$4 sm:$0xff]  }
 0x158   : > { %1509 = vmatpush1.bf16.msra.mxu1 %v5433_v19  ;;  %1023 = vmatprep.subr.bf16.mxu0 %v5434_v20  ;;  %v5472_v45 = vld [vmem:[#allocation8 + $0x164] ss:$16 sps:$4 sm:$0xff]   ;;  %v5475_v49 = vld [vmem:[#allocation8 + $0x160] ss:$16 sps:$4 sm:$0xff]   ;;  %s7368_s9 = sld [smem:[#allocation42_spill]]  ;;  %p7369_p13 = scmp.ne.s32.totalorder %s7344_s21, 0 }
 0x159   : > { %1510 = vmatprep.subr.bf16.mxu1 %v5436_v21  ;;  %v798_v46 = vld [vmem:[%s6822_s30 + $0x8] sm:$0xff]  ;;  %v5481_v54 = vld [vmem:[#allocation8 + $0x180] ss:$16 sps:$4 sm:$0xff]   ;;  %s6401_s20 = smov [#allocation19]  }
 0x15a   : > { %v808_v48 = vpack.c.bf16 %v798_v46, %v798_v46  ;;  %v5502_v50 = vld [vmem:[%s6852_s12 + $0x4] ss:$8 sps:$4 sm:$0xff]   ;;  %v5480_v53 = vld [vmem:[#allocation5 + $0xc0] ss:$8 sps:$4 sm:$0xff]   ;;  %v5482_v55 = vld [vmem:[#allocation5 + $0xd4] ss:$8 sps:$4 sm:$0xff]  }
 0x15b   : > { %1024 = vmatpush1.bf16.msra.mxu0 %v5438_v22  ;;  %v5476_v51 = vld [vmem:[#allocation5 + $0xc4] ss:$8 sps:$4 sm:$0xff]   ;;  %1532 = vmatprep.mubr.bf16.mxu1 %v5502_v50  ;;  %v5486_v57 = vld [vmem:[#allocation5 + $0xd0] ss:$8 sps:$4 sm:$0xff]   ;;  %v5492_v61 = vld [vmem:[#allocation5 + $0xe0] ss:$8 sps:$4 sm:$0xff]  }
 0x15c   : > { %1511 = vmatpush1.bf16.msra.mxu1 %v5439_v23  ;;  %1025 = vmatprep.subr.bf16.mxu0 %v5440_v24  ;;  %v5478_v52 = vld [vmem:[#allocation8 + $0x184] ss:$16 sps:$4 sm:$0xff]   ;;  %v5487_v58 = vld [vmem:[#allocation8 + $0x1a0] ss:$16 sps:$4 sm:$0xff]  }
 0x15d   : > { %1512 = vmatprep.subr.bf16.mxu1 %v5442_v25  ;;  %1045 = vmatprep.mubr.bf16.mxu0 %v808_v48  ;;  %v5484_v56 = vld [vmem:[#allocation8 + $0x1a4] ss:$16 sps:$4 sm:$0xff]   ;;  %v5493_v62 = vld [vmem:[#allocation8 + $0x1c0] ss:$16 sps:$4 sm:$0xff]  }
 0x15e   : > { %v5488_v59 = vld [vmem:[#allocation5 + $0xe4] ss:$8 sps:$4 sm:$0xff]   ;;  %v5494_v63 = vld [vmem:[#allocation5 + $0xf4] ss:$8 sps:$4 sm:$0xff]   ;;  %v5498_v1 = vld [vmem:[#allocation5 + $0xf0] ss:$8 sps:$4 sm:$0xff]  }
 0x15f   : > { %1026 = vmatpush1.bf16.msra.mxu0 %v5444_v26  ;;  %v5490_v60 = vld [vmem:[#allocation8 + $0x1c4] ss:$16 sps:$4 sm:$0xff]   ;;  %v5499_v2 = vld [vmem:[#allocation8 + $0x1e0] ss:$16 sps:$4 sm:$0xff]  }
 0x160   : > { %1513 = vmatpush1.bf16.msra.mxu1 %v5445_v27  ;;  %1027 = vmatprep.subr.bf16.mxu0 %v5446_v28  ;;  %v5496_v0 = vld [vmem:[#allocation8 + $0x1e4] ss:$16 sps:$4 sm:$0xff]   ;;  %v5528_v28 = vld [vmem:[#allocation8 + $0x8] ss:$16 sps:$4 sm:$0xff]  }
 0x161   : > { %1514 = vmatprep.subr.bf16.mxu1 %v5448_v29  ;;  %v797_v3 = vld [vmem:[%s6822_s30] sm:$0xff]  ;;  %v5514_v9 = vld [vmem:[%s7291_s14 + $0x48] sm:$0xff]   ;;  %v5518_v15 = vld [vmem:[%s7291_s14 + $0x58] sm:$0xff]  }
 0x162   : > { %v5512_v4 = vld [vmem:[%s7291_s14 + $0x40] sm:$0xff]   ;;  %v5503_v6 = vld [vmem:[%s6852_s12 + $0x14] ss:$8 sps:$4 sm:$0xff]   ;;  %v807_v8 = vpack.c.bf16 %v797_v3, %v797_v3  ;;  %v5515_v10 = vld [vmem:[%s7291_s14 + $0x8] sm:$0xff]  }
 0x163   : > { %1028 = vmatpush1.bf16.msra.mxu0 %v5450_v30  ;;  %v5500_v5 = vld [vmem:[%s6852_s12] ss:$8 sps:$4 sm:$0xff]   ;;  %v5516_v11 = vld [vmem:[%s7291_s14 + $0x50] sm:$0xff]   ;;  %v6878_v13 = vld [vmem:[%s6852_s12 + $0x24] ss:$8 sps:$4 sm:$0xff]  }
 0x164   : > { %1515 = vmatpush1.bf16.msra.mxu1 %v5451_v31  ;;  %1029 = vmatprep.subr.bf16.mxu0 %v5452_v32  ;;  %v5513_v7 = vld [vmem:[%s7291_s14] sm:$0xff]   ;;  %v6875_v12 = vld [vmem:[%s6852_s12 + $0x10] ss:$8 sps:$4 sm:$0xff]   ;;  %v6895_v18 = vld [vmem:[%s6852_s12 + $0x34] ss:$8 sps:$4 sm:$0xff]   ;;  %v843_v32 = vlaneseq }
 0x165   : > { %1516 = vmatprep.subr.bf16.mxu1 %v5454_v33  ;;  %v5517_v14 = vld [vmem:[%s7291_s14 + $0x10] sm:$0xff]   ;;  %v5519_v16 = vld [vmem:[%s7291_s14 + $0x18] sm:$0xff]   ;;  %v6892_v17 = vld [vmem:[%s6852_s12 + $0x20] ss:$8 sps:$4 sm:$0xff]  }
 0x166   : > { %v6900_v19 = vld [vmem:[%s6852_s12 + $0x30] ss:$8 sps:$4 sm:$0xff]   ;;  %v5520_v20 = vld [vmem:[%s7291_s14 + $0x60] sm:$0xff]   ;;  %v5522_v22 = vld [vmem:[%s7291_s14 + $0x68] sm:$0xff]   ;;  %v6927_v33 = vshrl.u32 %v843_v32, 7 }
 0x167   : > { %1030 = vmatpush1.bf16.msra.mxu0 %v5456_v34  ;;  %v5521_v21 = vld [vmem:[%s7291_s14 + $0x20] sm:$0xff]   ;;  %v5523_v23 = vld [vmem:[%s7291_s14 + $0x28] sm:$0xff]   ;;  %v5524_v24 = vld [vmem:[%s7291_s14 + $0x70] sm:$0xff]  }
 0x168   : > { %1517 = vmatpush1.bf16.msra.mxu1 %v5457_v35  ;;  %1031 = vmatprep.subr.bf16.mxu0 %v5458_v36  ;;  %v5525_v25 = vld [vmem:[%s7291_s14 + $0x30] sm:$0xff]   ;;  %v5526_v26 = vld [vmem:[%s7291_s14 + $0x78] sm:$0xff]   ;;  %v6930_v34 = vsub.s32 0, %v6927_v33  ;;  %v841_v35 = vld [vmem:[#allocation7] sm:$0x3]  ;;  %v6933_v36 = vsub.s32 1, %v6927_v33 }
 0x169   : > { %1518 = vmatprep.subr.bf16.mxu1 %v5460_v37  ;;  %v5527_v27 = vld [vmem:[%s7291_s14 + $0x38] sm:$0xff]   ;;  %v6399_v37 = vmov 1966171168  }
 0x16a   : > { %v5530_v29 = vld [vmem:[#allocation8 + $0xc] ss:$16 sps:$4 sm:$0xff]   ;;  %v5531_v31 = vld [vmem:[#allocation8 + $0x28] ss:$16 sps:$4 sm:$0xff]  }
 0x16b   : > { %1032 = vmatpush1.bf16.msra.mxu0 %v5462_v38  ;;  %v5533_v30 = vld [vmem:[#allocation8 + $0x2c] ss:$16 sps:$4 sm:$0xff]   ;;  %v1651_v38 = vunpack.c.l.s4 %v6399_v37 }
 0x16c   : > { %1519 = vmatpush1.bf16.msra.mxu1 %v5463_v39  ;;  %1033 = vmatprep.subr.bf16.mxu0 %v5464_v40  ;;  %v1118_v39 = vld [vmem:[#allocation10] sm:$0xf]  ;;  %v846_v40 = vrot.slane %v841_v35, %v6930_v34 }
 0x16d   : > { %1520 = vmatprep.subr.bf16.mxu1 %v5466_v41  ;;  %v6937_v41 = vrot.slane %v1118_v39, %v6930_v34 }
 0x16f   : > { %1034 = vmatpush1.bf16.msra.mxu0 %v5468_v42  ;;  %v850_v42 = vrot.slane %v841_v35, %v6933_v36 }
 0x170   : > { %1521 = vmatpush1.bf16.msra.mxu1 %v5469_v43  ;;  %1035 = vmatprep.subr.bf16.mxu0 %v5470_v44  ;;  %v1652_v43 = vunpack.c.0.s8 %v1651_v38  ;;  %v6941_v44 = vrot.slane %v1118_v39, %v6933_v36 }
 0x171   : > { %1522 = vmatprep.subr.bf16.mxu1 %v5472_v45 }
 0x173   : > { %1036 = vmatpush1.bf16.msra.mxu0 %v5474_v47 }
 0x174   : > { %1523 = vmatpush1.bf16.msra.mxu1 %v5475_v49  ;;  %1037 = vmatprep.subr.bf16.mxu0 %v5476_v51 }
 0x175   : > { %1524 = vmatprep.subr.bf16.mxu1 %v5478_v52  ;;  %v1655_v52 = vsub.s32 %v1652_v43, %v6927_v33 }
 0x177   : > { %1038 = vmatpush1.bf16.msra.mxu0 %v5480_v53 }
 0x178   : > { %1525 = vmatpush1.bf16.msra.mxu1 %v5481_v54  ;;  %1039 = vmatprep.subr.bf16.mxu0 %v5482_v55 }
 0x179   : > { %1526 = vmatprep.subr.bf16.mxu1 %v5484_v56 }
 0x17b   : > { %1040 = vmatpush1.bf16.msra.mxu0 %v5486_v57 }
 0x17c   : > { %1527 = vmatpush1.bf16.msra.mxu1 %v5487_v58  ;;  %1041 = vmatprep.subr.bf16.mxu0 %v5488_v59 }
 0x17d   : > { %1528 = vmatprep.subr.bf16.mxu1 %v5490_v60 }
 0x17f   : > { %1042 = vmatpush1.bf16.msra.mxu0 %v5492_v61 }
 0x180   : > { %1529 = vmatpush1.bf16.msra.mxu1 %v5493_v62  ;;  %1043 = vmatprep.subr.bf16.mxu0 %v5494_v63 }
 0x181   : > { %1530 = vmatprep.subr.bf16.mxu1 %v5496_v0 }
 0x183   : > { %1044 = vmatpush1.bf16.msra.mxu0 %v5498_v1 }
 0x184   : > { %1531 = vmatpush1.bf16.msra.mxu1 %v5499_v2  ;;  %1573 = vmatprep.subr.bf16.mxu0 %v5530_v29 }
 0x185   : > { %5217 = vmatprep.subr.bf16.mxu1 %v5512_v4 }
 0x186   : > { %1046 = vmatmul.mubr.bf16.vlgmr.msra.gmra.mrb[0].mxu0 %v807_v8 }
 0x187   : > { %1533 = vmatmul.mubr.bf16.vlgmr.msra.gmra.mrb[0].mxu1 %v5500_v5  ;;  %1605 = vmatprep.mubr.bf16.mxu0 %v5502_v50 }
 0x188   : > { %1542 = vmatprep.mubr.bf16.mxu1 %v5503_v6  ;;  %5218 = vmatpush3.bf16.msra.mxu1 %v5513_v7 }
 0x189   : > { %5219 = vmatprep.subr.bf16.mxu1 %v5514_v9  ;;  %1574 = vmatpush1.bf16.msra.mxu0 %v5528_v28 }
 0x18a   : > { %1575 = vmatprep.subr.bf16.mxu0 %v5533_v30 }
 0x18c   : > { %5220 = vmatpush3.bf16.msra.mxu1 %v5515_v10 }
 0x18d   : > { %5221 = vmatprep.subr.bf16.mxu1 %v5516_v11  ;;  %1576 = vmatpush1.bf16.msra.mxu0 %v5531_v31 }
 0x18f   : > { %1543 = vmatmul.mubr.bf16.gmra.mrb[4].mxu1 %v6875_v12 }
 0x190   : > { %1552 = vmatprep.mubr.bf16.mxu1 %v6878_v13  ;;  %5222 = vmatpush3.bf16.msra.mxu1 %v5517_v14 }
 0x191   : > { %5223 = vmatprep.subr.bf16.mxu1 %v5518_v15 }
 0x194   : > { %5224 = vmatpush3.bf16.msra.mxu1 %v5519_v16 }
 0x195   : > { %5225 = vmatprep.subr.bf16.mxu1 %v5520_v20 }
 0x197   : > { %1553 = vmatmul.mubr.bf16.gmra.mrb[8].mxu1 %v6892_v17 }
 0x198   : > { %1562 = vmatprep.mubr.bf16.mxu1 %v6895_v18  ;;  %5226 = vmatpush3.bf16.msra.mxu1 %v5521_v21 }
 0x199   : > { %5227 = vmatprep.subr.bf16.mxu1 %v5522_v22 }
 0x19c   : > { %5228 = vmatpush3.bf16.msra.mxu1 %v5523_v23 }
 0x19d   : > { %5229 = vmatprep.subr.bf16.mxu1 %v5524_v24 }
 0x19f   : > { %1563 = vmatmul.mubr.bf16.gmra.mrb[12].mxu1 %v6900_v19 }
 0x1a0   : > { %5230 = vmatpush3.bf16.msra.mxu1 %v5525_v25 }
 0x1a1   : > { %5231 = vmatprep.subr.bf16.mxu1 %v5526_v26 }
 0x1a4   : > { %5232 = vmatpush3.bf16.msra.mxu1 %v5527_v27 }
 0x259   : > { %v1047_v45 = vpop.f32.mrb[0].mxu0 }
 0x25a   : > { %v1534_v46 = vpop.f32.mrb[0].mxu1  ;;  %v1048_v47 = vadd.f32 %v1047_v45, %v846_v40  ;;  %v1049_v48 = vpop.f32.mrb[1].mxu0 }
 0x25b   : > { %v1535_v49 = vadd.f32 %v1534_v46, %v6937_v41  ;;  %v1536_v50 = vpop.f32.mrb[1].mxu1  ;;  %v1050_v51 = vadd.f32 %v1049_v48, %v850_v42  ;;  %v1051_v53 = vpop.f32.mrb[2].mxu0 }
 0x25c   : > { %v1537_v54 = vadd.f32 %v1536_v50, %v6941_v44  ;;  %v1538_v55 = vpop.f32.mrb[2].mxu1  ;;  %v1052_v56 = vpop.f32.mrb[3].mxu0 }
 0x25d   : > { %v1539_v57 = vadd.f32 %v1538_v55, %v6937_v41  ;;  %v1540_v58 = vpop.f32.mrb[3].mxu1  ;;  %v1648_v59 = vcombine.low %v1048_v47, %v1050_v51  ;;  %v1649_v60 = vcombine.high %v1048_v47, %v1050_v51 }
 0x25e   : > { %v1541_v61 = vadd.f32 %v1540_v58, %v6941_v44 }
 0x25f   : > { %v1786_v62 = vpack.c.bf16 %v1539_v57, %v1535_v49  ;;  %v1656_v63 = vrot.slane %v1648_v59, %v1655_v52  ;;  %v1663_v0 = vrot.slane %v1649_v60, %v1655_v52 }
 0x260   : > { %v1787_v1 = vpack.c.bf16 %v1541_v61, %v1537_v54 }
 0x261   : > { %v1664_v2 = vcombine.high %v1656_v63, %v1656_v63  ;;  %v1672_v3 = vrot.slane %v1656_v63, %v1655_v52  ;;  %v1665_v5 = vcombine.high %v1663_v0, %v1663_v0  ;;  %v1679_v32 = vrot.slane %v1663_v0, %v1655_v52 }
 0x262   : > { %v1544_v4 = vpop.f32.mrb[4].mxu1 }
 0x263   : > { %v1545_v6 = vadd.f32 %v1544_v4, %v6937_v41  ;;  %v1546_v7 = vpop.f32.mrb[5].mxu1  ;;  %v1686_v8 = vrot.slane %v1664_v2, %v1655_v52  ;;  %v1701_v11 = vrot.slane %v1672_v3, %v6930_v34  ;;  %v1705_v16 = vrot.slane %v1672_v3, %v6933_v36 }
 0x264   : > { %v1547_v9 = vadd.f32 %v1546_v7, %v6941_v44  ;;  %v1548_v10 = vpop.f32.mrb[6].mxu1  ;;  %v1694_v20 = vcombine.high %v1672_v3, %v1672_v3  ;;  %v1693_v25 = vrot.slane %v1665_v5, %v1655_v52  ;;  %v1733_v55 = vrot.slane %v1679_v32, %v6930_v34 }
 0x265   : > { %v1549_v14 = vadd.f32 %v1548_v10, %v6937_v41  ;;  %v1550_v15 = vpop.f32.mrb[7].mxu1  ;;  %v1709_v21 = vrot.slane %v1686_v8, %v6930_v34  ;;  %v1713_v23 = vrot.slane %v1686_v8, %v6933_v36  ;;  %v1696_v24 = vcombine.high %v1686_v8, %v1686_v8 }
 0x266   : > { %v1551_v22 = vadd.f32 %v1550_v15, %v6941_v44  ;;  %v1721_v27 = vrot.slane %v1694_v20, %v6933_v36  ;;  %v1717_v35 = vrot.slane %v1694_v20, %v6930_v34  ;;  %v1741_v47 = vrot.slane %v1693_v25, %v6930_v34 }
 0x267   : > { %v1788_v26 = vpack.c.bf16 %v1549_v14, %v1545_v6  ;;  %v1778_v28 = vpack.c.bf16 %v1709_v21, %v1701_v11  ;;  %v1779_v30 = vpack.c.bf16 %v1713_v23, %v1705_v16  ;;  %v1729_v31 = vrot.slane %v1696_v24, %v6933_v36 }
 0x268   : > { %v1789_v29 = vpack.c.bf16 %v1551_v22, %v1547_v9  ;;  %v1725_v37 = vrot.slane %v1696_v24, %v6930_v34  ;;  %v1745_v51 = vrot.slane %v1693_v25, %v6933_v36  ;;  %v1737_v57 = vrot.slane %v1679_v32, %v6933_v36 }
 0x269   : > { %v1794_v38 = vmul.bf16 %v1786_v62, %v1778_v28  ;;  %v1795_v40 = vmul.bf16 %v1787_v1, %v1779_v30  ;;  %v1781_v42 = vpack.c.bf16 %v1729_v31, %v1721_v27  ;;  %v1782_v59 = vpack.c.bf16 %v1741_v47, %v1733_v55  ;;  %v5537_v27 = vld [vmem:[#allocation8 + $0x68] ss:$16 sps:$4 sm:$0xff]   ;;  %v5548_v31 = vld [vmem:[#allocation8 + $0xcc] ss:$16 sps:$4 sm:$0xff]  }
 0x26a   : > { %v1554_v39 = vpop.f32.mrb[8].mxu1  ;;  %v1780_v46 = vpack.c.bf16 %v1725_v37, %v1717_v35  ;;  %v1697_v60 = vcombine.high %v1693_v25, %v1693_v25  ;;  %v1783_v62 = vpack.c.bf16 %v1745_v51, %v1737_v57  ;;  %v1695_v0 = vcombine.high %v1679_v32, %v1679_v32  ;;  %v5534_v25 = vld [vmem:[#allocation8 + $0x48] ss:$16 sps:$4 sm:$0xff]   ;;  %v5551_v35 = vld [vmem:[#allocation8 + $0xec] ss:$16 sps:$4 sm:$0xff]  }
 0x26b   : > { %v1555_v43 = vadd.f32 %v1554_v39, %v6937_v41  ;;  %v1556_v45 = vpop.f32.mrb[9].mxu1  ;;  %1962 = vmatprep.mubr.bf16.mxu1 %v1795_v40  ;;  %v1797_v50 = vmul.bf16 %v1789_v29, %v1781_v42  ;;  %v5540_v28 = vld [vmem:[#allocation8 + $0x88] ss:$16 sps:$4 sm:$0xff]   ;;  %v5545_v29 = vld [vmem:[#allocation8 + $0xac] ss:$16 sps:$4 sm:$0xff]  }
 0x26c   : > { %v1557_v48 = vadd.f32 %v1556_v45, %v6941_v44  ;;  %v1558_v49 = vpop.f32.mrb[10].mxu1  ;;  %1963 = vmatmul.mubr.bf16.vlgmr.msra.gmra.mrb[16].mxu1 %v1794_v38  ;;  %v1796_v54 = vmul.bf16 %v1788_v26, %v1780_v46  ;;  %v1757_v5 = vrot.slane %v1697_v60, %v6930_v34  ;;  %v1761_v8 = vrot.slane %v1697_v60, %v6933_v36  ;;  %v5539_v26 = vld [vmem:[#allocation8 + $0x6c] ss:$16 sps:$4 sm:$0xff]   ;;  %v5543_v30 = vld [vmem:[#allocation8 + $0xa8] ss:$16 sps:$4 sm:$0xff]  }
 0x26d   : > { %v1559_v52 = vadd.f32 %v1558_v49, %v6937_v41  ;;  %v1560_v53 = vpop.f32.mrb[11].mxu1  ;;  %1970 = vmatprep.mubr.bf16.mxu1 %v1797_v50  ;;  %v1749_v11 = vrot.slane %v1695_v0, %v6930_v34  ;;  %v1753_v15 = vrot.slane %v1695_v0, %v6933_v36  ;;  %v5546_v32 = vld [vmem:[#allocation8 + $0xc8] ss:$16 sps:$4 sm:$0xff]   ;;  %v5554_v38 = vld [vmem:[#allocation8 + $0x10c] ss:$16 sps:$4 sm:$0xff]  }
 0x26e   : > { %v1561_v56 = vadd.f32 %v1560_v53, %v6941_v44  ;;  %v5549_v37 = vld [vmem:[#allocation8 + $0xe8] ss:$16 sps:$4 sm:$0xff]   ;;  %v5557_v40 = vld [vmem:[#allocation8 + $0x12c] ss:$16 sps:$4 sm:$0xff]  }
 0x26f   : > { %v1790_v58 = vpack.c.bf16 %v1559_v52, %v1555_v43  ;;  %v1784_v20 = vpack.c.bf16 %v1757_v5, %v1749_v11  ;;  %v1785_v22 = vpack.c.bf16 %v1761_v8, %v1753_v15  ;;  %v5552_v39 = vld [vmem:[#allocation8 + $0x108] ss:$16 sps:$4 sm:$0xff]   ;;  %v5562_v43 = vld [vmem:[#allocation8 + $0x14c] ss:$16 sps:$4 sm:$0xff]  }
 0x270   : > { %v1791_v61 = vpack.c.bf16 %v1561_v56, %v1557_v48  ;;  %v5555_v42 = vld [vmem:[#allocation8 + $0x128] ss:$16 sps:$4 sm:$0xff]   ;;  %v5565_v46 = vld [vmem:[#allocation8 + $0x16c] ss:$16 sps:$4 sm:$0xff]  }
 0x271   : > { %v1798_v63 = vmul.bf16 %v1790_v58, %v1782_v59  ;;  %v5560_v45 = vld [vmem:[#allocation8 + $0x148] ss:$16 sps:$4 sm:$0xff]   ;;  %v5568_v48 = vld [vmem:[#allocation8 + $0x18c] ss:$16 sps:$4 sm:$0xff]  }
 0x272   : > { %v1564_v1 = vpop.f32.mrb[12].mxu1  ;;  %v1799_v2 = vmul.bf16 %v1791_v61, %v1783_v62  ;;  %v5563_v47 = vld [vmem:[#allocation8 + $0x168] ss:$16 sps:$4 sm:$0xff]   ;;  %v5571_v50 = vld [vmem:[#allocation8 + $0x1ac] ss:$16 sps:$4 sm:$0xff]   ;;  %v6400_v62 = vmov 0  }
 0x273   : > { %v1565_v3 = vadd.f32 %v1564_v1, %v6937_v41  ;;  %v1566_v4 = vpop.f32.mrb[13].mxu1  ;;  %v5566_v49 = vld [vmem:[#allocation8 + $0x188] ss:$16 sps:$4 sm:$0xff]   ;;  %v5574_v52 = vld [vmem:[#allocation8 + $0x1cc] ss:$16 sps:$4 sm:$0xff]  }
 0x274   : > { %v1567_v6 = vadd.f32 %v1566_v4, %v6941_v44  ;;  %v1568_v7 = vpop.f32.mrb[14].mxu1  ;;  %1971 = vmatmul.mubr.bf16.gmra.mrb[20].mxu1 %v1796_v54  ;;  %v5569_v51 = vld [vmem:[#allocation8 + $0x1a8] ss:$16 sps:$4 sm:$0xff]   ;;  %v5577_v54 = vld [vmem:[#allocation8 + $0x1ec] ss:$16 sps:$4 sm:$0xff]  }
 0x275   : > { %v1569_v9 = vadd.f32 %v1568_v7, %v6937_v41  ;;  %v1570_v10 = vpop.f32.mrb[15].mxu1  ;;  %1978 = vmatprep.mubr.bf16.mxu1 %v1799_v2  ;;  %v5536_v41 = vld [vmem:[#allocation8 + $0x4c] ss:$16 sps:$4 sm:$0xff]   ;;  %v5572_v53 = vld [vmem:[#allocation8 + $0x1c8] ss:$16 sps:$4 sm:$0xff]  }
 0x276   : > { %v1571_v14 = vadd.f32 %v1570_v10, %v6941_v44  ;;  %1577 = vmatprep.subr.bf16.mxu0 %v5536_v41  ;;  %v5542_v44 = vld [vmem:[#allocation8 + $0x8c] ss:$16 sps:$4 sm:$0xff]   ;;  %v5575_v55 = vld [vmem:[#allocation8 + $0x1e8] ss:$16 sps:$4 sm:$0xff]  }
 0x277   : > { %v1792_v16 = vpack.c.bf16 %v1569_v9, %v1565_v3  ;;  %1578 = vmatpush1.bf16.msra.mxu0 %v5534_v25  ;;  %v2152_v56 = vld [vmem:[%s7360_s29] sm:$0xff]  ;;  %v6009_v61 = vld [vmem:[%s6852_s12 + $0x14] ss:$8 sps:$4 sm:$0xff]   ;;  %s7364_s29 = sld [smem:[#allocation37_spill]] }
 0x278   : > { %v1793_v21 = vpack.c.bf16 %v1571_v14, %v1567_v6  ;;  %1579 = vmatprep.subr.bf16.mxu0 %v5539_v26  ;;  %v4938_v57 = vcombine.high %v2152_v56, %v2152_v56  ;;  %v4937_v58 = vcombine.low %v2152_v56, %v2152_v56  ;;  %v6008_v59 = vld [vmem:[%s6852_s12] ss:$8 sps:$4 sm:$0xff]  }
 0x279   : > { %v1800_v23 = vmul.bf16 %v1792_v16, %v1784_v20  ;;  %v5580_v0 = vld [vmem:[#allocation11 + $0x4] ss:$8 sps:$4 sm:$0xff]   ;;  %v5583_v1 = vld [vmem:[#allocation11 + $0x14] ss:$8 sps:$4 sm:$0xff]   ;;  %v5581_v2 = vld [vmem:[#allocation11 + $0x10] ss:$8 sps:$4 sm:$0xff]  }
 0x27a   : > { %v1801_v24 = vmul.bf16 %v1793_v21, %v1785_v22  ;;  %4939 = vmatprep.subr.msk.bf16.mxu1 %vm2170_vm0, %v4938_v57  ;;  %v2172_v60 = vsel %vm2170_vm0, %v4937_v58, 0  ;;  %v5586_v3 = vld [vmem:[#allocation11 + $0x24] ss:$8 sps:$4 sm:$0xff]   ;;  %v5584_v4 = vld [vmem:[#allocation11 + $0x20] ss:$8 sps:$4 sm:$0xff]  }
 0x27b   : > { %1580 = vmatpush1.bf16.msra.mxu0 %v5537_v27  ;;  %2178 = vmatpush1.bf16.msra.mxu1 %v2172_v60  ;;  %v5587_v58 = vld [vmem:[#allocation11 + $0x30] ss:$8 sps:$4 sm:$0xff]  }
 0x27c   : > { %1979 = vmatmul.mubr.bf16.gmra.mrb[24].mxu1 %v1798_v63  ;;  %1581 = vmatprep.subr.bf16.mxu0 %v5542_v44  ;;  %v5578_v63 = vld [vmem:[#allocation11] ss:$8 sps:$4 sm:$0xff]  }
 0x27d   : > { %1986 = vmatprep.mubr.bf16.mxu1 %v1801_v24 }
 0x27f   : > { %1582 = vmatpush1.bf16.msra.mxu0 %v5540_v28 }
 0x280   : > { %1583 = vmatprep.subr.bf16.mxu0 %v5545_v29 }
 0x283   : > { %1584 = vmatpush1.bf16.msra.mxu0 %v5543_v30 }
 0x284   : > { %1987 = vmatmul.mubr.bf16.gmra.mrb[28].mxu1 %v1800_v23  ;;  %1585 = vmatprep.subr.bf16.mxu0 %v5548_v31 }
 0x285   : > { %2209 = vmatprep.mubr.bf16.mxu1 %v6400_v62 }
 0x287   : > { %1586 = vmatpush1.bf16.msra.mxu0 %v5546_v32 }
 0x288   : > { %1587 = vmatprep.subr.bf16.mxu0 %v5551_v35 }
 0x28b   : > { %1588 = vmatpush1.bf16.msra.mxu0 %v5549_v37 }
 0x28c   : > { %1589 = vmatprep.subr.bf16.mxu0 %v5554_v38 }
 0x28f   : > { %1590 = vmatpush1.bf16.msra.mxu0 %v5552_v39 }
 0x290   : > { %1591 = vmatprep.subr.bf16.mxu0 %v5557_v40 }
 0x293   : > { %1592 = vmatpush1.bf16.msra.mxu0 %v5555_v42 }
 0x294   : > { %1593 = vmatprep.subr.bf16.mxu0 %v5562_v43 }
 0x297   : > { %1594 = vmatpush1.bf16.msra.mxu0 %v5560_v45 }
 0x298   : > { %1595 = vmatprep.subr.bf16.mxu0 %v5565_v46 }
 0x29b   : > { %1596 = vmatpush1.bf16.msra.mxu0 %v5563_v47 }
 0x29c   : > { %1597 = vmatprep.subr.bf16.mxu0 %v5568_v48 }
 0x29f   : > { %1598 = vmatpush1.bf16.msra.mxu0 %v5566_v49 }
 0x2a0   : > { %1599 = vmatprep.subr.bf16.mxu0 %v5571_v50 }
 0x2a3   : > { %1600 = vmatpush1.bf16.msra.mxu0 %v5569_v51 }
 0x2a4   : > { %1601 = vmatprep.subr.bf16.mxu0 %v5574_v52 }
 0x2a7   : > { %1602 = vmatpush1.bf16.msra.mxu0 %v5572_v53 }
 0x2a8   : > { %1603 = vmatprep.subr.bf16.mxu0 %v5577_v54 }
 0x2ab   : > { %1604 = vmatpush1.bf16.msra.mxu0 %v5575_v55 }
 0x2ac   : > { %2639 = vmatprep.subr.bf16.mxu0 %v5580_v0 }
 0x2ae   : > { %1606 = vmatmul.mubr.bf16.vlgmr.msra.gmra.mrb[4].mxu0 %v6008_v59  ;;  %v5589_v59 = vld [vmem:[#allocation11 + $0x34] ss:$8 sps:$4 sm:$0xff]  }
 0x2af   : > { %1615 = vmatprep.mubr.bf16.mxu0 %v6009_v61  ;;  %2640 = vmatpush1.bf16.msra.mxu0 %v5578_v63 }
 0x2b0   : > { %2641 = vmatprep.subr.bf16.mxu0 %v5583_v1 }
 0x2b3   : > { %2642 = vmatpush1.bf16.msra.mxu0 %v5581_v2 }
 0x2b4   : > { %2643 = vmatprep.subr.bf16.mxu0 %v5586_v3 }
 0x2b6   : > { %1616 = vmatmul.mubr.bf16.gmra.mrb[8].mxu0 %v6875_v12 }
 0x2b7   : > { %1625 = vmatprep.mubr.bf16.mxu0 %v6878_v13  ;;  %2644 = vmatpush1.bf16.msra.mxu0 %v5584_v4 }
 0x2b8   : > { %2645 = vmatprep.subr.bf16.mxu0 %v5589_v59 }
 0x2bb   : > { %2646 = vmatpush1.bf16.msra.mxu0 %v5587_v58 }
 0x2be   : > { %1626 = vmatmul.mubr.bf16.gmra.mrb[12].mxu0 %v6892_v17 }
 0x2bf   : > { %1635 = vmatprep.mubr.bf16.mxu0 %v6895_v18 }
 0x2c6   : > { %1636 = vmatmul.mubr.bf16.gmra.mrb[16].mxu0 %v6900_v19 }
 0x33f   : > { %v5233_v12 = vpop.f32.mrb[16].mxu1 }
 0x340   : > { %v5234_v13 = vpop.f32.mrb[17].mxu1 }
 0x341   : > { %v5235_v17 = vadd.f32 %v5234_v13, %v5233_v12  ;;  %v5236_v5 = vpop.f32.mrb[18].mxu1 }
 0x342   : > { %v5237_v18 = vpop.f32.mrb[19].mxu1 }
 0x343   : > { %v1996_v19 = vsel %vm1995_vm1, %v5235_v17, -inf  ;;  %v5238_v6 = vadd.f32 %v5237_v18, %v5236_v5 }
 0x344   : > { %v1997_v7 = vrot.slane %v1996_v19, 4 }
 0x345   : > { %v2003_v8 = vsel %vm1995_vm1, %v5238_v6, -inf }
 0x346   : > { %v1998_v9 = vmax.f32 %v1996_v19, %v1997_v7  ;;  %v2004_v10 = vrot.slane %v2003_v8, 4 }
 0x347   : > { %v5239_v11 = vpop.f32.mrb[20].mxu1 }
 0x348   : > { %v1999_v14 = vrot.slane %v1998_v9, 2  ;;  %v2005_v15 = vmax.f32 %v2003_v8, %v2004_v10  ;;  %v5240_v16 = vpop.f32.mrb[21].mxu1 }
 0x349   : > { %v5241_v20 = vadd.f32 %v5240_v16, %v5239_v11  ;;  %v5242_v21 = vpop.f32.mrb[22].mxu1 }
 0x34a   : > { %v2000_v22 = vmax.f32 %v1998_v9, %v1999_v14  ;;  %v2006_v23 = vrot.slane %v2005_v15, 2  ;;  %v5243_v24 = vpop.f32.mrb[23].mxu1 }
 0x34b   : > { %v2010_v25 = vsel %vm1995_vm1, %v5241_v20, -inf  ;;  %v5244_v41 = vadd.f32 %v5243_v24, %v5242_v21 }
 0x34c   : > { %v2001_v26 = vrot.slane %v2000_v22, 1  ;;  %v2007_v27 = vmax.f32 %v2005_v15, %v2006_v23  ;;  %v2011_v44 = vrot.slane %v2010_v25, 4 }
 0x34d   : > { %v2017_v28 = vsel %vm1995_vm1, %v5244_v41, -inf }
 0x34e   : > { %v2002_v29 = vmax.f32 %v2000_v22, %v2001_v26  ;;  %v2008_v30 = vrot.slane %v2007_v27, 1  ;;  %v2012_v31 = vmax.f32 %v2010_v25, %v2011_v44  ;;  %v2018_v32 = vrot.slane %v2017_v28, 4 }
 0x34f   : > { %v5245_v35 = vpop.f32.mrb[24].mxu1 }
 0x350   : > { %v2052_v37 = vsub.f32 %v5235_v17, %v2002_v29  ;;  %v2009_v38 = vmax.f32 %v2007_v27, %v2008_v30  ;;  %v2013_v39 = vrot.slane %v2012_v31, 2  ;;  %v2019_v40 = vmax.f32 %v2017_v28, %v2018_v32  ;;  %v5246_v42 = vpop.f32.mrb[25].mxu1 }
 0x351   : > { %v6991_v43 = vadd.f32 %v5246_v42, %v5245_v35  ;;  %v5248_v45 = vpop.f32.mrb[26].mxu1 }
 0x352   : > { %v2060_v46 = vmul.f32 1.442695, %v2052_v37  ;;  %v2053_v47 = vsub.f32 %v5238_v6, %v2009_v38  ;;  %v2014_v48 = vmax.f32 %v2012_v31, %v2013_v39  ;;  %v2020_v49 = vrot.slane %v2019_v40, 2  ;;  %v5249_v50 = vpop.f32.mrb[27].mxu1 }
 0x353   : > { %v2024_v51 = vsel %vm1995_vm1, %v6991_v43, -inf  ;;  %v5250_v52 = vadd.f32 %v5249_v50, %v5248_v45 }
 0x354   : > { %5962 = vpow2.f32 %v2060_v46  ;;  %v2062_v53 = vmul.f32 1.442695, %v2053_v47  ;;  %v2015_v54 = vrot.slane %v2014_v48, 1  ;;  %v2021_v55 = vmax.f32 %v2019_v40, %v2020_v49 }
 0x355   : > { %v2025_v56 = vrot.slane %v2024_v51, 4  ;;  %v2031_v57 = vsel %vm1995_vm1, %v5250_v52, -inf }
 0x356   : > { %5964 = vpow2.f32 %v2062_v53  ;;  %v2016_v60 = vmax.f32 %v2014_v48, %v2015_v54  ;;  %v2022_v61 = vrot.slane %v2021_v55, 1  ;;  %v2032_v63 = vrot.slane %v2031_v57, 4 }
 0x357   : > { %v2026_v0 = vmax.f32 %v2024_v51, %v2025_v56  ;;  %v5251_v1 = vpop.f32.mrb[28].mxu1 }
 0x358   : > { %v2054_v2 = vsub.f32 %v5241_v20, %v2016_v60  ;;  %v2023_v3 = vmax.f32 %v2021_v55, %v2022_v61  ;;  %v2033_v4 = vmax.f32 %v2031_v57, %v2032_v63  ;;  %v5252_v12 = vpop.f32.mrb[29].mxu1 }
 0x359   : > { %v2027_v13 = vrot.slane %v2026_v0, 2  ;;  %v5253_v17 = vadd.f32 %v5252_v12, %v5251_v1  ;;  %v5254_v5 = vpop.f32.mrb[30].mxu1 }
 0x35a   : > { %v2064_v18 = vmul.f32 1.442695, %v2054_v2  ;;  %v2055_v19 = vsub.f32 %v5244_v41, %v2023_v3  ;;  %v2034_v6 = vrot.slane %v2033_v4, 2  ;;  %v5255_v7 = vpop.f32.mrb[31].mxu1 }
 0x35b   : > { %v2028_v8 = vmax.f32 %v2026_v0, %v2027_v13  ;;  %v2038_v9 = vsel %vm1995_vm1, %v5253_v17, -inf  ;;  %v5256_v10 = vadd.f32 %v5255_v7, %v5254_v5 }
 0x35c   : > { %5966 = vpow2.f32 %v2064_v18  ;;  %v2066_v11 = vmul.f32 1.442695, %v2055_v19  ;;  %v2035_v14 = vmax.f32 %v2033_v4, %v2034_v6  ;;  %v2039_v15 = vrot.slane %v2038_v9, 4 }
 0x35d   : > { %v2029_v16 = vrot.slane %v2028_v8, 1  ;;  %v2045_v20 = vsel %vm1995_vm1, %v5256_v10, -inf }
 0x35e   : > { %v6998_v21 = vpop.eup %5962  ;;  %5968 = vpow2.f32 %v2066_v11  ;;  %v2036_v22 = vrot.slane %v2035_v14, 1  ;;  %v2040_v23 = vmax.f32 %v2038_v9, %v2039_v15  ;;  %v2046_v24 = vrot.slane %v2045_v20, 4 }
 0x35f   : > { %v2076_v25 = vsel %vm1995_vm1, %v6998_v21, 0.0  ;;  %v2030_v41 = vmax.f32 %v2028_v8, %v2029_v16 }
 0x360   : > { %v7002_v26 = vpop.eup %5964  ;;  %v2077_v27 = vrot.slane %v2076_v25, 4  ;;  %v2037_v44 = vmax.f32 %v2035_v14, %v2036_v22  ;;  %v2041_v28 = vrot.slane %v2040_v23, 2  ;;  %v2047_v29 = vmax.f32 %v2045_v20, %v2046_v24 }
 0x361   : > { %v2083_v30 = vsel %vm1995_vm1, %v7002_v26, 0.0  ;;  %v2056_v31 = vsub.f32 %v6991_v43, %v2030_v41 }
 0x362   : > { %v2078_v32 = vadd.f32 %v2077_v27, %v2076_v25  ;;  %v2084_v35 = vrot.slane %v2083_v30, 4  ;;  %v2057_v37 = vsub.f32 %v5250_v52, %v2037_v44  ;;  %v2042_v38 = vmax.f32 %v2040_v23, %v2041_v28 }
 0x363   : > { %v2068_v39 = vmul.f32 1.442695, %v2056_v31  ;;  %v2048_v40 = vrot.slane %v2047_v29, 2 }
 0x364   : > { %v2079_v42 = vrot.slane %v2078_v32, 2  ;;  %v2085_v45 = vadd.f32 %v2084_v35, %v2083_v30  ;;  %v2070_v46 = vmul.f32 1.442695, %v2057_v37  ;;  %v2043_v47 = vrot.slane %v2042_v38, 1 }
 0x365   : > { %5970 = vpow2.f32 %v2068_v39  ;;  %v2049_v48 = vmax.f32 %v2047_v29, %v2048_v40 }
 0x366   : > { %v7007_v49 = vpop.eup %5966  ;;  %v2080_v50 = vadd.f32 %v2079_v42, %v2078_v32  ;;  %v2086_v51 = vrot.slane %v2085_v45, 2  ;;  %5972 = vpow2.f32 %v2070_v46  ;;  %v2044_v53 = vmax.f32 %v2042_v38, %v2043_v47 }
 0x367   : > { %v2090_v43 = vsel %vm1995_vm1, %v7007_v49, 0.0  ;;  %v2050_v54 = vrot.slane %v2049_v48, 1 }
 0x368   : > { %v7011_v52 = vpop.eup %5968  ;;  %v2081_v55 = vrot.slane %v2080_v50, 1  ;;  %v2087_v56 = vadd.f32 %v2086_v51, %v2085_v45  ;;  %v2091_v57 = vrot.slane %v2090_v43, 4  ;;  %v2058_v58 = vsub.f32 %v5253_v17, %v2044_v53 }
 0x369   : > { %v2097_v59 = vsel %vm1995_vm1, %v7011_v52, 0.0  ;;  %v2051_v60 = vmax.f32 %v2049_v48, %v2050_v54 }
 0x36a   : > { %v2082_v61 = vadd.f32 %v2081_v55, %v2080_v50  ;;  %v2088_v63 = vrot.slane %v2087_v56, 1  ;;  %v2092_v0 = vadd.f32 %v2091_v57, %v2090_v43  ;;  %v2098_v1 = vrot.slane %v2097_v59, 4 }
 0x36b   : > { %v2072_v2 = vmul.f32 1.442695, %v2058_v58  ;;  %v2059_v3 = vsub.f32 %v5256_v10, %v2051_v60 }
 0x36c   : > { %5974 = vrcp.f32 %v2082_v61  ;;  %v2089_v4 = vadd.f32 %v2088_v63, %v2087_v56  ;;  %v2093_v12 = vrot.slane %v2092_v0, 2  ;;  %v2099_v13 = vadd.f32 %v2098_v1, %v2097_v59 }
 0x36d   : > { %5976 = vpow2.f32 %v2072_v2  ;;  %v2074_v5 = vmul.f32 1.442695, %v2059_v3 }
 0x36e   : > { %5978 = vrcp.f32 %v2089_v4  ;;  %v2094_v18 = vadd.f32 %v2093_v12, %v2092_v0  ;;  %v2100_v19 = vrot.slane %v2099_v13, 2 }
 0x36f   : > { %v5971_v17 = vpop.eup %5970  ;;  %5980 = vpow2.f32 %v2074_v5 }
 0x370   : > { %v5973_v6 = vpop.eup %5972  ;;  %v2095_v7 = vrot.slane %v2094_v18, 1  ;;  %v2101_v8 = vadd.f32 %v2100_v19, %v2099_v13  ;;  %v2104_v9 = vsel %vm1995_vm1, %v5971_v17, 0.0 }
 0x371   : > { %v2105_v11 = vrot.slane %v2104_v9, 4  ;;  %v2111_v14 = vsel %vm1995_vm1, %v5973_v6, 0.0 }
 0x372   : > { %v2096_v10 = vadd.f32 %v2095_v7, %v2094_v18  ;;  %v2102_v15 = vrot.slane %v2101_v8, 1  ;;  %v2112_v16 = vrot.slane %v2111_v14, 4  ;;  %v5590_v7 = vld [vmem:[#allocation11 + $0x40] ss:$8 sps:$4 sm:$0xff]  }
 0x373   : > { %v2106_v20 = vadd.f32 %v2105_v11, %v2104_v9  ;;  %v5595_v9 = vld [vmem:[#allocation11 + $0x54] ss:$8 sps:$4 sm:$0xff]  }
 0x374   : > { %5982 = vrcp.f32 %v2096_v10  ;;  %v2103_v22 = vadd.f32 %v2102_v15, %v2101_v8  ;;  %v2113_v23 = vadd.f32 %v2112_v16, %v2111_v14  ;;  %v5593_v14 = vld [vmem:[#allocation11 + $0x50] ss:$8 sps:$4 sm:$0xff]   ;;  %v5598_v15 = vld [vmem:[#allocation11 + $0x64] ss:$8 sps:$4 sm:$0xff]   ;;  %v5596_v16 = vld [vmem:[#allocation11 + $0x60] ss:$8 sps:$4 sm:$0xff]  }
 0x375   : > { %v2107_v24 = vrot.slane %v2106_v20, 2 }
 0x376   : > { %v5975_v25 = vpop.eup %5974  ;;  %5984 = vrcp.f32 %v2103_v22  ;;  %v2114_v41 = vrot.slane %v2113_v23, 2 }
 0x377   : > { %v5977_v27 = vpop.eup %5976  ;;  %v2108_v44 = vadd.f32 %v2107_v24, %v2106_v20  ;;  %v2140_v32 = vmul.f32 %v5975_v25, %v6998_v21  ;;  %v5599_v25 = vld [vmem:[#allocation11 + $0x70] ss:$8 sps:$4 sm:$0xff]  }
 0x378   : > { %v5979_v28 = vpop.eup %5978  ;;  %v2115_v29 = vadd.f32 %v2114_v41, %v2113_v23  ;;  %v2118_v30 = vsel %vm1995_vm1, %v5977_v27, 0.0  ;;  %v5601_v23 = vld [vmem:[#allocation11 + $0x74] ss:$8 sps:$4 sm:$0xff]  }
 0x379   : > { %v5981_v31 = vpop.eup %5980  ;;  %v2141_v35 = vmul.f32 %v5979_v28, %v7002_v26  ;;  %v2109_v37 = vrot.slane %v2108_v44, 1  ;;  %v2119_v38 = vrot.slane %v2118_v30, 4 }
 0x37a   : > { %v2116_v39 = vrot.slane %v2115_v29, 1  ;;  %v2125_v40 = vsel %vm1995_vm1, %v5981_v31, 0.0 }
 0x37b   : > { %v2148_v42 = vpack.c.bf16 %v2141_v35, %v2140_v32  ;;  %v2110_v45 = vadd.f32 %v2109_v37, %v2108_v44  ;;  %v2120_v46 = vadd.f32 %v2119_v38, %v2118_v30  ;;  %v2126_v47 = vrot.slane %v2125_v40, 4  ;;  %v5602_v44 = vld [vmem:[#allocation11 + $0x80] ss:$8 sps:$4 sm:$0xff]   ;;  %v5607_v30 = vld [vmem:[#allocation11 + $0x94] ss:$8 sps:$4 sm:$0xff]  }
 0x37c   : > { %v2117_v48 = vadd.f32 %v2116_v39, %v2115_v29  ;;  %v5605_v32 = vld [vmem:[#allocation11 + $0x90] ss:$8 sps:$4 sm:$0xff]   ;;  %v5610_v37 = vld [vmem:[#allocation11 + $0xa4] ss:$8 sps:$4 sm:$0xff]   ;;  %v5608_v38 = vld [vmem:[#allocation11 + $0xa0] ss:$8 sps:$4 sm:$0xff]  }
 0x37d   : > { %5986 = vrcp.f32 %v2110_v45  ;;  %v2121_v50 = vrot.slane %v2120_v46, 2  ;;  %v2127_v51 = vadd.f32 %v2126_v47, %v2125_v40  ;;  %4940 = vmatmul.mubr.msk.bf16.vlgmr.msra.gmra.mrb[32].mxu1 %vm1995_vm1, %v2148_v42  ;;  %v5613_v39 = vld [vmem:[#allocation11 + $0xb4] ss:$8 sps:$4 sm:$0xff]   ;;  %v5611_v40 = vld [vmem:[#allocation11 + $0xb0] ss:$8 sps:$4 sm:$0xff]  }
 0x37e   : > { %v5983_v53 = vpop.eup %5982  ;;  %5988 = vrcp.f32 %v2117_v48  ;;  %2219 = vmatprep.mubr.bf16.mxu1 %v6400_v62  ;;  %v5616_v42 = vld [vmem:[#allocation11 + $0xc4] ss:$8 sps:$4 sm:$0xff]   ;;  %v5614_v45 = vld [vmem:[#allocation11 + $0xc0] ss:$8 sps:$4 sm:$0xff]   ;;  %v5617_v47 = vld [vmem:[#allocation11 + $0xd0] ss:$8 sps:$4 sm:$0xff]  }
 0x37f   : > { %v2122_v21 = vadd.f32 %v2121_v50, %v2120_v46  ;;  %v2128_v26 = vrot.slane %v2127_v51, 2  ;;  %v2142_v56 = vmul.f32 %v5983_v53, %v7007_v49  ;;  %v5619_v46 = vld [vmem:[#allocation11 + $0xd4] ss:$8 sps:$4 sm:$0xff]   ;;  %v5622_v48 = vld [vmem:[#allocation11 + $0xe4] ss:$8 sps:$4 sm:$0xff]  }
 0x380   : > { %v5985_v43 = vpop.eup %5984  ;;  %v5620_v50 = vld [vmem:[#allocation11 + $0xe0] ss:$8 sps:$4 sm:$0xff]   ;;  %v5623_v53 = vld [vmem:[#allocation11 + $0xf0] ss:$8 sps:$4 sm:$0xff]  }
 0x381   : > { %v2123_v54 = vrot.slane %v2122_v21, 1  ;;  %v2129_v55 = vadd.f32 %v2128_v26, %v2127_v51  ;;  %v2143_v57 = vmul.f32 %v5985_v43, %v7011_v52  ;;  %v7030_v5 = vpop.f32.mrb[4].mxu0  ;;  %v5625_v51 = vld [vmem:[#allocation11 + $0xf4] ss:$8 sps:$4 sm:$0xff]  }
 0x382   : > { %v7032_v18 = vpop.f32.mrb[5].mxu0  ;;  %v5628_v26 = vld [vmem:[#allocation14 + $0x4] ss:$16 sps:$4 sm:$0xff]   ;;  %v5631_v43 = vld [vmem:[#allocation14 + $0xc] ss:$16 sps:$4 sm:$0xff]  }
 0x383   : > { %v2124_v58 = vadd.f32 %v2123_v54, %v2122_v21  ;;  %v2130_v59 = vrot.slane %v2129_v55, 1  ;;  %v2149_v60 = vpack.c.bf16 %v2143_v57, %v2142_v56  ;;  %v7034_v19 = vpop.f32.mrb[6].mxu0  ;;  %v5626_v21 = vld [vmem:[#allocation14] ss:$16 sps:$4 sm:$0xff]   ;;  %v5634_v54 = vld [vmem:[#allocation14 + $0x24] ss:$16 sps:$4 sm:$0xff]   ;;  %3088 = vmatprep.subr.bf16.mxu1 %v5628_v26 }
 0x384   : > { %3089 = vmatpush1.bf16.msra.mxu1 %v5626_v21  ;;  %v5640_v56 = vld [vmem:[#allocation14 + $0x44] ss:$16 sps:$4 sm:$0xff]   ;;  %v5638_v57 = vld [vmem:[#allocation14 + $0x40] ss:$16 sps:$4 sm:$0xff]  }
 0x385   : > { %5990 = vrcp.f32 %v2124_v58  ;;  %v2131_v61 = vadd.f32 %v2130_v59, %v2129_v55  ;;  %4941 = vmatmul.mubr.msk.bf16.gmra.mrb[36].mxu1 %vm1995_vm1, %v2149_v60  ;;  %v5632_v55 = vld [vmem:[#allocation14 + $0x20] ss:$16 sps:$4 sm:$0xff]   ;;  %3090 = vmatprep.subr.bf16.mxu1 %v5634_v54  ;;  %v5646_v58 = vld [vmem:[#allocation14 + $0x64] ss:$16 sps:$4 sm:$0xff]  }
 0x386   : > { %2229 = vmatprep.mubr.bf16.mxu1 %v6400_v62  ;;  %v5644_v59 = vld [vmem:[#allocation14 + $0x60] ss:$16 sps:$4 sm:$0xff]   ;;  %v5652_v60 = vld [vmem:[#allocation14 + $0x84] ss:$16 sps:$4 sm:$0xff]  }
 0x387   : > { %v5987_v63 = vpop.eup %5986  ;;  %5992 = vrcp.f32 %v2131_v61  ;;  %v5650_v61 = vld [vmem:[#allocation14 + $0x80] ss:$16 sps:$4 sm:$0xff]  }
 0x388   : > { %v5989_v0 = vpop.eup %5988  ;;  %v2144_v1 = vmul.f32 %v5987_v63, %v5971_v17  ;;  %v7036_v17 = vpop.f32.mrb[7].mxu0  ;;  %3091 = vmatpush1.bf16.msra.mxu1 %v5632_v55  ;;  %v5658_v63 = vld [vmem:[#allocation14 + $0xa4] ss:$16 sps:$4 sm:$0xff]  }
 0x389   : > { %v2145_v2 = vmul.f32 %v5989_v0, %v5973_v6  ;;  %v5592_v6 = vld [vmem:[#allocation11 + $0x44] ss:$8 sps:$4 sm:$0xff]   ;;  %v7038_v8 = vpop.f32.mrb[8].mxu0  ;;  %3092 = vmatprep.subr.bf16.mxu1 %v5640_v56 }
 0x38a   : > { %2647 = vmatprep.subr.bf16.mxu0 %v5592_v6  ;;  %v5656_v0 = vld [vmem:[#allocation14 + $0xa0] ss:$16 sps:$4 sm:$0xff]   ;;  %v5688_v6 = vld [vmem:[#allocation14 + $0x144] ss:$16 sps:$4 sm:$0xff]  }
 0x38b   : > { %v2150_v3 = vpack.c.bf16 %v2145_v2, %v2144_v1  ;;  %2648 = vmatpush1.bf16.msra.mxu0 %v5590_v7  ;;  %v5664_v1 = vld [vmem:[#allocation14 + $0xc4] ss:$16 sps:$4 sm:$0xff]   ;;  %v5662_v2 = vld [vmem:[#allocation14 + $0xc0] ss:$16 sps:$4 sm:$0xff]  }
 0x38c   : > { %2649 = vmatprep.subr.bf16.mxu0 %v5595_v9  ;;  %3093 = vmatpush1.bf16.msra.mxu1 %v5638_v57  ;;  %v5686_v7 = vld [vmem:[#allocation14 + $0x140] ss:$16 sps:$4 sm:$0xff]   ;;  %v5694_v9 = vld [vmem:[#allocation14 + $0x164] ss:$16 sps:$4 sm:$0xff]  }
 0x38d   : > { %4942 = vmatmul.mubr.msk.bf16.gmra.mrb[40].mxu1 %vm1995_vm1, %v2150_v3  ;;  %3094 = vmatprep.subr.bf16.mxu1 %v5646_v58  ;;  %v5670_v3 = vld [vmem:[#allocation14 + $0xe4] ss:$16 sps:$4 sm:$0xff]  }
 0x38e   : > { %2239 = vmatprep.mubr.bf16.mxu1 %v6400_v62  ;;  %v7040_v62 = vpop.f32.mrb[9].mxu0 }
 0x38f   : > { %v5991_v49 = vpop.eup %5990  ;;  %v7042_v11 = vpop.f32.mrb[10].mxu0  ;;  %2650 = vmatpush1.bf16.msra.mxu0 %v5593_v14  ;;  %v5692_v14 = vld [vmem:[#allocation14 + $0x160] ss:$16 sps:$4 sm:$0xff]  }
 0x390   : > { %v2146_v4 = vmul.f32 %v5991_v49, %v5977_v27  ;;  %v7044_v10 = vpop.f32.mrb[11].mxu0  ;;  %2651 = vmatprep.subr.bf16.mxu0 %v5598_v15  ;;  %v5604_v27 = vld [vmem:[#allocation11 + $0x84] ss:$8 sps:$4 sm:$0xff]   ;;  %3095 = vmatpush1.bf16.msra.mxu1 %v5644_v59 }
 0x391   : > { %v5993_v52 = vpop.eup %5992  ;;  %v7046_v20 = vpop.f32.mrb[12].mxu0  ;;  %3096 = vmatprep.subr.bf16.mxu1 %v5652_v60  ;;  %v5668_v49 = vld [vmem:[#allocation14 + $0xe0] ss:$16 sps:$4 sm:$0xff]   ;;  %v5700_v15 = vld [vmem:[#allocation14 + $0x184] ss:$16 sps:$4 sm:$0xff]  }
 0x392   : > { %v2147_v12 = vmul.f32 %v5993_v52, %v5981_v31  ;;  %v7048_v22 = vpop.f32.mrb[13].mxu0  ;;  %v5676_v52 = vld [vmem:[#allocation14 + $0x104] ss:$16 sps:$4 sm:$0xff]  }
 0x393   : > { %2652 = vmatpush1.bf16.msra.mxu0 %v5596_v16  ;;  %v7050_v24 = vpop.f32.mrb[14].mxu0  ;;  %v5698_v16 = vld [vmem:[#allocation14 + $0x180] ss:$16 sps:$4 sm:$0xff]  }
 0x394   : > { %v2151_v13 = vpack.c.bf16 %v2147_v12, %v2146_v4  ;;  %v7052_v41 = vpop.f32.mrb[15].mxu0  ;;  %2653 = vmatprep.subr.bf16.mxu0 %v5601_v23  ;;  %3097 = vmatpush1.bf16.msra.mxu1 %v5650_v61  ;;  %v5674_v4 = vld [vmem:[#allocation14 + $0x100] ss:$16 sps:$4 sm:$0xff]   ;;  %v5682_v12 = vld [vmem:[#allocation14 + $0x124] ss:$16 sps:$4 sm:$0xff]  }
 0x395   : > { %3098 = vmatprep.subr.bf16.mxu1 %v5658_v63  ;;  %v5706_v23 = vld [vmem:[#allocation14 + $0x1a4] ss:$16 sps:$4 sm:$0xff]  }
 0x396   : > { %4943 = vmatmul.mubr.msk.bf16.gmra.mrb[44].mxu1 %vm1995_vm1, %v2151_v13  ;;  %v5680_v13 = vld [vmem:[#allocation14 + $0x120] ss:$16 sps:$4 sm:$0xff]  }
 0x397   : > { %2654 = vmatpush1.bf16.msra.mxu0 %v5599_v25  ;;  %v5704_v25 = vld [vmem:[#allocation14 + $0x1a0] ss:$16 sps:$4 sm:$0xff]  }
 0x398   : > { %2655 = vmatprep.subr.bf16.mxu0 %v5604_v27  ;;  %3099 = vmatpush1.bf16.msra.mxu1 %v5656_v0  ;;  %v5712_v27 = vld [vmem:[#allocation14 + $0x1c4] ss:$16 sps:$4 sm:$0xff]  }
 0x399   : > { %v7054_v28 = vpop.f32.mrb[16].mxu0  ;;  %3100 = vmatprep.subr.bf16.mxu1 %v5664_v1 }
 0x39a   : > { %v7056_v29 = vpop.f32.mrb[17].mxu0 }
 0x39b   : > { %2656 = vmatpush1.bf16.msra.mxu0 %v5602_v44  ;;  %v7058_v31 = vpop.f32.mrb[18].mxu0  ;;  %v5710_v44 = vld [vmem:[#allocation14 + $0x1c0] ss:$16 sps:$4 sm:$0xff]  }
 0x39c   : > { %v7060_v35 = vpop.f32.mrb[19].mxu0  ;;  %2657 = vmatprep.subr.bf16.mxu0 %v5607_v30  ;;  %3101 = vmatpush1.bf16.msra.mxu1 %v5662_v2  ;;  %v7063_v30 = vsub.s32 2, %v6927_v33 }
 0x39d   : > { %3102 = vmatprep.subr.bf16.mxu1 %v5670_v3 }
 0x39f   : > { %2658 = vmatpush1.bf16.msra.mxu0 %v5605_v32  ;;  %v7066_v32 = vsub.s32 3, %v6927_v33 }
 0x3a0   : > { %2659 = vmatprep.subr.bf16.mxu0 %v5610_v37  ;;  %3103 = vmatpush1.bf16.msra.mxu1 %v5668_v49  ;;  %v6010_v37 = vld [vmem:[#allocation10] sm:$0xf] }
 0x3a1   : > { %3104 = vmatprep.subr.bf16.mxu1 %v5676_v52 }
 0x3a3   : > { %2660 = vmatpush1.bf16.msra.mxu0 %v5608_v38  ;;  %v1131_v38 = vrot.slane %v6010_v37, %v7063_v30 }
 0x3a4   : > { %2661 = vmatprep.subr.bf16.mxu0 %v5613_v39  ;;  %3105 = vmatpush1.bf16.msra.mxu1 %v5674_v4  ;;  %v1135_v39 = vrot.slane %v6010_v37, %v7066_v32 }
 0x3a5   : > { %3106 = vmatprep.subr.bf16.mxu1 %v5682_v12  ;;  %v1618_v55 = vadd.f32 %v7038_v8, %v1131_v38  ;;  %v1622_v58 = vadd.f32 %v7042_v11, %v1131_v38  ;;  %v7085_v8 = vadd.f32 %v7050_v24, %v1131_v38  ;;  %v7097_v4 = vadd.f32 %v7058_v31, %v1131_v38 }
 0x3a6   : > { %v7082_v61 = vadd.f32 %v7048_v22, %v1135_v39 }
 0x3a7   : > { %2662 = vmatpush1.bf16.msra.mxu0 %v5611_v40  ;;  %v1608_v40 = vadd.f32 %v7030_v5, %v1131_v38  ;;  %v1620_v5 = vadd.f32 %v7040_v62, %v1135_v39  ;;  %v7088_v62 = vadd.f32 %v7052_v41, %v1135_v39 }
 0x3a8   : > { %2663 = vmatprep.subr.bf16.mxu0 %v5616_v42  ;;  %3107 = vmatpush1.bf16.msra.mxu1 %v5680_v13  ;;  %v1610_v42 = vadd.f32 %v7032_v18, %v1135_v39 }
 0x3a9   : > { %3108 = vmatprep.subr.bf16.mxu1 %v5688_v6  ;;  %v7100_v6 = vadd.f32 %v7060_v35, %v1135_v39 }
 0x3ab   : > { %2664 = vmatpush1.bf16.msra.mxu0 %v5614_v45 }
 0x3ac   : > { %2665 = vmatprep.subr.bf16.mxu0 %v5619_v46  ;;  %3109 = vmatpush1.bf16.msra.mxu1 %v5686_v7  ;;  %v1612_v46 = vadd.f32 %v7034_v19, %v1131_v38  ;;  %v1624_v19 = vadd.f32 %v7044_v10, %v1135_v39  ;;  %v7091_v10 = vadd.f32 %v7054_v28, %v1131_v38 }
 0x3ad   : > { %3110 = vmatprep.subr.bf16.mxu1 %v5694_v9 }
 0x3af   : > { %2666 = vmatpush1.bf16.msra.mxu0 %v5617_v47 }
 0x3b0   : > { %2667 = vmatprep.subr.bf16.mxu0 %v5622_v48  ;;  %3111 = vmatpush1.bf16.msra.mxu1 %v5692_v14 }
 0x3b1   : > { %3112 = vmatprep.subr.bf16.mxu1 %v5700_v15 }
 0x3b3   : > { %2668 = vmatpush1.bf16.msra.mxu0 %v5620_v50  ;;  %v1614_v50 = vadd.f32 %v7036_v17, %v1135_v39  ;;  %v7079_v17 = vadd.f32 %v7046_v20, %v1131_v38  ;;  %v7094_v20 = vadd.f32 %v7056_v29, %v1135_v39 }
 0x3b4   : > { %2669 = vmatprep.subr.bf16.mxu0 %v5625_v51  ;;  %3113 = vmatpush1.bf16.msra.mxu1 %v5698_v16 }
 0x3b5   : > { %3114 = vmatprep.subr.bf16.mxu1 %v5706_v23 }
 0x3b7   : > { %2670 = vmatpush1.bf16.msra.mxu0 %v5623_v53 }
 0x3b8   : > { %3129 = vmatprep.subr.bf16.mxu0 %v5631_v43  ;;  %3115 = vmatpush1.bf16.msra.mxu1 %v5704_v25 }
 0x3b9   : > { %3116 = vmatprep.subr.bf16.mxu1 %v5712_v27 }
 0x3bc   : > { %3117 = vmatpush1.bf16.msra.mxu1 %v5710_v44 }
 0x450   : > { %v2211_v45 = vpop.f32.mrb[32].mxu1 }
 0x451   : > { %v2250_v47 = vmul.f32 %v2211_v45, %v1608_v40  ;;  %v2213_v48 = vpop.f32.mrb[33].mxu1 }
 0x452   : > { %v2251_v51 = vmul.f32 %v2213_v48, %v1610_v42  ;;  %v2215_v53 = vpop.f32.mrb[34].mxu1 }
 0x453   : > { %v2266_v21 = vrot.slane %v2250_v47, 4  ;;  %v2252_v26 = vmul.f32 %v2215_v53, %v1612_v46  ;;  %v2217_v43 = vpop.f32.mrb[35].mxu1 }
 0x454   : > { %v2272_v54 = vrot.slane %v2251_v51, 4  ;;  %v2253_v56 = vmul.f32 %v2217_v43, %v1614_v50 }
 0x455   : > { %v2267_v57 = vadd.f32 %v2266_v21, %v2250_v47  ;;  %v2278_v18 = vrot.slane %v2252_v26, 4 }
 0x456   : > { %v2273_v59 = vadd.f32 %v2272_v54, %v2251_v51  ;;  %v2284_v60 = vrot.slane %v2253_v56, 4 }
 0x457   : > { %v2268_v63 = vrot.slane %v2267_v57, 2  ;;  %v2279_v0 = vadd.f32 %v2278_v18, %v2252_v26 }
 0x458   : > { %v2274_v1 = vrot.slane %v2273_v59, 2  ;;  %v2285_v11 = vadd.f32 %v2284_v60, %v2253_v56  ;;  %v2221_v2 = vpop.f32.mrb[36].mxu1 }
 0x459   : > { %v2269_v3 = vadd.f32 %v2268_v63, %v2267_v57  ;;  %v2280_v22 = vrot.slane %v2279_v0, 2  ;;  %v2254_v49 = vmul.f32 %v2221_v2, %v1618_v55  ;;  %v2223_v52 = vpop.f32.mrb[37].mxu1 }
 0x45a   : > { %v2275_v24 = vadd.f32 %v2274_v1, %v2273_v59  ;;  %v2286_v41 = vrot.slane %v2285_v11, 2  ;;  %v2255_v12 = vmul.f32 %v2223_v52, %v1620_v5  ;;  %v2225_v13 = vpop.f32.mrb[38].mxu1 }
 0x45b   : > { %v2270_v28 = vrot.slane %v2269_v3, 1  ;;  %v2281_v7 = vadd.f32 %v2280_v22, %v2279_v0  ;;  %v2290_v9 = vrot.slane %v2254_v49, 4  ;;  %v2256_v29 = vmul.f32 %v2225_v13, %v1622_v58  ;;  %v2227_v14 = vpop.f32.mrb[39].mxu1 }
 0x45c   : > { %v2276_v15 = vrot.slane %v2275_v24, 1  ;;  %v2287_v16 = vadd.f32 %v2286_v41, %v2285_v11  ;;  %v2296_v23 = vrot.slane %v2255_v12, 4  ;;  %v2257_v25 = vmul.f32 %v2227_v14, %v1624_v19 }
 0x45d   : > { %v2271_v27 = vadd.f32 %v2270_v28, %v2269_v3  ;;  %v2282_v31 = vrot.slane %v2281_v7, 1  ;;  %v2291_v44 = vadd.f32 %v2290_v9, %v2254_v49  ;;  %v2302_v37 = vrot.slane %v2256_v29, 4 }
 0x45e   : > { %v2277_v38 = vadd.f32 %v2276_v15, %v2275_v24  ;;  %v2288_v40 = vrot.slane %v2287_v16, 1  ;;  %v2297_v42 = vadd.f32 %v2296_v23, %v2255_v12  ;;  %v2308_v45 = vrot.slane %v2257_v25, 4 }
 0x45f   : > { %v2362_v46 = vpack.c.bf16 %v2271_v27, %v2271_v27  ;;  %v2283_v35 = vadd.f32 %v2282_v31, %v2281_v7  ;;  %v2292_v39 = vrot.slane %v2291_v44, 2  ;;  %v2303_v47 = vadd.f32 %v2302_v37, %v2256_v29 }
 0x460   : > { %v2363_v48 = vpack.c.bf16 %v2277_v38, %v2277_v38  ;;  %v2289_v50 = vadd.f32 %v2288_v40, %v2287_v16  ;;  %v2298_v51 = vrot.slane %v2297_v42, 2  ;;  %v2309_v53 = vadd.f32 %v2308_v45, %v2257_v25  ;;  %v2231_v21 = vpop.f32.mrb[40].mxu1 }
 0x461   : > { %v2438_v26 = vunpack.c.l.b16 %v2362_v46  ;;  %v2364_v43 = vpack.c.bf16 %v2283_v35, %v2283_v35  ;;  %v2293_v54 = vadd.f32 %v2292_v39, %v2291_v44  ;;  %v2304_v55 = vrot.slane %v2303_v47, 2  ;;  %v2233_v56 = vpop.f32.mrb[41].mxu1 }
 0x462   : > { %v2439_v5 = vunpack.c.l.b16 %v2363_v48  ;;  %v2365_v57 = vpack.c.bf16 %v2289_v50, %v2289_v50  ;;  %v2299_v18 = vadd.f32 %v2298_v51, %v2297_v42  ;;  %v2310_v58 = vrot.slane %v2309_v53, 2  ;;  %v2235_v19 = vpop.f32.mrb[42].mxu1 }
 0x463   : > { %v2440_v59 = vunpack.c.l.b16 %v2364_v43  ;;  %v2294_v60 = vrot.slane %v2293_v54, 1  ;;  %v2305_v63 = vadd.f32 %v2304_v55, %v2303_v47  ;;  %v2258_v0 = vmul.f32 %v2231_v21, %v7079_v17  ;;  %v2237_v1 = vpop.f32.mrb[43].mxu1 }
 0x464   : > { %v2441_v11 = vunpack.c.l.b16 %v2365_v57  ;;  %v2300_v2 = vrot.slane %v2299_v18, 1  ;;  %v2311_v3 = vadd.f32 %v2310_v58, %v2309_v53  ;;  %v2259_v22 = vmul.f32 %v2233_v56, %v7082_v61 }
 0x465   : > { %v2455_v49 = vsel %vm2454_vm2, %v2440_v59, %v2438_v26  ;;  %v2295_v52 = vadd.f32 %v2294_v60, %v2293_v54  ;;  %v2306_v24 = vrot.slane %v2305_v63, 1  ;;  %v2314_v41 = vrot.slane %v2258_v0, 4 }
 0x466   : > { %v2468_v12 = vsel %vm2454_vm2, %v2441_v11, %v2439_v5  ;;  %v2301_v13 = vadd.f32 %v2300_v2, %v2299_v18  ;;  %v2312_v28 = vrot.slane %v2311_v3, 1  ;;  %v2320_v7 = vrot.slane %v2259_v22, 4 }
 0x467   : > { %v2366_v9 = vpack.c.bf16 %v2295_v52, %v2295_v52  ;;  %v2307_v29 = vadd.f32 %v2306_v24, %v2305_v63  ;;  %v2315_v14 = vadd.f32 %v2314_v41, %v2258_v0  ;;  %v2260_v17 = vmul.f32 %v2235_v19, %v7085_v8 }
 0x468   : > { %v2367_v15 = vpack.c.bf16 %v2301_v13, %v2301_v13  ;;  %v2313_v16 = vadd.f32 %v2312_v28, %v2311_v3  ;;  %v2321_v23 = vadd.f32 %v2320_v7, %v2259_v22  ;;  %v2261_v61 = vmul.f32 %v2237_v1, %v7088_v62 }
 0x469   : > { %v2442_v25 = vunpack.c.l.b16 %v2366_v9  ;;  %v2368_v27 = vpack.c.bf16 %v2307_v29, %v2307_v29  ;;  %v2316_v31 = vrot.slane %v2315_v14, 2  ;;  %v2326_v44 = vrot.slane %v2260_v17, 4  ;;  %v2241_v37 = vpop.f32.mrb[44].mxu1 }
 0x46a   : > { %v2443_v38 = vunpack.c.l.b16 %v2367_v15  ;;  %v2369_v40 = vpack.c.bf16 %v2313_v16, %v2313_v16  ;;  %v2322_v42 = vrot.slane %v2321_v23, 2  ;;  %v2332_v45 = vrot.slane %v2261_v61, 4  ;;  %v2243_v46 = vpop.f32.mrb[45].mxu1 }
 0x46b   : > { %v2457_v35 = vsel %vm2456_vm3, %v2442_v25, %v2455_v49  ;;  %v2444_v39 = vunpack.c.l.b16 %v2368_v27  ;;  %v2317_v8 = vadd.f32 %v2316_v31, %v2315_v14  ;;  %v2327_v47 = vadd.f32 %v2326_v44, %v2260_v17  ;;  %v2245_v48 = vpop.f32.mrb[46].mxu1 }
 0x46c   : > { %v2469_v50 = vsel %vm2456_vm3, %v2443_v38, %v2468_v12  ;;  %v2445_v62 = vunpack.c.l.b16 %v2369_v40  ;;  %v2323_v51 = vadd.f32 %v2322_v42, %v2321_v23  ;;  %v2333_v53 = vadd.f32 %v2332_v45, %v2261_v61  ;;  %v2247_v21 = vpop.f32.mrb[47].mxu1 }
 0x46d   : > { %v2459_v26 = vsel %vm2458_vm4, %v2444_v39, %v2457_v35  ;;  %v2318_v43 = vrot.slane %v2317_v8, 1  ;;  %v2328_v54 = vrot.slane %v2327_v47, 2  ;;  %v2262_v55 = vmul.f32 %v2241_v37, %v7091_v10 }
 0x46e   : > { %v2470_v56 = vsel %vm2458_vm4, %v2445_v62, %v2469_v50  ;;  %v2324_v5 = vrot.slane %v2323_v51, 1  ;;  %v2334_v57 = vrot.slane %v2333_v53, 2  ;;  %v2263_v18 = vmul.f32 %v2243_v46, %v7094_v20 }
 0x46f   : > { %v2319_v58 = vadd.f32 %v2318_v43, %v2317_v8  ;;  %v2329_v19 = vadd.f32 %v2328_v54, %v2327_v47  ;;  %v2338_v59 = vrot.slane %v2262_v55, 4  ;;  %v2264_v60 = vmul.f32 %v2245_v48, %v7097_v4 }
 0x470   : > { %v2325_v63 = vadd.f32 %v2324_v5, %v2323_v51  ;;  %v2335_v0 = vadd.f32 %v2334_v57, %v2333_v53  ;;  %v2344_v1 = vrot.slane %v2263_v18, 4  ;;  %v2265_v11 = vmul.f32 %v2247_v21, %v7100_v6 }
 0x471   : > { %v2370_v2 = vpack.c.bf16 %v2319_v58, %v2319_v58  ;;  %v2330_v3 = vrot.slane %v2329_v19, 1  ;;  %v2339_v10 = vadd.f32 %v2338_v59, %v2262_v55  ;;  %v2350_v22 = vrot.slane %v2264_v60, 4  ;;  %v5629_v58 = vld [vmem:[#allocation14 + $0x8] ss:$16 sps:$4 sm:$0xff]   ;;  %v5637_v59 = vld [vmem:[#allocation14 + $0x2c] ss:$16 sps:$4 sm:$0xff]  }
 0x472   : > { %v2371_v49 = vpack.c.bf16 %v2325_v63, %v2325_v63  ;;  %v2336_v52 = vrot.slane %v2335_v0, 1  ;;  %v2345_v24 = vadd.f32 %v2344_v1, %v2263_v18  ;;  %v2356_v41 = vrot.slane %v2265_v11, 4  ;;  %v5643_v63 = vld [vmem:[#allocation14 + $0x4c] ss:$16 sps:$4 sm:$0xff]  }
 0x473   : > { %v2446_v20 = vunpack.c.l.b16 %v2370_v2  ;;  %v2331_v12 = vadd.f32 %v2330_v3, %v2329_v19  ;;  %v2340_v13 = vrot.slane %v2339_v10, 2  ;;  %v2351_v28 = vadd.f32 %v2350_v22, %v2264_v60  ;;  %v5635_v60 = vld [vmem:[#allocation14 + $0x28] ss:$16 sps:$4 sm:$0xff]   ;;  %v5649_v1 = vld [vmem:[#allocation14 + $0x6c] ss:$16 sps:$4 sm:$0xff]  }
 0x474   : > { %v2447_v7 = vunpack.c.l.b16 %v2371_v49  ;;  %v2337_v9 = vadd.f32 %v2336_v52, %v2335_v0  ;;  %v2346_v4 = vrot.slane %v2345_v24, 2  ;;  %v2357_v29 = vadd.f32 %v2356_v41, %v2265_v11  ;;  %v5641_v0 = vld [vmem:[#allocation14 + $0x48] ss:$16 sps:$4 sm:$0xff]   ;;  %v5655_v2 = vld [vmem:[#allocation14 + $0x8c] ss:$16 sps:$4 sm:$0xff]  }
 0x475   : > { %v2461_v14 = vsel %vm2460_vm5, %v2446_v20, %v2459_v26  ;;  %v2372_v17 = vpack.c.bf16 %v2331_v12, %v2331_v12  ;;  %v2341_v6 = vadd.f32 %v2340_v13, %v2339_v10  ;;  %v2352_v15 = vrot.slane %v2351_v28, 2  ;;  %v5647_v11 = vld [vmem:[#allocation14 + $0x68] ss:$16 sps:$4 sm:$0xff]   ;;  %v5661_v10 = vld [vmem:[#allocation14 + $0xac] ss:$16 sps:$4 sm:$0xff]  }
 0x476   : > { %v2373_v16 = vpack.c.bf16 %v2337_v9, %v2337_v9  ;;  %v2347_v23 = vadd.f32 %v2346_v4, %v2345_v24  ;;  %v2358_v61 = vrot.slane %v2357_v29, 2  ;;  %v2471_v25 = vsel %vm2460_vm5, %v2447_v7, %v2470_v56  ;;  %v5653_v3 = vld [vmem:[#allocation14 + $0x88] ss:$16 sps:$4 sm:$0xff]   ;;  %v5667_v49 = vld [vmem:[#allocation14 + $0xcc] ss:$16 sps:$4 sm:$0xff]  }
 0x477   : > { %v2448_v27 = vunpack.c.l.b16 %v2372_v17  ;;  %v2342_v31 = vrot.slane %v2341_v6, 1  ;;  %v2353_v44 = vadd.f32 %v2352_v15, %v2351_v28  ;;  %v5659_v22 = vld [vmem:[#allocation14 + $0xa8] ss:$16 sps:$4 sm:$0xff]   ;;  %v5673_v24 = vld [vmem:[#allocation14 + $0xec] ss:$16 sps:$4 sm:$0xff]  }
 0x478   : > { %v2449_v37 = vunpack.c.l.b16 %v2373_v16  ;;  %v2348_v38 = vrot.slane %v2347_v23, 1  ;;  %v2359_v40 = vadd.f32 %v2358_v61, %v2357_v29  ;;  %v5665_v52 = vld [vmem:[#allocation14 + $0xc8] ss:$16 sps:$4 sm:$0xff]   ;;  %v5679_v20 = vld [vmem:[#allocation14 + $0x10c] ss:$16 sps:$4 sm:$0xff]  }
 0x479   : > { %v2343_v42 = vadd.f32 %v2342_v31, %v2341_v6  ;;  %v2354_v45 = vrot.slane %v2353_v44, 1  ;;  %v2463_v46 = vsel %vm2462_vm6, %v2448_v27, %v2461_v14  ;;  %v5671_v41 = vld [vmem:[#allocation14 + $0xe8] ss:$16 sps:$4 sm:$0xff]   ;;  %v5685_v13 = vld [vmem:[#allocation14 + $0x12c] ss:$16 sps:$4 sm:$0xff]  }
 0x47a   : > { %v2349_v35 = vadd.f32 %v2348_v38, %v2347_v23  ;;  %v2360_v39 = vrot.slane %v2359_v40, 1  ;;  %v2472_v8 = vsel %vm2462_vm6, %v2449_v37, %v2471_v25  ;;  %v5677_v12 = vld [vmem:[#allocation14 + $0x108] ss:$16 sps:$4 sm:$0xff]   ;;  %v5691_v7 = vld [vmem:[#allocation14 + $0x14c] ss:$16 sps:$4 sm:$0xff]  }
 0x47b   : > { %v2374_v47 = vpack.c.bf16 %v2343_v42, %v2343_v42  ;;  %v2355_v48 = vadd.f32 %v2354_v45, %v2353_v44  ;;  %v5683_v28 = vld [vmem:[#allocation14 + $0x128] ss:$16 sps:$4 sm:$0xff]   ;;  %v5697_v4 = vld [vmem:[#allocation14 + $0x16c] ss:$16 sps:$4 sm:$0xff]   ;;  %v5718_v61 = vld [vmem:[#allocation14 + $0x1e4] ss:$16 sps:$4 sm:$0xff]  }
 0x47c   : > { %v2375_v50 = vpack.c.bf16 %v2349_v35, %v2349_v35  ;;  %v2361_v62 = vadd.f32 %v2360_v39, %v2359_v40  ;;  %v5689_v9 = vld [vmem:[#allocation14 + $0x148] ss:$16 sps:$4 sm:$0xff]   ;;  %v5703_v14 = vld [vmem:[#allocation14 + $0x18c] ss:$16 sps:$4 sm:$0xff]   ;;  %v5716_v27 = vld [vmem:[#allocation14 + $0x1e0] ss:$16 sps:$4 sm:$0xff]   ;;  %3118 = vmatprep.subr.bf16.mxu1 %v5718_v61 }
 0x47d   : > { %v2450_v51 = vunpack.c.l.b16 %v2374_v47  ;;  %v2376_v53 = vpack.c.bf16 %v2355_v48, %v2355_v48  ;;  %v5695_v29 = vld [vmem:[#allocation14 + $0x168] ss:$16 sps:$4 sm:$0xff]   ;;  %v5709_v6 = vld [vmem:[#allocation14 + $0x1ac] ss:$16 sps:$4 sm:$0xff]   ;;  %3119 = vmatpush1.bf16.msra.mxu1 %v5716_v27 }
 0x47e   : > { %v2451_v21 = vunpack.c.l.b16 %v2375_v50  ;;  %v2377_v26 = vpack.c.bf16 %v2361_v62, %v2361_v62  ;;  %v5701_v17 = vld [vmem:[#allocation14 + $0x188] ss:$16 sps:$4 sm:$0xff]   ;;  %v5715_v16 = vld [vmem:[#allocation14 + $0x1cc] ss:$16 sps:$4 sm:$0xff]  }
 0x47f   : > { %v2452_v43 = vunpack.c.l.b16 %v2376_v53  ;;  %v2465_v54 = vsel %vm2464_vm7, %v2450_v51, %v2463_v46  ;;  %v5707_v15 = vld [vmem:[#allocation14 + $0x1a8] ss:$16 sps:$4 sm:$0xff]   ;;  %v5721_v25 = vld [vmem:[#allocation14 + $0x1ec] ss:$16 sps:$4 sm:$0xff]  }
 0x480   : > { %v2453_v55 = vunpack.c.l.b16 %v2377_v26  ;;  %v2473_v56 = vsel %vm2464_vm7, %v2451_v21, %v2472_v8  ;;  %v5713_v23 = vld [vmem:[#allocation14 + $0x1c8] ss:$16 sps:$4 sm:$0xff]   ;;  %v5724_v44 = vld [vmem:[#allocation16 + $0x4] ss:$8 sps:$4 sm:$0xff]   ;;  %v2410_v38 = vld [vmem:[#allocation13] sm:$0x3] }
 0x481   : > { %v2467_v5 = vsel %vm2466_vm8, %v2452_v43, %v2465_v54  ;;  %v5719_v31 = vld [vmem:[#allocation14 + $0x1e8] ss:$16 sps:$4 sm:$0xff]   ;;  %v5727_v37 = vld [vmem:[#allocation16 + $0x104] ss:$8 sps:$4 sm:$0xff]   ;;  %3574 = vmatprep.subr.bf16.mxu1 %v5724_v44  ;;  %v2415_v40 = vrot.slane %v2410_v38, %v6930_v34  ;;  %v2419_v42 = vrot.slane %v2410_v38, %v6933_v36  ;;  %v5730_v53 = vld [vmem:[#allocation16 + $0x14] ss:$8 sps:$4 sm:$0xff]  }
 0x482   : > { %v2474_v57 = vsel %vm2466_vm8, %v2453_v55, %v2473_v56  ;;  %v2475_v19 = vpack.c.b16 %v2467_v5, %v2467_v5  ;;  %v5722_v50 = vld [vmem:[#allocation16] ss:$8 sps:$4 sm:$0xff]   ;;  %v5733_v21 = vld [vmem:[#allocation16 + $0x114] ss:$8 sps:$4 sm:$0xff]   ;;  %v5728_v26 = vld [vmem:[#allocation16 + $0x10] ss:$8 sps:$4 sm:$0xff]  }
 0x483   : > { %v2476_v18 = vpack.c.b16 %v2474_v57, %v2474_v57  ;;  %v5725_v62 = vld [vmem:[#allocation16 + $0x100] ss:$8 sps:$4 sm:$0xff]   ;;  %v5731_v43 = vld [vmem:[#allocation16 + $0x110] ss:$8 sps:$4 sm:$0xff]   ;;  %v5736_v54 = vld [vmem:[#allocation16 + $0x24] ss:$8 sps:$4 sm:$0xff]  }
 0x484   : > { %v5739_v55 = vld [vmem:[#allocation16 + $0x124] ss:$8 sps:$4 sm:$0xff]   ;;  %v5734_v56 = vld [vmem:[#allocation16 + $0x20] ss:$8 sps:$4 sm:$0xff]   ;;  %v5742_v57 = vld [vmem:[#allocation16 + $0x34] ss:$8 sps:$4 sm:$0xff]  }
 0x485   : > { %2671 = vmatprep.mubr.bf16.mxu0 %v2476_v18  ;;  %v5737_v5 = vld [vmem:[#allocation16 + $0x120] ss:$8 sps:$4 sm:$0xff]   ;;  %v5745_v18 = vld [vmem:[#allocation16 + $0x134] ss:$8 sps:$4 sm:$0xff]   ;;  %v5788_v27 = vld [vmem:[#allocation16 + $0xb0] ss:$8 sps:$4 sm:$0xff]  }
 0x486   : > { %2672 = vmatmul.mubr.bf16.vlgmr.msra.gmra.mrb[20].mxu0 %v2475_v19  ;;  %v5743_v19 = vld [vmem:[#allocation16 + $0x130] ss:$8 sps:$4 sm:$0xff]   ;;  %v5790_v61 = vld [vmem:[#allocation16 + $0xb4] ss:$8 sps:$4 sm:$0xff]   ;;  %v5796_v44 = vld [vmem:[#allocation16 + $0xc4] ss:$8 sps:$4 sm:$0xff]  }
 0x487   : > { %3130 = vmatpush1.bf16.msra.mxu0 %v5629_v58  ;;  %v5740_v58 = vld [vmem:[#allocation16 + $0x30] ss:$8 sps:$4 sm:$0xff]   ;;  %v5794_v38 = vld [vmem:[#allocation16 + $0xc0] ss:$8 sps:$4 sm:$0xff]  }
 0x488   : > { %3131 = vmatprep.subr.bf16.mxu0 %v5637_v59  ;;  %v5748_v59 = vld [vmem:[#allocation16 + $0x44] ss:$8 sps:$4 sm:$0xff]  }
 0x48b   : > { %3132 = vmatpush1.bf16.msra.mxu0 %v5635_v60  ;;  %v5751_v60 = vld [vmem:[#allocation16 + $0x144] ss:$8 sps:$4 sm:$0xff]  }
 0x48c   : > { %3133 = vmatprep.subr.bf16.mxu0 %v5643_v63  ;;  %v5746_v63 = vld [vmem:[#allocation16 + $0x40] ss:$8 sps:$4 sm:$0xff]  }
 0x48f   : > { %3134 = vmatpush1.bf16.msra.mxu0 %v5641_v0  ;;  %v5749_v0 = vld [vmem:[#allocation16 + $0x140] ss:$8 sps:$4 sm:$0xff]  }
 0x490   : > { %3135 = vmatprep.subr.bf16.mxu0 %v5649_v1  ;;  %v5754_v1 = vld [vmem:[#allocation16 + $0x54] ss:$8 sps:$4 sm:$0xff]  }
 0x493   : > { %3136 = vmatpush1.bf16.msra.mxu0 %v5647_v11  ;;  %v5757_v11 = vld [vmem:[#allocation16 + $0x154] ss:$8 sps:$4 sm:$0xff]  }
 0x494   : > { %3137 = vmatprep.subr.bf16.mxu0 %v5655_v2  ;;  %v5752_v2 = vld [vmem:[#allocation16 + $0x50] ss:$8 sps:$4 sm:$0xff]  }
 0x497   : > { %3138 = vmatpush1.bf16.msra.mxu0 %v5653_v3  ;;  %v5755_v3 = vld [vmem:[#allocation16 + $0x150] ss:$8 sps:$4 sm:$0xff]  }
 0x498   : > { %3139 = vmatprep.subr.bf16.mxu0 %v5661_v10  ;;  %v5760_v10 = vld [vmem:[#allocation16 + $0x64] ss:$8 sps:$4 sm:$0xff]  }
 0x49b   : > { %3140 = vmatpush1.bf16.msra.mxu0 %v5659_v22  ;;  %v5763_v22 = vld [vmem:[#allocation16 + $0x164] ss:$8 sps:$4 sm:$0xff]  }
 0x49c   : > { %3141 = vmatprep.subr.bf16.mxu0 %v5667_v49  ;;  %v5758_v49 = vld [vmem:[#allocation16 + $0x60] ss:$8 sps:$4 sm:$0xff]  }
 0x49f   : > { %3142 = vmatpush1.bf16.msra.mxu0 %v5665_v52  ;;  %v5761_v52 = vld [vmem:[#allocation16 + $0x160] ss:$8 sps:$4 sm:$0xff]  }
 0x4a0   : > { %3143 = vmatprep.subr.bf16.mxu0 %v5673_v24  ;;  %v5766_v24 = vld [vmem:[#allocation16 + $0x74] ss:$8 sps:$4 sm:$0xff]  }
 0x4a3   : > { %3144 = vmatpush1.bf16.msra.mxu0 %v5671_v41  ;;  %v5769_v41 = vld [vmem:[#allocation16 + $0x174] ss:$8 sps:$4 sm:$0xff]  }
 0x4a4   : > { %3145 = vmatprep.subr.bf16.mxu0 %v5679_v20  ;;  %v5764_v20 = vld [vmem:[#allocation16 + $0x70] ss:$8 sps:$4 sm:$0xff]  }
 0x4a7   : > { %3146 = vmatpush1.bf16.msra.mxu0 %v5677_v12  ;;  %v5767_v12 = vld [vmem:[#allocation16 + $0x170] ss:$8 sps:$4 sm:$0xff]  }
 0x4a8   : > { %3147 = vmatprep.subr.bf16.mxu0 %v5685_v13  ;;  %v5772_v13 = vld [vmem:[#allocation16 + $0x84] ss:$8 sps:$4 sm:$0xff]  }
 0x4ab   : > { %3148 = vmatpush1.bf16.msra.mxu0 %v5683_v28  ;;  %v5775_v28 = vld [vmem:[#allocation16 + $0x184] ss:$8 sps:$4 sm:$0xff]  }
 0x4ac   : > { %3149 = vmatprep.subr.bf16.mxu0 %v5691_v7  ;;  %v5770_v7 = vld [vmem:[#allocation16 + $0x80] ss:$8 sps:$4 sm:$0xff]  }
 0x4af   : > { %3150 = vmatpush1.bf16.msra.mxu0 %v5689_v9  ;;  %v5773_v9 = vld [vmem:[#allocation16 + $0x180] ss:$8 sps:$4 sm:$0xff]  }
 0x4b0   : > { %3151 = vmatprep.subr.bf16.mxu0 %v5697_v4  ;;  %v5778_v4 = vld [vmem:[#allocation16 + $0x94] ss:$8 sps:$4 sm:$0xff]  }
 0x4b3   : > { %3152 = vmatpush1.bf16.msra.mxu0 %v5695_v29  ;;  %v5781_v29 = vld [vmem:[#allocation16 + $0x194] ss:$8 sps:$4 sm:$0xff]  }
 0x4b4   : > { %3153 = vmatprep.subr.bf16.mxu0 %v5703_v14  ;;  %v5776_v14 = vld [vmem:[#allocation16 + $0x90] ss:$8 sps:$4 sm:$0xff]  }
 0x4b7   : > { %3154 = vmatpush1.bf16.msra.mxu0 %v5701_v17  ;;  %v5779_v17 = vld [vmem:[#allocation16 + $0x190] ss:$8 sps:$4 sm:$0xff]  }
 0x4b8   : > { %3155 = vmatprep.subr.bf16.mxu0 %v5709_v6  ;;  %v5784_v6 = vld [vmem:[#allocation16 + $0xa4] ss:$8 sps:$4 sm:$0xff]  }
 0x4bb   : > { %3156 = vmatpush1.bf16.msra.mxu0 %v5707_v15  ;;  %v5787_v15 = vld [vmem:[#allocation16 + $0x1a4] ss:$8 sps:$4 sm:$0xff]  }
 0x4bc   : > { %3157 = vmatprep.subr.bf16.mxu0 %v5715_v16  ;;  %v5782_v16 = vld [vmem:[#allocation16 + $0xa0] ss:$8 sps:$4 sm:$0xff]  }
 0x4bf   : > { %3158 = vmatpush1.bf16.msra.mxu0 %v5713_v23  ;;  %v5785_v23 = vld [vmem:[#allocation16 + $0x1a0] ss:$8 sps:$4 sm:$0xff]  }
 0x4c0   : > { %3159 = vmatprep.subr.bf16.mxu0 %v5721_v25  ;;  %v5793_v25 = vld [vmem:[#allocation16 + $0x1b4] ss:$8 sps:$4 sm:$0xff]  }
 0x4c3   : > { %3160 = vmatpush1.bf16.msra.mxu0 %v5719_v31  ;;  %v5791_v31 = vld [vmem:[#allocation16 + $0x1b0] ss:$8 sps:$4 sm:$0xff]  }
 0x4c4   : > { %3615 = vmatprep.subr.bf16.mxu0 %v5727_v37  ;;  %v5799_v37 = vld [vmem:[#allocation16 + $0x1c4] ss:$8 sps:$4 sm:$0xff]  }
 0x559   : > { %v2673_v45 = vpop.f32.mrb[20].mxu0 }
 0x55a   : > { %v2674_v46 = vadd.f32 %v2673_v45, %v2415_v40  ;;  %v2675_v35 = vpop.f32.mrb[21].mxu0  ;;  %v5797_v40 = vld [vmem:[#allocation16 + $0x1c0] ss:$8 sps:$4 sm:$0xff]   ;;  %v5805_v45 = vld [vmem:[#allocation16 + $0x1d4] ss:$8 sps:$4 sm:$0xff]  }
 0x55b   : > { %v2676_v39 = vadd.f32 %v2675_v35, %v2419_v42  ;;  %v2677_v8 = vpop.f32.mrb[22].mxu0  ;;  %v5802_v42 = vld [vmem:[#allocation16 + $0xd4] ss:$8 sps:$4 sm:$0xff]   ;;  %v5803_v35 = vld [vmem:[#allocation16 + $0x1d0] ss:$8 sps:$4 sm:$0xff]  }
 0x55c   : > { %v2678_v47 = vpop.f32.mrb[23].mxu0  ;;  %v2680_v51 = vpack.c.bf16 %v2674_v46, %v2674_v46  ;;  %v5800_v46 = vld [vmem:[#allocation16 + $0xd0] ss:$8 sps:$4 sm:$0xff]   ;;  %v5811_v8 = vld [vmem:[#allocation16 + $0x1e4] ss:$8 sps:$4 sm:$0xff]  }
 0x55d   : > { %v2681_v48 = vpack.c.bf16 %v2676_v39, %v2676_v39  ;;  %v5808_v39 = vld [vmem:[#allocation16 + $0xe4] ss:$8 sps:$4 sm:$0xff]   ;;  %v5806_v47 = vld [vmem:[#allocation16 + $0xe0] ss:$8 sps:$4 sm:$0xff]  }
 0x55f   : > { %3120 = vmatprep.mubr.bf16.mxu1 %v2681_v48  ;;  %3161 = vmatprep.mubr.bf16.mxu0 %v2681_v48  ;;  %v5809_v48 = vld [vmem:[#allocation16 + $0x1e0] ss:$8 sps:$4 sm:$0xff]  }
 0x560   : > { %3121 = vmatmul.mubr.bf16.vlgmr.msra.gmra.mrb[48].mxu1 %v2680_v51  ;;  %3162 = vmatmul.mubr.bf16.vlgmr.msra.gmra.mrb[24].mxu0 %v2680_v51  ;;  %v5812_v51 = vld [vmem:[#allocation16 + $0xf0] ss:$8 sps:$4 sm:$0xff]  }
 0x561   : > { %3575 = vmatpush1.bf16.msra.mxu1 %v5722_v50  ;;  %3616 = vmatpush1.bf16.msra.mxu0 %v5725_v62  ;;  %v5814_v50 = vld [vmem:[#allocation16 + $0xf4] ss:$8 sps:$4 sm:$0xff]  }
 0x562   : > { %3576 = vmatprep.subr.bf16.mxu1 %v5730_v53  ;;  %3617 = vmatprep.subr.bf16.mxu0 %v5733_v21  ;;  %v5817_v62 = vld [vmem:[#allocation16 + $0x1f4] ss:$8 sps:$4 sm:$0xff]   ;;  %v5815_v53 = vld [vmem:[#allocation16 + $0x1f0] ss:$8 sps:$4 sm:$0xff]  }
 0x563   : > { %v2746_v21 = vld [vmem:[%s7361_s4] sm:$0xf]  ;;  %s7365_s4 = sld [smem:[#allocation39_spill]] }
 0x565   : > { %3577 = vmatpush1.bf16.msra.mxu1 %v5728_v26  ;;  %3618 = vmatpush1.bf16.msra.mxu0 %v5731_v43  ;;  %v2751_v26 = vrot.slane %v2746_v21, %v6930_v34  ;;  %v2759_v43 = vrot.slane %v2746_v21, %v7063_v30 }
 0x566   : > { %3578 = vmatprep.subr.bf16.mxu1 %v5736_v54  ;;  %3619 = vmatprep.subr.bf16.mxu0 %v5739_v55  ;;  %v2755_v54 = vrot.slane %v2746_v21, %v6933_v36  ;;  %v2763_v55 = vrot.slane %v2746_v21, %v7066_v32  ;;  %v5836_v21 = vld [vmem:[#allocation17 + $0x90] ss:$24 sps:$4 sm:$0xff]  }
 0x569   : > { %3579 = vmatpush1.bf16.msra.mxu1 %v5734_v56  ;;  %3620 = vmatpush1.bf16.msra.mxu0 %v5737_v5 }
 0x56a   : > { %3580 = vmatprep.subr.bf16.mxu1 %v5742_v57  ;;  %3621 = vmatprep.subr.bf16.mxu0 %v5745_v18 }
 0x56d   : > { %3581 = vmatpush1.bf16.msra.mxu1 %v5740_v58  ;;  %3622 = vmatpush1.bf16.msra.mxu0 %v5743_v19 }
 0x56e   : > { %3582 = vmatprep.subr.bf16.mxu1 %v5748_v59  ;;  %3623 = vmatprep.subr.bf16.mxu0 %v5751_v60 }
 0x571   : > { %3583 = vmatpush1.bf16.msra.mxu1 %v5746_v63  ;;  %3624 = vmatpush1.bf16.msra.mxu0 %v5749_v0 }
 0x572   : > { %3584 = vmatprep.subr.bf16.mxu1 %v5754_v1  ;;  %3625 = vmatprep.subr.bf16.mxu0 %v5757_v11 }
 0x575   : > { %3585 = vmatpush1.bf16.msra.mxu1 %v5752_v2  ;;  %3626 = vmatpush1.bf16.msra.mxu0 %v5755_v3 }
 0x576   : > { %3586 = vmatprep.subr.bf16.mxu1 %v5760_v10  ;;  %3627 = vmatprep.subr.bf16.mxu0 %v5763_v22 }
 0x579   : > { %3587 = vmatpush1.bf16.msra.mxu1 %v5758_v49  ;;  %3628 = vmatpush1.bf16.msra.mxu0 %v5761_v52 }
 0x57a   : > { %3588 = vmatprep.subr.bf16.mxu1 %v5766_v24  ;;  %3629 = vmatprep.subr.bf16.mxu0 %v5769_v41 }
 0x57d   : > { %3589 = vmatpush1.bf16.msra.mxu1 %v5764_v20  ;;  %3630 = vmatpush1.bf16.msra.mxu0 %v5767_v12  ;;  %v3242_v20 = vld [vmem:[%s7362_s11] sm:$0x3]  ;;  %s7197_s11 = scalar_lea.vmem [#allocation19], %s5257_s17  ;;  %s6299_s17 = sshll.u32 %s6401_s20, 4  ;;  %s6300_s17 = int_to_ptr.vmem [resolvable:$false] %s6299_s17 }
 0x57e   : > { %3590 = vmatprep.subr.bf16.mxu1 %v5772_v13  ;;  %3631 = vmatprep.subr.bf16.mxu0 %v5775_v28  ;;  %v3247_v12 = vrot.slane %v3242_v20, %v6930_v34  ;;  %v3251_v13 = vrot.slane %v3242_v20, %v6933_v36  ;;  %v5875_v20 = vld [vmem:[#allocation17 + $0x1b8] ss:$24 sps:$4 sm:$0xff]   ;;  %s4620_s26 = sshll.u32 %s7197_s11, 4  ;;  %s6301_s12 = scalar_lea.vmem %s6300_s17, 1536  ;;  %s7233_s26 = int_to_ptr.vmem [resolvable:$true] %s4620_s26 }
 0x57f   : > { %p6302_p9 = scmp.lt.s32.totalorder %s7233_s26, %s6300_s17 }
 0x581   : > { %3591 = vmatpush1.bf16.msra.mxu1 %v5770_v7  ;;  %3632 = vmatpush1.bf16.msra.mxu0 %v5773_v9 }
 0x582   : > { %3592 = vmatprep.subr.bf16.mxu1 %v5778_v4  ;;  %3633 = vmatprep.subr.bf16.mxu0 %v5781_v29 }
 0x585   : > { %3593 = vmatpush1.bf16.msra.mxu1 %v5776_v14  ;;  %3634 = vmatpush1.bf16.msra.mxu0 %v5779_v17 }
 0x586   : > { %3594 = vmatprep.subr.bf16.mxu1 %v5784_v6  ;;  %3635 = vmatprep.subr.bf16.mxu0 %v5787_v15 }
 0x589   : > { %3595 = vmatpush1.bf16.msra.mxu1 %v5782_v16  ;;  %3636 = vmatpush1.bf16.msra.mxu0 %v5785_v23 }
 0x58a   : > { %3596 = vmatprep.subr.bf16.mxu1 %v5790_v61  ;;  %3637 = vmatprep.subr.bf16.mxu0 %v5793_v25  ;;  %v6011_v25 = vld [vmem:[%s6822_s30] sm:$0xff] }
 0x58d   : > { %3597 = vmatpush1.bf16.msra.mxu1 %v5788_v27  ;;  %3638 = vmatpush1.bf16.msra.mxu0 %v5791_v31  ;;  %v6012_v31 = vld [vmem:[%s6822_s30 + $0x8] sm:$0xff]  ;;  %s7366_s30 = sld [smem:[#allocation40_spill]] }
 0x58e   : > { %3598 = vmatprep.subr.bf16.mxu1 %v5796_v44  ;;  %3639 = vmatprep.subr.bf16.mxu0 %v5799_v37 }
 0x591   : > { %3599 = vmatpush1.bf16.msra.mxu1 %v5794_v38  ;;  %3640 = vmatpush1.bf16.msra.mxu0 %v5797_v40  ;;  %v5818_v38 = vld [vmem:[#allocation17] ss:$24 sps:$4 sm:$0xff]   ;;  %v5820_v40 = vld [vmem:[#allocation17 + $0x4] ss:$24 sps:$4 sm:$0xff]  }
 0x592   : > { %3600 = vmatprep.subr.bf16.mxu1 %v5802_v42  ;;  %3641 = vmatprep.subr.bf16.mxu0 %v5805_v45  ;;  %v5821_v42 = vld [vmem:[#allocation17 + $0x8] ss:$24 sps:$4 sm:$0xff]   ;;  %v5823_v45 = vld [vmem:[#allocation17 + $0xc] ss:$24 sps:$4 sm:$0xff]  }
 0x595   : > { %3601 = vmatpush1.bf16.msra.mxu1 %v5800_v46  ;;  %3642 = vmatpush1.bf16.msra.mxu0 %v5803_v35  ;;  %v5826_v46 = vld [vmem:[#allocation17 + $0x34] ss:$24 sps:$4 sm:$0xff]  }
 0x596   : > { %3602 = vmatprep.subr.bf16.mxu1 %v5808_v39  ;;  %3643 = vmatprep.subr.bf16.mxu0 %v5811_v8  ;;  %v5829_v35 = vld [vmem:[#allocation17 + $0x3c] ss:$24 sps:$4 sm:$0xff]   ;;  %v5824_v39 = vld [vmem:[#allocation17 + $0x30] ss:$24 sps:$4 sm:$0xff]  }
 0x597   : > { %v5827_v8 = vld [vmem:[#allocation17 + $0x38] ss:$24 sps:$4 sm:$0xff]  }
 0x599   : > { %3603 = vmatpush1.bf16.msra.mxu1 %v5806_v47  ;;  %3644 = vmatpush1.bf16.msra.mxu0 %v5809_v48  ;;  %v5832_v47 = vld [vmem:[#allocation17 + $0x64] ss:$24 sps:$4 sm:$0xff]  }
 0x59a   : > { %3604 = vmatprep.subr.bf16.mxu1 %v5814_v50  ;;  %3645 = vmatprep.subr.bf16.mxu0 %v5817_v62  ;;  %v5835_v48 = vld [vmem:[#allocation17 + $0x6c] ss:$24 sps:$4 sm:$0xff]   ;;  %v5830_v50 = vld [vmem:[#allocation17 + $0x60] ss:$24 sps:$4 sm:$0xff]  }
 0x59b   : > { %v5833_v62 = vld [vmem:[#allocation17 + $0x68] ss:$24 sps:$4 sm:$0xff]  }
 0x59d   : > { %3605 = vmatpush1.bf16.msra.mxu1 %v5812_v51  ;;  %3646 = vmatpush1.bf16.msra.mxu0 %v5815_v53  ;;  %v5838_v51 = vld [vmem:[#allocation17 + $0x94] ss:$24 sps:$4 sm:$0xff]  }
 0x59e   : > { %4313 = vmatprep.subr.bf16.mxu1 %v5820_v40  ;;  %4354 = vmatprep.subr.bf16.mxu0 %v5823_v45  ;;  %v5841_v53 = vld [vmem:[#allocation17 + $0x9c] ss:$24 sps:$4 sm:$0xff]   ;;  %v5899_v45 = vld [vmem:[#allocation17 + $0x278] ss:$24 sps:$4 sm:$0xff]  }
 0x59f   : > { %v5901_v40 = vld [vmem:[#allocation17 + $0x27c] ss:$24 sps:$4 sm:$0xff]  }
 0x633   : > { %v3122_v56 = vpop.f32.mrb[48].mxu1  ;;  %v3163_v5 = vpop.f32.mrb[24].mxu0 }
 0x634   : > { %v3123_v57 = vadd.f32 %v3122_v56, %v2751_v26  ;;  %v3164_v18 = vadd.f32 %v3163_v5, %v2759_v43  ;;  %v3124_v58 = vpop.f32.mrb[49].mxu1  ;;  %v3165_v19 = vpop.f32.mrb[25].mxu0  ;;  %v5839_v26 = vld [vmem:[#allocation17 + $0x98] ss:$24 sps:$4 sm:$0xff]   ;;  %v5844_v43 = vld [vmem:[#allocation17 + $0xc4] ss:$24 sps:$4 sm:$0xff]  }
 0x635   : > { %v3125_v59 = vadd.f32 %v3124_v58, %v2755_v54  ;;  %v3166_v60 = vadd.f32 %v3165_v19, %v2763_v55  ;;  %v3126_v63 = vpop.f32.mrb[50].mxu1  ;;  %v3167_v0 = vpop.f32.mrb[26].mxu0  ;;  %v5847_v54 = vld [vmem:[#allocation17 + $0xcc] ss:$24 sps:$4 sm:$0xff]   ;;  %v5842_v55 = vld [vmem:[#allocation17 + $0xc0] ss:$24 sps:$4 sm:$0xff]  }
 0x636   : > { %v3170_v1 = vmax.f32 %v3123_v57, 0.0  ;;  %v3172_v11 = vmax.f32 %v3164_v18, 0.0  ;;  %v3127_v2 = vpop.f32.mrb[51].mxu1  ;;  %v3168_v3 = vpop.f32.mrb[27].mxu0  ;;  %v5845_v56 = vld [vmem:[#allocation17 + $0xc8] ss:$24 sps:$4 sm:$0xff]  }
 0x637   : > { %v3171_v10 = vmax.f32 %v3125_v59, 0.0  ;;  %v3173_v22 = vmax.f32 %v3166_v60, 0.0  ;;  %v5850_v5 = vld [vmem:[#allocation17 + $0xf4] ss:$24 sps:$4 sm:$0xff]   ;;  %v5848_v18 = vld [vmem:[#allocation17 + $0xf0] ss:$24 sps:$4 sm:$0xff]  }
 0x638   : > { %v3174_v24 = vpack.c.bf16 %v3170_v1, %v3170_v1  ;;  %v3176_v41 = vpack.c.bf16 %v3172_v11, %v3172_v11  ;;  %v5853_v57 = vld [vmem:[#allocation17 + $0xfc] ss:$24 sps:$4 sm:$0xff]   ;;  %v5851_v58 = vld [vmem:[#allocation17 + $0xf8] ss:$24 sps:$4 sm:$0xff]   ;;  %v5859_v59 = vld [vmem:[#allocation17 + $0x12c] ss:$24 sps:$4 sm:$0xff]  }
 0x639   : > { %v3175_v49 = vpack.c.bf16 %v3171_v10, %v3171_v10  ;;  %v3177_v52 = vpack.c.bf16 %v3173_v22, %v3173_v22  ;;  %v5856_v19 = vld [vmem:[#allocation17 + $0x124] ss:$24 sps:$4 sm:$0xff]   ;;  %v5854_v60 = vld [vmem:[#allocation17 + $0x120] ss:$24 sps:$4 sm:$0xff]   ;;  %v5862_v0 = vld [vmem:[#allocation17 + $0x154] ss:$24 sps:$4 sm:$0xff]  }
 0x63a   : > { %v5857_v63 = vld [vmem:[#allocation17 + $0x128] ss:$24 sps:$4 sm:$0xff]   ;;  %v5865_v1 = vld [vmem:[#allocation17 + $0x15c] ss:$24 sps:$4 sm:$0xff]   ;;  %v5863_v2 = vld [vmem:[#allocation17 + $0x158] ss:$24 sps:$4 sm:$0xff]  }
 0x63b   : > { %3606 = vmatprep.mubr.bf16.mxu1 %v3175_v49  ;;  %3647 = vmatprep.mubr.bf16.mxu0 %v3177_v52  ;;  %v5860_v11 = vld [vmem:[#allocation17 + $0x150] ss:$24 sps:$4 sm:$0xff]   ;;  %v5868_v3 = vld [vmem:[#allocation17 + $0x184] ss:$24 sps:$4 sm:$0xff]   ;;  %v5866_v22 = vld [vmem:[#allocation17 + $0x180] ss:$24 sps:$4 sm:$0xff]  }
 0x63c   : > { %3607 = vmatmul.mubr.bf16.vlgmr.msra.gmra.mrb[52].mxu1 %v3174_v24  ;;  %3648 = vmatmul.mubr.bf16.vlgmr.msra.gmra.mrb[28].mxu0 %v3176_v41  ;;  %v5871_v10 = vld [vmem:[#allocation17 + $0x18c] ss:$24 sps:$4 sm:$0xff]   ;;  %v5869_v49 = vld [vmem:[#allocation17 + $0x188] ss:$24 sps:$4 sm:$0xff]   ;;  %v5877_v24 = vld [vmem:[#allocation17 + $0x1bc] ss:$24 sps:$4 sm:$0xff]  }
 0x63d   : > { %4314 = vmatpush1.bf16.msra.mxu1 %v5818_v38  ;;  %4355 = vmatpush1.bf16.msra.mxu0 %v5821_v42  ;;  %v5874_v52 = vld [vmem:[#allocation17 + $0x1b4] ss:$24 sps:$4 sm:$0xff]   ;;  %v5872_v41 = vld [vmem:[#allocation17 + $0x1b0] ss:$24 sps:$4 sm:$0xff]  }
 0x63e   : > { %4315 = vmatprep.subr.bf16.mxu1 %v5826_v46  ;;  %4356 = vmatprep.subr.bf16.mxu0 %v5829_v35  ;;  %v5898_v38 = vld [vmem:[#allocation17 + $0x274] ss:$24 sps:$4 sm:$0xff]   ;;  %v5896_v42 = vld [vmem:[#allocation17 + $0x270] ss:$24 sps:$4 sm:$0xff]   ;;  %v5904_v46 = vld [vmem:[#allocation17 + $0x2a4] ss:$24 sps:$4 sm:$0xff]  }
 0x63f   : > { %v5907_v35 = vld [vmem:[#allocation17 + $0x2ac] ss:$24 sps:$4 sm:$0xff]  }
 0x641   : > { %4316 = vmatpush1.bf16.msra.mxu1 %v5824_v39  ;;  %4357 = vmatpush1.bf16.msra.mxu0 %v5827_v8  ;;  %v5902_v39 = vld [vmem:[#allocation17 + $0x2a0] ss:$24 sps:$4 sm:$0xff]  }
 0x642   : > { %4317 = vmatprep.subr.bf16.mxu1 %v5832_v47  ;;  %4358 = vmatprep.subr.bf16.mxu0 %v5835_v48  ;;  %v5905_v8 = vld [vmem:[#allocation17 + $0x2a8] ss:$24 sps:$4 sm:$0xff]   ;;  %v5910_v47 = vld [vmem:[#allocation17 + $0x2d4] ss:$24 sps:$4 sm:$0xff]  }
 0x643   : > { %v5913_v48 = vld [vmem:[#allocation17 + $0x2dc] ss:$24 sps:$4 sm:$0xff]  }
 0x645   : > { %4318 = vmatpush1.bf16.msra.mxu1 %v5830_v50  ;;  %4359 = vmatpush1.bf16.msra.mxu0 %v5833_v62  ;;  %v5908_v50 = vld [vmem:[#allocation17 + $0x2d0] ss:$24 sps:$4 sm:$0xff]  }
 0x646   : > { %4319 = vmatprep.subr.bf16.mxu1 %v5838_v51  ;;  %4360 = vmatprep.subr.bf16.mxu0 %v5841_v53  ;;  %v5911_v62 = vld [vmem:[#allocation17 + $0x2d8] ss:$24 sps:$4 sm:$0xff]   ;;  %v5916_v51 = vld [vmem:[#allocation17 + $0x14] ss:$24 sps:$4 sm:$0xff]  }
 0x649   : > { %4320 = vmatpush1.bf16.msra.mxu1 %v5836_v21  ;;  %4361 = vmatpush1.bf16.msra.mxu0 %v5839_v26 }
 0x64a   : > { %4321 = vmatprep.subr.bf16.mxu1 %v5844_v43  ;;  %4362 = vmatprep.subr.bf16.mxu0 %v5847_v54  ;;  %v3658_v43 = vld [vmem:[%s7363_s0] sm:$0x3]  ;;  %s6295_s0 = scalar_lea.vmem %s7233_s26, 768 }
 0x64b   : > { %v3659_v54 = vld [vmem:[%s7364_s29] sm:$0x3]  ;;  %s5258_s29 = smul.u32 768, %s6528_s3  ;;  %s4606_s3 = scalar_lea.sflag [#allocation4], %s6818_s5 }
 0x64c   : > { %p6296_p12 = scmp.ne.s32.totalorder %s7233_s26, %s6295_s0  ;;  %p6303_p4 = scmp.lt.s32.totalorder %s6301_s12, %s6295_s0 }
 0x64d   : > { %4322 = vmatpush1.bf16.msra.mxu1 %v5842_v55  ;;  %4363 = vmatpush1.bf16.msra.mxu0 %v5845_v56  ;;  %v3681_v55 = vrot.slane %v3658_v43, %v6930_v34  ;;  %v3685_v56 = vrot.slane %v3658_v43, %v6933_v36  ;;  %s7231_s6 = scalar_lea.hbm %s7368_s9, %s5258_s29 }
 0x64e   : > { %4323 = vmatprep.subr.bf16.mxu1 %v5850_v5  ;;  %4364 = vmatprep.subr.bf16.mxu0 %v5853_v57  ;;  %p6297_p3 = pnand %p6296_p12, %p7369_p13  ;;  %p6304_p8 = por %p6303_p4, %p6302_p9 }
 0x650   : > { %p6298_p6 = pneg %p6297_p3 }
 0x651   : > { %4324 = vmatpush1.bf16.msra.mxu1 %v5848_v18  ;;  %4365 = vmatpush1.bf16.msra.mxu0 %v5851_v58  ;;  %v3694_v18 = vrot.slane %v3659_v54, %v6930_v34  ;;  %v3698_v58 = vrot.slane %v3659_v54, %v6933_v36 }
 0x652   : > { %4325 = vmatprep.subr.bf16.mxu1 %v5856_v19  ;;  %4366 = vmatprep.subr.bf16.mxu0 %v5859_v59  ;;  %p6305_p0 = pnand %p6304_p8, %p6298_p6 }
 0x655   : > { %4326 = vmatpush1.bf16.msra.mxu1 %v5854_v60  ;;  %4367 = vmatpush1.bf16.msra.mxu0 %v5857_v63 }
 0x656   : > { %4327 = vmatprep.subr.bf16.mxu1 %v5862_v0  ;;  %4368 = vmatprep.subr.bf16.mxu0 %v5865_v1 }
 0x659   : > { %4328 = vmatpush1.bf16.msra.mxu1 %v5860_v11  ;;  %4369 = vmatpush1.bf16.msra.mxu0 %v5863_v2  ;;  %v5914_v11 = vld [vmem:[#allocation17 + $0x10] ss:$24 sps:$4 sm:$0xff]  }
 0x65a   : > { %4329 = vmatprep.subr.bf16.mxu1 %v5868_v3  ;;  %4370 = vmatprep.subr.bf16.mxu0 %v5871_v10  ;;  %v5919_v3 = vld [vmem:[#allocation17 + $0x44] ss:$24 sps:$4 sm:$0xff]   ;;  %v5917_v10 = vld [vmem:[#allocation17 + $0x40] ss:$24 sps:$4 sm:$0xff]  }
 0x65d   : > { %4330 = vmatpush1.bf16.msra.mxu1 %v5866_v22  ;;  %4371 = vmatpush1.bf16.msra.mxu0 %v5869_v49  ;;  %v5922_v22 = vld [vmem:[#allocation17 + $0x74] ss:$24 sps:$4 sm:$0xff]   ;;  %v5920_v49 = vld [vmem:[#allocation17 + $0x70] ss:$24 sps:$4 sm:$0xff]  }
 0x65e   : > { %4331 = vmatprep.subr.bf16.mxu1 %v5874_v52  ;;  %4372 = vmatprep.subr.bf16.mxu0 %v5877_v24  ;;  %v5925_v52 = vld [vmem:[#allocation17 + $0xa4] ss:$24 sps:$4 sm:$0xff]   ;;  %v5923_v24 = vld [vmem:[#allocation17 + $0xa0] ss:$24 sps:$4 sm:$0xff]  }
 0x661   : > { %4332 = vmatpush1.bf16.msra.mxu1 %v5872_v41  ;;  %4373 = vmatpush1.bf16.msra.mxu0 %v5875_v20  ;;  %v5928_v41 = vld [vmem:[#allocation17 + $0xd4] ss:$24 sps:$4 sm:$0xff]   ;;  %v5926_v20 = vld [vmem:[#allocation17 + $0xd0] ss:$24 sps:$4 sm:$0xff]  }
 0x70f   : > { %v3608_v28 = vpop.f32.mrb[52].mxu1  ;;  %v3649_v7 = vpop.f32.mrb[28].mxu0 }
 0x710   : > { %v3609_v9 = vadd.f32 %v3608_v28, %v3247_v12  ;;  %v3610_v4 = vpop.f32.mrb[53].mxu1  ;;  %v3651_v29 = vpop.f32.mrb[29].mxu0  ;;  %v5880_v12 = vld [vmem:[#allocation17 + $0x1e4] ss:$24 sps:$4 sm:$0xff]  }
 0x711   : > { %v3611_v14 = vadd.f32 %v3610_v4, %v3251_v13  ;;  %v3612_v17 = vpop.f32.mrb[54].mxu1  ;;  %v3653_v6 = vpop.f32.mrb[30].mxu0  ;;  %v5878_v13 = vld [vmem:[#allocation17 + $0x1e0] ss:$24 sps:$4 sm:$0xff]   ;;  %4333 = vmatprep.subr.bf16.mxu1 %v5880_v12  ;;  %v5931_v12 = vld [vmem:[#allocation17 + $0x104] ss:$24 sps:$4 sm:$0xff]  }
 0x712   : > { %v3650_v15 = vadd.f32 %v3649_v7, %v3609_v9  ;;  %v3613_v16 = vpop.f32.mrb[55].mxu1  ;;  %v3654_v23 = vpop.f32.mrb[31].mxu0  ;;  %4334 = vmatpush1.bf16.msra.mxu1 %v5878_v13  ;;  %v5883_v6 = vld [vmem:[#allocation17 + $0x1ec] ss:$24 sps:$4 sm:$0xff]   ;;  %v5929_v13 = vld [vmem:[#allocation17 + $0x100] ss:$24 sps:$4 sm:$0xff]  }
 0x713   : > { %v3652_v61 = vadd.f32 %v3651_v29, %v3611_v14  ;;  %4374 = vmatprep.subr.bf16.mxu0 %v5883_v6  ;;  %v5886_v16 = vld [vmem:[#allocation17 + $0x214] ss:$24 sps:$4 sm:$0xff]   ;;  %v5884_v23 = vld [vmem:[#allocation17 + $0x210] ss:$24 sps:$4 sm:$0xff]   ;;  %v5941_v6 = vld [vmem:[#allocation17 + $0x1c0] ss:$24 sps:$4 sm:$0xff]  }
 0x714   : > { %v7135_v27 = vadd.f32 %v6011_v25, %v3650_v15  ;;  %v5881_v15 = vld [vmem:[#allocation17 + $0x1e8] ss:$24 sps:$4 sm:$0xff]   ;;  %v5889_v25 = vld [vmem:[#allocation17 + $0x21c] ss:$24 sps:$4 sm:$0xff]   ;;  %4335 = vmatprep.subr.bf16.mxu1 %v5886_v16 }
 0x715   : > { %v7138_v44 = vadd.f32 %v6012_v31, %v3652_v61  ;;  %4375 = vmatpush1.bf16.msra.mxu0 %v5881_v15  ;;  %v5887_v61 = vld [vmem:[#allocation17 + $0x218] ss:$24 sps:$4 sm:$0xff]   ;;  %v5892_v31 = vld [vmem:[#allocation17 + $0x244] ss:$24 sps:$4 sm:$0xff]   ;;  %v5946_v15 = vld [vmem:[#allocation17 + $0x1f4] ss:$24 sps:$4 sm:$0xff]  }
 0x716   : > { %4336 = vmatpush1.bf16.msra.mxu1 %v5884_v23  ;;  %4376 = vmatprep.subr.bf16.mxu0 %v5889_v25  ;;  %v5944_v16 = vld [vmem:[#allocation17 + $0x1f0] ss:$24 sps:$4 sm:$0xff]   ;;  %v5949_v23 = vld [vmem:[#allocation17 + $0x224] ss:$24 sps:$4 sm:$0xff]   ;;  %v5952_v25 = vld [vmem:[#allocation17 + $0x254] ss:$24 sps:$4 sm:$0xff]  }
 0x717   : > { %v3660_v37 = vadd.f32 %v7138_v44, %v7135_v27  ;;  %4337 = vmatprep.subr.bf16.mxu1 %v5892_v31  ;;  %v5950_v31 = vld [vmem:[#allocation17 + $0x250] ss:$24 sps:$4 sm:$0xff]  }
 0x719   : > { %3661 = vadd.xlane.f32.xlu0 %v3660_v37  ;;  %4377 = vmatpush1.bf16.msra.mxu0 %v5887_v61  ;;  %v5893_v37 = vld [vmem:[#allocation17 + $0x248] ss:$24 sps:$4 sm:$0xff]  }
 0x71a   : > { %v5947_v61 = vld [vmem:[#allocation17 + $0x220] ss:$24 sps:$4 sm:$0xff]  }
 0x7a6   : > { %v3662_v28 = vpop.xlane.xlu0 %3661 }
 0x7a7   : > { %v3664_v7 = vmul.f32 0.00390625, %v3662_v28  ;;  %v5934_v28 = vld [vmem:[#allocation17 + $0x134] ss:$24 sps:$4 sm:$0xff]  }
 0x7a9   : > { %v7143_v9 = vsub.f32 %v7135_v27, %v3664_v7  ;;  %v3666_v4 = vsub.f32 %v7138_v44, %v3664_v7  ;;  %v5890_v27 = vld [vmem:[#allocation17 + $0x240] ss:$24 sps:$4 sm:$0xff]   ;;  %v5895_v44 = vld [vmem:[#allocation17 + $0x24c] ss:$24 sps:$4 sm:$0xff]   ;;  %v5932_v7 = vld [vmem:[#allocation17 + $0x130] ss:$24 sps:$4 sm:$0xff]  }
 0x7aa   : > { %4378 = vmatprep.subr.bf16.mxu0 %v5895_v44  ;;  %4338 = vmatpush1.bf16.msra.mxu1 %v5890_v27  ;;  %v5955_v27 = vld [vmem:[#allocation17 + $0x284] ss:$24 sps:$4 sm:$0xff]   ;;  %v5953_v44 = vld [vmem:[#allocation17 + $0x280] ss:$24 sps:$4 sm:$0xff]  }
 0x7ab   : > { %v3667_v29 = vmul.f32 %v7143_v9, %v7143_v9  ;;  %v3668_v14 = vmul.f32 %v3666_v4, %v3666_v4  ;;  %4379 = vmatpush1.bf16.msra.mxu0 %v5893_v37  ;;  %4339 = vmatprep.subr.bf16.mxu1 %v5898_v38  ;;  %v5958_v37 = vld [vmem:[#allocation17 + $0x2b4] ss:$24 sps:$4 sm:$0xff]   ;;  %v5956_v38 = vld [vmem:[#allocation17 + $0x2b0] ss:$24 sps:$4 sm:$0xff]  }
 0x7ac   : > { %4380 = vmatprep.subr.bf16.mxu0 %v5901_v40  ;;  %v5961_v40 = vld [vmem:[#allocation17 + $0x2e4] ss:$24 sps:$4 sm:$0xff]  }
 0x7ad   : > { %v3669_v17 = vadd.f32 %v3668_v14, %v3667_v29  ;;  %v5940_v29 = vld [vmem:[#allocation17 + $0x194] ss:$24 sps:$4 sm:$0xff]   ;;  %v5938_v14 = vld [vmem:[#allocation17 + $0x190] ss:$24 sps:$4 sm:$0xff]  }
 0x7ae   : > { %4340 = vmatpush1.bf16.msra.mxu1 %v5896_v42  ;;  %v5959_v42 = vld [vmem:[#allocation17 + $0x2e0] ss:$24 sps:$4 sm:$0xff]  }
 0x7af   : > { %3670 = vadd.xlane.f32.xlu0 %v3669_v17  ;;  %4381 = vmatpush1.bf16.msra.mxu0 %v5899_v45  ;;  %v5943_v17 = vld [vmem:[#allocation17 + $0x1c4] ss:$24 sps:$4 sm:$0xff]  }
 0x7b0   : > { %4341 = vmatprep.subr.bf16.mxu1 %v5904_v46  ;;  %4382 = vmatprep.subr.bf16.mxu0 %v5907_v35  ;;  %v3801_v45 = vld [vmem:[%s7365_s4] sm:$0x3f] }
 0x7b1   : > { %v3806_v46 = vrot.slane %v3801_v45, %v6930_v34  ;;  %v3814_v35 = vrot.slane %v3801_v45, %v7063_v30  ;;  %v3821_v30 = vsub.s32 4, %v6927_v33 }
 0x7b2   : > { %4342 = vmatpush1.bf16.msra.mxu1 %v5902_v39 }
 0x7b3   : > { %4383 = vmatpush1.bf16.msra.mxu0 %v5905_v8  ;;  %4343 = vmatprep.subr.bf16.mxu1 %v5910_v47 }
 0x7b4   : > { %4384 = vmatprep.subr.bf16.mxu0 %v5913_v48 }
 0x7b6   : > { %4344 = vmatpush1.bf16.msra.mxu1 %v5908_v50  ;;  %v3810_v50 = vrot.slane %v3801_v45, %v6933_v36 }
 0x7b7   : > { %4385 = vmatpush1.bf16.msra.mxu0 %v5911_v62  ;;  %4395 = vmatprep.subr.bf16.mxu1 %v5916_v51 }
 0x83c   : > { %v3671_v53 = vpop.xlane.xlu0 %3670 }
 0x83d   : > { %v3672_v21 = vmul.f32 0.00390625, %v3671_v53 }
 0x83f   : > { %v3673_v26 = vadd.f32 1e-05, %v3672_v21 }
 0x841   : > { %5994 = vrsqrt.f32 %v3673_v26 }
 0x84b   : > { %v5995_v5 = vpop.eup %5994 }
 0x84c   : > { %v3676_v57 = vmul.f32 %v5995_v5, %v3666_v4  ;;  %v3675_v19 = vmul.f32 %v5995_v5, %v7143_v9  ;;  %v5937_v9 = vld [vmem:[#allocation17 + $0x164] ss:$24 sps:$4 sm:$0xff]   ;;  %v5935_v4 = vld [vmem:[#allocation17 + $0x160] ss:$24 sps:$4 sm:$0xff]   ;;  %v3822_v5 = vrot.slane %v3801_v45, %v3821_v30 }
 0x84e   : > { %v3689_v59 = vmul.f32 %v3685_v56, %v3676_v57  ;;  %v3688_v60 = vmul.f32 %v3681_v55, %v3675_v19  ;;  %v3818_v55 = vrot.slane %v3801_v45, %v7066_v32  ;;  %v3825_v56 = vsub.s32 5, %v6927_v33 }
 0x850   : > { %v3702_v63 = vadd.f32 %v3698_v58, %v3689_v59  ;;  %v3701_v0 = vadd.f32 %v3694_v18, %v3688_v60  ;;  %v3826_v36 = vrot.slane %v3801_v45, %v3825_v56  ;;  %v5200_v45 = vld [vmem:[%s7366_s30] ss:$0 sm:$0xff] }
 0x852   : > { %v3704_v1 = vpack.c.bf16 %v3702_v63, %v3702_v63  ;;  %v7159_v2 = vpack.c.bf16 %v3701_v0, %v3701_v0 }
 0x854   : > { %4345 = vmatprep.mubr.bf16.mxu1 %v3704_v1  ;;  %4386 = vmatprep.mubr.bf16.mxu0 %v3704_v1 }
 0x855   : > { %4346 = vmatmul.mubr.bf16.vlgmr.msra.gmra.mrb[56].mxu1 %v7159_v2  ;;  %4387 = vmatmul.mubr.bf16.vlgmr.msra.gmra.mrb[32].mxu0 %v7159_v2 }
 0x856   : > { %4396 = vmatpush1.bf16.msra.mxu1 %v5914_v11  ;;  %4427 = vmatprep.mubr.bf16.mxu1 %v3704_v1 }
 0x857   : > { %4397 = vmatprep.subr.bf16.mxu1 %v5919_v3 }
 0x85a   : > { %4398 = vmatpush1.bf16.msra.mxu1 %v5917_v10 }
 0x85b   : > { %4399 = vmatprep.subr.bf16.mxu1 %v5922_v22 }
 0x85e   : > { %4400 = vmatpush1.bf16.msra.mxu1 %v5920_v49 }
 0x85f   : > { %4401 = vmatprep.subr.bf16.mxu1 %v5925_v52 }
 0x862   : > { %4402 = vmatpush1.bf16.msra.mxu1 %v5923_v24 }
 0x863   : > { %4403 = vmatprep.subr.bf16.mxu1 %v5928_v41 }
 0x866   : > { %4404 = vmatpush1.bf16.msra.mxu1 %v5926_v20 }
 0x867   : > { %4405 = vmatprep.subr.bf16.mxu1 %v5931_v12 }
 0x86a   : > { %4406 = vmatpush1.bf16.msra.mxu1 %v5929_v13 }
 0x86b   : > { %4407 = vmatprep.subr.bf16.mxu1 %v5934_v28 }
 0x86e   : > { %4408 = vmatpush1.bf16.msra.mxu1 %v5932_v7 }
 0x86f   : > { %4409 = vmatprep.subr.bf16.mxu1 %v5937_v9 }
 0x872   : > { %4410 = vmatpush1.bf16.msra.mxu1 %v5935_v4 }
 0x873   : > { %4411 = vmatprep.subr.bf16.mxu1 %v5940_v29 }
 0x876   : > { %4412 = vmatpush1.bf16.msra.mxu1 %v5938_v14 }
 0x877   : > { %4413 = vmatprep.subr.bf16.mxu1 %v5943_v17 }
 0x87a   : > { %4414 = vmatpush1.bf16.msra.mxu1 %v5941_v6 }
 0x87b   : > { %4415 = vmatprep.subr.bf16.mxu1 %v5946_v15 }
 0x87e   : > { %4416 = vmatpush1.bf16.msra.mxu1 %v5944_v16 }
 0x87f   : > { %4417 = vmatprep.subr.bf16.mxu1 %v5949_v23 }
 0x882   : > { %4418 = vmatpush1.bf16.msra.mxu1 %v5947_v61 }
 0x883   : > { %4419 = vmatprep.subr.bf16.mxu1 %v5952_v25 }
 0x886   : > { %4420 = vmatpush1.bf16.msra.mxu1 %v5950_v31 }
 0x887   : > { %4421 = vmatprep.subr.bf16.mxu1 %v5955_v27 }
 0x88a   : > { %4422 = vmatpush1.bf16.msra.mxu1 %v5953_v44 }
 0x88b   : > { %4423 = vmatprep.subr.bf16.mxu1 %v5958_v37 }
 0x88e   : > { %4424 = vmatpush1.bf16.msra.mxu1 %v5956_v38 }
 0x88f   : > { %4425 = vmatprep.subr.bf16.mxu1 %v5961_v40 }
 0x892   : > { %4426 = vmatpush1.bf16.msra.mxu1 %v5959_v42 }
 0x895   : > { %4428 = vmatmul.mubr.bf16.vlgmr.msra.gmra.mrb[60].mxu1 %v7159_v2 }
 0x928   : > { %v4347_v39 = vpop.f32.mrb[56].mxu1  ;;  %v4388_v8 = vpop.f32.mrb[32].mxu0 }
 0x929   : > { %v4348_v47 = vadd.f32 %v4347_v39, %v3806_v46  ;;  %v4389_v48 = vadd.f32 %v4388_v8, %v3814_v35  ;;  %v4349_v62 = vpop.f32.mrb[57].mxu1  ;;  %v4390_v51 = vpop.f32.mrb[33].mxu0  ;;  %v5201_v35 = vld [vmem:[%s7367_s28] ss:$0 sm:$0xff] }
 0x92a   : > { %v4351_v53 = vpop.f32.mrb[58].mxu1  ;;  %v4392_v21 = vpop.f32.mrb[34].mxu0  ;;  %v4350_v54 = vadd.f32 %v4349_v62, %v3810_v50  ;;  %v4391_v34 = vadd.f32 %v4390_v51, %v3818_v55  ;;  %v5202_v51 = vld [vmem:[%s7366_s30 + $0x1] ss:$0 sm:$0xff] }
 0x92b   : > { %v4393_v26 = vpop.f32.mrb[35].mxu0  ;;  %4495 = vadd.xlane.f32.xlu0 %v4389_v48  ;;  %v4352_v43 = vpop.f32.mrb[59].mxu1  ;;  %4438 = vadd.xlane.f32.xlu1 %v4348_v47  ;;  %v5205_v53 = vld [vmem:[%s7367_s28 + $0x2] ss:$0 sm:$0xff] }
 0x92c   : > { %v5203_v43 = vld [vmem:[%s7367_s28 + $0x1] ss:$0 sm:$0xff] }
 0x92f   : > { %4467 = vadd.xlane.f32.xlu1 %v4350_v54 }
 0x933   : > { %4523 = vadd.xlane.f32.xlu1 %v4391_v34 }
 0x968   : > { %v4429_v57 = vpop.f32.mrb[60].mxu1 }
 0x969   : > { %v4430_v18 = vadd.f32 %v4429_v57, %v3822_v5  ;;  %v4431_v58 = vpop.f32.mrb[61].mxu1 }
 0x96a   : > { %v4432_v19 = vadd.f32 %v4431_v58, %v3826_v36  ;;  %v4433_v59 = vpop.f32.mrb[62].mxu1  ;;  %v5207_v36 = vld [vmem:[%s7367_s28 + $0x3] ss:$0 sm:$0xff] }
 0x96b   : > { %v4434_v60 = vpop.f32.mrb[63].mxu1  ;;  %4551 = vadd.xlane.f32.xlu0 %v4430_v18 }
 0x96c   : > { %4579 = vadd.xlane.f32.xlu1 %v4432_v19 }
 0x9b8   : > { %v4496_v63 = vpop.xlane.xlu0 %4495  ;;  %v4439_v0 = vpop.xlane.xlu1 %4438 }
 0x9b9   : > { %v4497_v32 = vmul.f32 0.0078125, %v4496_v63  ;;  %v4441_v1 = vmul.f32 0.0078125, %v4439_v0 }
 0x9bb   : > { %v4442_v11 = vsub.f32 %v4348_v47, %v4441_v1  ;;  %v4498_v3 = vsub.f32 %v4389_v48, %v4497_v32  ;;  %v5204_v47 = vld [vmem:[%s7366_s30 + $0x2] ss:$0 sm:$0xff]  ;;  %v5208_v1 = vld [vmem:[%s7366_s30 + $0x4] ss:$0 sm:$0xff] }
 0x9bc   : > { %v4468_v2 = vpop.xlane.xlu1 %4467 }
 0x9bd   : > { %v4469_v10 = vmul.f32 0.0078125, %v4468_v2  ;;  %v4443_v22 = vmul.f32 %v4442_v11, %v4442_v11  ;;  %v4499_v24 = vmul.f32 %v4498_v3, %v4498_v3 }
 0x9bf   : > { %v4470_v33 = vsub.f32 %v4350_v54, %v4469_v10  ;;  %4444 = vadd.xlane.f32.xlu0 %v4443_v22  ;;  %v5209_v10 = vld [vmem:[%s7367_s28 + $0x4] ss:$0 sm:$0xff] }
 0x9c0   : > { %v4524_v49 = vpop.xlane.xlu1 %4523 }
 0x9c1   : > { %v4525_v52 = vmul.f32 0.0078125, %v4524_v49  ;;  %v4471_v41 = vmul.f32 %v4470_v33, %v4470_v33  ;;  %v5211_v49 = vld [vmem:[%s7367_s28 + $0x5] ss:$0 sm:$0xff] }
 0x9c3   : > { %v4526_v20 = vsub.f32 %v4391_v34, %v4525_v52  ;;  %4500 = vadd.xlane.f32.xlu0 %v4499_v24  ;;  %4472 = vadd.xlane.f32.xlu1 %v4471_v41  ;;  %v5206_v34 = vld [vmem:[%s7366_s30 + $0x3] ss:$0 sm:$0xff] }
 0x9c5   : > { %v4527_v12 = vmul.f32 %v4526_v20, %v4526_v20 }
 0x9c7   : > { %4528 = vadd.xlane.f32.xlu1 %v4527_v12 }
 0x9f8   : > { %v4552_v13 = vpop.xlane.xlu0 %4551 }
 0x9f9   : > { %v4553_v28 = vmul.f32 0.0078125, %v4552_v13  ;;  %v4580_v7 = vpop.xlane.xlu1 %4579 }
 0x9fa   : > { %v4581_v9 = vmul.f32 0.0078125, %v4580_v7 }
 0x9fb   : > { %v7173_v4 = vsub.f32 %v4430_v18, %v4553_v28 }
 0x9fc   : > { %v7175_v29 = vsub.f32 %v4432_v19, %v4581_v9 }
 0x9fd   : > { %v4555_v14 = vmul.f32 %v7173_v4, %v7173_v4 }
 0x9fe   : > { %v4583_v17 = vmul.f32 %v7175_v29, %v7175_v29 }
 0x9ff   : > { %4556 = vadd.xlane.f32.xlu0 %v4555_v14 }
 0xa00   : > { %4584 = vadd.xlane.f32.xlu1 %v4583_v17 }
 0xa4c   : > { %v4445_v6 = vpop.xlane.xlu0 %4444 }
 0xa4d   : > { %v4446_v15 = vmul.f32 0.0078125, %v4445_v6 }
 0xa4f   : > { %v4447_v16 = vadd.f32 1e-05, %v4446_v15 }
 0xa50   : > { %v4501_v23 = vpop.xlane.xlu0 %4500  ;;  %v4473_v61 = vpop.xlane.xlu1 %4472 }
 0xa51   : > { %5996 = vrsqrt.f32 %v4447_v16  ;;  %v4502_v25 = vmul.f32 0.0078125, %v4501_v23  ;;  %v4474_v31 = vmul.f32 0.0078125, %v4473_v61 }
 0xa53   : > { %v4503_v27 = vadd.f32 1e-05, %v4502_v25  ;;  %v4475_v44 = vadd.f32 1e-05, %v4474_v31 }
 0xa54   : > { %v4529_v37 = vpop.xlane.xlu1 %4528 }
 0xa55   : > { %5998 = vrsqrt.f32 %v4503_v27  ;;  %v4530_v38 = vmul.f32 0.0078125, %v4529_v37 }
 0xa56   : > { %6000 = vrsqrt.f32 %v4475_v44 }
 0xa57   : > { %v4531_v40 = vadd.f32 1e-05, %v4530_v38 }
 0xa59   : > { %6002 = vrsqrt.f32 %v4531_v40 }
 0xa5b   : > { %v5997_v42 = vpop.eup %5996 }
 0xa5c   : > { %v4449_v46 = vmul.f32 %v5997_v42, %v4442_v11 }
 0xa5e   : > { %v4456_v39 = vmul.f32 %v5200_v45, %v4449_v46 }
 0xa5f   : > { %v5999_v8 = vpop.eup %5998 }
 0xa60   : > { %v6001_v48 = vpop.eup %6000  ;;  %v4463_v50 = vadd.f32 %v5201_v35, %v4456_v39  ;;  %v4505_v62 = vmul.f32 %v5999_v8, %v4498_v3  ;;  %v5210_v3 = vld [vmem:[%s7366_s30 + $0x5] ss:$0 sm:$0xff] }
 0xa61   : > { %v4477_v21 = vmul.f32 %v6001_v48, %v4470_v33 }
 0xa62   : > { %4464 = vst [vmem:[%s7197_s11] sm:$0xff] %v4463_v50  ;;  %v4512_v26 = vmul.f32 %v5204_v47, %v4505_v62 }
 0xa63   : > { %v6003_v54 = vpop.eup %6002  ;;  %v4484_v55 = vmul.f32 %v5202_v51, %v4477_v21 }
 0xa64   : > { %v4519_v30 = vadd.f32 %v5205_v53, %v4512_v26  ;;  %v4533_v56 = vmul.f32 %v6003_v54, %v4526_v20 }
 0xa65   : > { %v4491_v5 = vadd.f32 %v5203_v43, %v4484_v55 }
 0xa66   : > { %4520 = vst [vmem:[%s7197_s11 + $0x10] sm:$0xff] %v4519_v30  ;;  %v4540_v57 = vmul.f32 %v5206_v34, %v4533_v56 }
 0xa67   : > { %4492 = vst [vmem:[%s7197_s11 + $0x8] sm:$0xff] %v4491_v5 }
 0xa68   : > { %v4547_v18 = vadd.f32 %v5207_v36, %v4540_v57 }
 0xa6a   : > { %4548 = vst [vmem:[%s7197_s11 + $0x18] sm:$0xff] %v4547_v18 }
 0xa8c   : > { %v4557_v58 = vpop.xlane.xlu0 %4556 }
 0xa8d   : > { %v4558_v19 = vmul.f32 0.0078125, %v4557_v58  ;;  %v4585_v59 = vpop.xlane.xlu1 %4584 }
 0xa8e   : > { %v4586_v60 = vmul.f32 0.0078125, %v4585_v59 }
 0xa8f   : > { %v4559_v63 = vadd.f32 1e-05, %v4558_v19 }
 0xa90   : > { %v4587_v0 = vadd.f32 1e-05, %v4586_v60 }
 0xa91   : > { %6004 = vrsqrt.f32 %v4559_v63 }
 0xa92   : > { %6006 = vrsqrt.f32 %v4587_v0 }
 0xa9b   : > { %v6005_v32 = vpop.eup %6004 }
 0xa9c   : > { %v6007_v11 = vpop.eup %6006  ;;  %v4561_v2 = vmul.f32 %v6005_v32, %v7173_v4 }
 0xa9d   : > { %v4589_v22 = vmul.f32 %v6007_v11, %v7175_v29 }
 0xa9e   : > { %v4568_v33 = vmul.f32 %v5208_v1, %v4561_v2 }
 0xa9f   : > { %v4596_v52 = vmul.f32 %v5210_v3, %v4589_v22 }
 0xaa0   : > { %v4575_v24 = vadd.f32 %v5209_v10, %v4568_v33 }
 0xaa1   : > { %v4603_v41 = vadd.f32 %v5211_v49, %v4596_v52 }
 0xaa2   : > { %4576 = vst [vmem:[%s7197_s11 + $0x20] sm:$0xff] %v4575_v24 }
 0xaa3   : > { %4604 = vst [vmem:[%s7197_s11 + $0x28] sm:$0xff] %v4603_v41 }
 0xaa4   : > { %6308 = shalt.err (!%p6305_p0)
}
 0xaa5   : > { %s6309_s5 = scalar_lea.hbm %s7231_s6, 768  ;;  %s6313_s4 = scalar_lea.hbm %s7368_s9, 1536 }
 0xaa6   : > { %p6310_p5 = scmp.ne.s32.totalorder %s7231_s6, %s6309_s5  ;;  %p6314_p10 = scmp.lt.u32.totalorder %s7231_s6, %s7368_s9 }
 0xaa7   : > { %p6315_p1 = scmp.lt.u32.totalorder %s6313_s4, %s6309_s5  ;;  %p6317_p12 = scmp.lt.u32.totalorder %s6309_s5, %s7231_s6 }
 0xaa8   : > { %p6311_p2 = pnand %p6310_p5, %p7369_p13 }
 0xaa9   : > { %p6316_p11 = por %p6315_p1, %p6314_p10 }
 0xaaa   : > { %p6312_p7 = pneg %p6311_p2 }
 0xaab   : > { %p6318_p3 = por %p6317_p12, %p6316_p11 }
 0xaad   : > { %p6319_p6 = pnand %p6318_p3, %p6312_p7 }
 0xaaf   : > { %6322 = shalt.err (!%p6319_p6)
}
 0xab0   : > { %5297 = dma.vmem_to_hbm [thread:$0]  (%p7369_p13), %s7233_s26, 768, %s7231_s6, %s4606_s3  }
 0xab1 PF: > { %s4632_s0 = sand.u32 1, %s6369_s1   ;;  %p7370_p9 = scmp.ne.s32.totalorder %s7345_s2, 0 }
 0xab2   : > { %p7371_p4 = scmp.ge.s32.totalorder %s6381_s24, 2  ;;  %s4633_s17 = scalar_lea.sflag [#allocation4], %s4632_s0 }
 0xab4   : > { %p5332_p8 = pnand %p7371_p4, %p7370_p9 }
 0xab6   : > { %6364 = dma.done.wait (!%p5332_p8), %s4633_s17, 768  }
 0xab7   : > { %6366 = vsyncadd (!%p5332_p8), %s4633_s17, 4294966528  ;;  %p38_p0 = scmp.ge.s32.totalorder %s6748_s15, 4   ;;  %s7372_s1 = smov %s6373_s22 }
 0xab8   : > { %s7373_s22 = smov %s6377_s23  ;;  %s7374_s23 = smov %s6760_s19 }
 0xab9   : > { %s7375_s24 = smov %s6748_s15  ;;  %40 = sbr.rel (!%p38_p0) target bundleno = 27 (0x1b), region = 184 }
 0xac0   :  { %4638 = vsyncpa [#allocation3], 1 }
 0xac1   :  { %4640 = vsyncpa [#allocation3 + $0x1], 1 }
 0xac2   :  { %4641 = vsyncpa [#allocation6], 1 }
 0xac3   :  { %4642 = vsyncpa [#allocation9], 1 }
 0xac4   :  { %4643 = vsyncpa [#allocation12], 1 }
 0xac5   :  { %4644 = vsyncpa [#allocation15], 1 }
 0xac6   :  { %4645 = vsyncpa [#allocation18], 1 }
 0xac7   :  { %4646 = vsyncpa [#allocation4], 1 }
 0xac8   :  { %4648 = vsyncpa [#allocation4 + $0x1], 1 }

</bundles_post_ra>
